<compile_context>
chip_gen: v7x
topology: tpu7x:2x2x1
jax: 0.10.0
libtpu: 0.0.40
codegen_flags: <defaults>
</compile_context>

<pallas_src>
import functools

import jax
import jax.numpy as jnp
import numpy as np
from jax import lax
from jax.experimental import pallas as pl
from jax.experimental.pallas import tpu as pltpu

_BN_EPS = 1e-5
_LANES = 128


def _round_up(x, m):
    return (x + m - 1) // m * m


def _pick_row_tile(ho, wo):
    """Largest divisor r of ho with r*wo <= ~2048 and (r*wo) % 8 == 0 (or r == ho)."""
    target = max(1, 2048 // max(wo, 1))
    divisors = [r for r in range(1, ho + 1) if ho % r == 0]
    valid = [r for r in divisors if (r * wo) % 8 == 0 or r == ho]
    under = [r for r in valid if r <= target]
    return max(under) if under else min(valid)


# ------------------------------ fused kernel ------------------------------
def _resblock_kernel(x_ref, w1_ref, b1_ref, w2_ref, b2_ref, o_ref,
                     h1_ref, acc1_ref, acc2_ref, *, stride, rows, wo, cp):
    # x_ref : (1, Hq, s, s, Wq, Cin)  space-to-depth view of the padded input
    #         (padded pixel (s*qi+a, s*qj+b) lives at [0, qi, a, b, qj, :]).
    # w1_ref: (9, Cin, Cp)   conv1 taps, BN1 scale folded, bf16
    # b1_ref: (1, Cp)        BN1 shift, f32
    # w2_ref: (9, Cp, Cp)    conv2 taps, BN2 scale folded, bf16
    # b2_ref: (1, Cp)        BN2 shift, f32
    # o_ref : (1, rows*wo, Cp)        one spatial row-tile of the final output
    # h1_ref: (rows+2, wo+2, Cp)      VMEM-resident conv1 tile (+row halo, +col pad)
    # acc1_ref / acc2_ref: f32 VMEM accumulators for the two convs.
    s = stride
    cin = x_ref.shape[-1]
    hrows = rows + 2                       # conv1 rows incl. conv2's row halo
    t = pl.program_id(1)
    r0 = t * rows                          # first output row of this tile

    # -------------- conv1 (BN1 scale folded) + BN1 shift + ReLU --------------
    # h1 row r (global, r in [r0-1, r0+rows]) with tap kh reads padded input
    # row s*r + kh + s; in the space-to-depth view that is
    #   qi = r0 + i + kh//s   (i = local halo row index),   a = kh % s.
    for kh in range(3):
        for kw in range(3):
            xs = x_ref[0,
                       pl.ds(r0 + kh // s, hrows),
                       kh % s,
                       kw % s,
                       pl.ds(kw // s, wo),
                       :]                                     # (hrows, wo, cin)
            part = jnp.dot(xs.reshape(hrows * wo, cin),
                           w1_ref[kh * 3 + kw],
                           preferred_element_type=jnp.float32)
            if kh == 0 and kw == 0:
                acc1_ref[...] = part
            else:
                acc1_ref[...] += part

    y1 = jnp.maximum(acc1_ref[...] + b1_ref[...], 0.0)        # (hrows*wo, cp)
    y1 = y1.reshape(hrows, wo, cp).astype(h1_ref.dtype)

    # conv2 sees zero padding around h1: border columns 0 / wo+1 and any halo
    # row that falls outside the image are kept at zero.
    zcol = jnp.zeros((hrows, 1, cp), h1_ref.dtype)
    h1_ref[:, pl.ds(0, 1), :] = zcol
    h1_ref[:, pl.ds(wo + 1, 1), :] = zcol
    h1_ref[:, pl.ds(1, wo), :] = y1

    zrow = jnp.zeros((1, wo + 2, cp), h1_ref.dtype)

    @pl.when(t == 0)
    def _():
        h1_ref[pl.ds(0, 1), :, :] = zrow            # halo row above the image

    @pl.when(t == pl.num_programs(1) - 1)
    def _():
        h1_ref[pl.ds(hrows - 1, 1), :, :] = zrow    # halo row below the image

    # ------------------- conv2 (BN2 scale folded) + BN2 shift ----------------
    for kh in range(3):
        for kw in range(3):
            hs = h1_ref[pl.ds(kh, rows), pl.ds(kw, wo), :]     # (rows, wo, cp)
            part = jnp.dot(hs.reshape(rows * wo, cp),
                           w2_ref[kh * 3 + kw],
                           preferred_element_type=jnp.float32)
            if kh == 0 and kw == 0:
                acc2_ref[...] = part
            else:
                acc2_ref[...] += part

    o_ref[0] = (acc2_ref[...] + b2_ref[...]).astype(o_ref.dtype)


# -------------------------------- wrapper --------------------------------
def resblock_fused(x_nhwc, w1, bn1, w2, bn2, *, stride, out_dtype=jnp.float32):
    """Fused 3x3 conv(+BN,+ReLU) -> 3x3 conv(+BN), inference, NHWC in / NHWC out."""
    n, h, w, cin = x_nhwc.shape
    cout = int(w1.shape[0])
    s = int(stride)
    assert s in (1, 2), "ResBlock uses stride 1 or 2"
    assert int(w1.shape[1]) == cin and int(w2.shape[1]) == cout
    ho = (h - 1) // s + 1
    wo = (w - 1) // s + 1
    cp = _round_up(cout, _LANES)

    # --- input: bf16, zero pad, space-to-depth view (free for s == 1) ---
    # Top pad of s+1 leaves room for the conv pad plus conv2's row halo; the
    # padded sizes make every (halo row, tap) the kernel reads in-bounds.
    hq = ho + 2 + 2 // s
    wq = wo + 2 // s
    hp, wp = s * hq, s * wq
    x = x_nhwc.astype(jnp.bfloat16)
    xpad = jnp.pad(x, ((0, 0), (s + 1, hp - h - (s + 1)), (1, wp - w - 1), (0, 0)))
    x6 = xpad.reshape(n, hq, s, wq, s, cin).transpose(0, 1, 2, 4, 3, 5)

    # --- weights: fold BN scale, (tap, Cin, Cout) layout, pad lane-dense ---
    def fold(wc, bn, cin_pad, cout_pad):
        c_out, c_in = int(wc.shape[0]), int(wc.shape[1])
        scale = bn["gamma"] / jnp.sqrt(bn["var"] + _BN_EPS)
        shift = bn["beta"] - bn["mean"] * scale
        km = jnp.transpose(wc, (2, 3, 1, 0)).reshape(9, c_in, c_out) * scale
        kp = jnp.zeros((9, cin_pad, cout_pad), jnp.float32).at[:, :c_in, :c_out].set(km)
        sp = jnp.zeros((1, cout_pad), jnp.float32).at[0, :c_out].set(shift)
        return kp.astype(jnp.bfloat16), sp

    w1_p, b1_p = fold(w1, bn1, cin, cp)
    w2_p, b2_p = fold(w2, bn2, cp, cp)

    rows = _pick_row_tile(ho, wo)
    grid = (n, ho // rows)
    hrows = rows + 2
    out_bytes = jnp.dtype(out_dtype).itemsize

    # VMEM budget: double-buffered in/out blocks + single-copy scratch, 2x headroom.
    est = (2 * (hq * s * s * wq * cin) * 2
           + 2 * (w1_p.size + w2_p.size) * 2 + 2 * 2 * cp * 4
           + 2 * rows * wo * cp * out_bytes
           + hrows * (wo + 2) * cp * 2
           + (hrows + rows) * wo * cp * 4)
    vmem_limit = int(min(100 * 2**20, max(32 * 2**20, 2 * est)))

    flops = 2 * n * ho * wo * 9 * (cin * cp + cp * cp)
    bytes_accessed = int(x6.size * 2 + (w1_p.size + w2_p.size) * 2
                         + n * ho * wo * cp * out_bytes)

    out = pl.pallas_call(
        functools.partial(_resblock_kernel, stride=s, rows=rows, wo=wo, cp=cp),
        out_shape=jax.ShapeDtypeStruct((n, ho * wo, cp), out_dtype),
        grid_spec=pltpu.PrefetchScalarGridSpec(
            num_scalar_prefetch=0,
            grid=grid,
            in_specs=[
                # Full (small) padded image for this batch element; revisited
                # across the row-tile axis, so it is DMA'd once per batch idx.
                pl.BlockSpec((1, hq, s, s, wq, cin),
                             lambda b, t: (b, 0, 0, 0, 0, 0)),
                pl.BlockSpec((9, cin, cp), lambda b, t: (0, 0, 0)),
                pl.BlockSpec((1, cp), lambda b, t: (0, 0)),
                pl.BlockSpec((9, cp, cp), lambda b, t: (0, 0, 0)),
                pl.BlockSpec((1, cp), lambda b, t: (0, 0)),
            ],
            out_specs=pl.BlockSpec((1, rows * wo, cp), lambda b, t: (b, t, 0)),
            scratch_shapes=[
                pltpu.VMEM((hrows, wo + 2, cp), jnp.bfloat16),   # resident h1 tile
                pltpu.VMEM((hrows * wo, cp), jnp.float32),       # conv1 accumulator
                pltpu.VMEM((rows * wo, cp), jnp.float32),        # conv2 accumulator
            ],
        ),
        compiler_params=pltpu.CompilerParams(
            # Bias megacore sharding to the batch axis: the input block is
            # indexed only by b, so sharding t across cores would double its
            # HBM reads on v7x.
            dimension_semantics=("parallel", "arbitrary"),
            vmem_limit_bytes=vmem_limit,
        ),
        cost_estimate=pl.CostEstimate(flops=flops, transcendentals=0,
                                      bytes_accessed=bytes_accessed),
    )(x6, w1_p, b1_p, w2_p, b2_p)
    return out.reshape(n, ho, wo, cp)[..., :cout]


# -------------------------------- ResBlock --------------------------------
def init_resblock_params(key, in_channels, out_channels):
    ks = jax.random.split(key, 4)

    def bn(k, c):
        kg, kb, km, kv = jax.random.split(k, 4)
        return dict(
            gamma=jax.random.uniform(kg, (c,), jnp.float32, 0.5, 1.5),
            beta=jax.random.normal(kb, (c,), jnp.float32) * 0.1,
            mean=jax.random.normal(km, (c,), jnp.float32) * 0.1,
            var=jax.random.uniform(kv, (c,), jnp.float32, 0.5, 1.5),
        )

    return dict(
        w1=jax.random.normal(ks[0], (out_channels, in_channels, 3, 3), jnp.float32) * 0.1,
        bn1=bn(ks[1], out_channels),
        w2=jax.random.normal(ks[2], (out_channels, out_channels, 3, 3), jnp.float32) * 0.1,
        bn2=bn(ks[3], out_channels),
    )


@functools.partial(jax.jit, static_argnames=("stride",))
def resblock_forward(params, x_nchw, *, stride):
    # NCHW -> NHWC, fused conv1+BN1+ReLU -> conv2+BN2, NHWC -> NCHW.
    x = jnp.transpose(x_nchw, (0, 2, 3, 1))
    y = resblock_fused(x, params["w1"], params["bn1"],
                       params["w2"], params["bn2"],
                       stride=stride, out_dtype=jnp.float32)
    return jnp.transpose(y, (0, 3, 1, 2))


# ---------------------------- pure-JAX reference ----------------------------
def _ref_conv_bn(x_nhwc, w_oihw, gamma, beta, mean, var, stride, relu):
    w_hwio = jnp.transpose(w_oihw, (2, 3, 1, 0))
    y = lax.conv_general_dilated(
        x_nhwc, w_hwio, window_strides=(stride, stride),
        padding=((1, 1), (1, 1)),
        dimension_numbers=("NHWC", "HWIO", "NHWC"))
    y = (y - mean) / jnp.sqrt(var + _BN_EPS) * gamma + beta
    return jnp.maximum(y, 0.0) if relu else y


def resblock_ref(params, x_nchw, stride):
    x = jnp.transpose(x_nchw, (0, 2, 3, 1))
    x = _ref_conv_bn(x, params["w1"], **params["bn1"], stride=stride, relu=True)
    x = _ref_conv_bn(x, params["w2"], **params["bn2"], stride=1, relu=False)
    return jnp.transpose(x, (0, 3, 1, 2))


if __name__ == "__main__":
    key = jax.random.PRNGKey(0)
    k_x, k_p1, k_p2 = jax.random.split(key, 3)

    # --- test 1: stride-2 ResBlock (downsampling residual path) ---
    N, Cin, H, W, Cout = 2, 4, 16, 16, 8
    x = jax.random.normal(k_x, (N, Cin, H, W), jnp.float32)
    params = init_resblock_params(k_p1, Cin, Cout)
    out = jax.block_until_ready(resblock_forward(params, x, stride=2))
    ref = jax.block_until_ready(resblock_ref(params, x, 2))
    assert out.shape == ref.shape, (out.shape, ref.shape)
    # bf16 operands / bf16 intermediate (f32 accumulation) vs pure-f32 reference.
    np.testing.assert_allclose(np.asarray(out), np.asarray(ref), atol=5e-2, rtol=5e-2)

    # --- test 2: stride-1 ResBlock (multi-tile path, row halo across tiles) ---
    params1 = init_resblock_params(k_p2, Cout, Cout)
    x1 = jax.random.normal(k_x, (N, Cout, H, W), jnp.float32)
    out1 = jax.block_until_ready(resblock_forward(params1, x1, stride=1))
    ref1 = jax.block_until_ready(resblock_ref(params1, x1, 1))
    assert out1.shape == ref1.shape, (out1.shape, ref1.shape)
    np.testing.assert_allclose(np.asarray(out1), np.asarray(ref1), atol=5e-2, rtol=5e-2)

    print("KERNEL_OK")
</pallas_src>

<mosaic_0001>
module attributes {stable_mosaic.version = 11 : i64} {
  func.func @_resblock_kernel(%arg0: i32, %arg1: i32, %arg2: memref<1x11x2x2x9x4xbf16, #tpu.memory_space<vmem>>, %arg3: memref<9x4x128xbf16, #tpu.memory_space<vmem>>, %arg4: memref<1x128xf32, #tpu.memory_space<vmem>>, %arg5: memref<9x128x128xbf16, #tpu.memory_space<vmem>>, %arg6: memref<1x128xf32, #tpu.memory_space<vmem>>, %arg7: memref<1x64x128xf32, #tpu.memory_space<vmem>>, %arg8: memref<10x10x128xbf16, #tpu.memory_space<vmem>>, %arg9: memref<80x128xf32, #tpu.memory_space<vmem>>, %arg10: memref<64x128xf32, #tpu.memory_space<vmem>>) attributes {dimension_semantics = [#tpu.dimension_semantics<parallel>, #tpu.dimension_semantics<arbitrary>], iteration_bounds = array<i64: 2, 1>, scalar_prefetch = 0 : i64, scratch_operands = 3 : i64, tpu.core_type = #tpu.core_type<tc>, window_params = [{transform_indices = @transform_0, window_bounds = array<i64: 1, 11, 2, 2, 9, 4>}, {pipeline_mode = #tpu.pipeline_mode<synchronous>, transform_indices = @transform_1, window_bounds = array<i64: 9, 4, 128>}, {pipeline_mode = #tpu.pipeline_mode<synchronous>, transform_indices = @transform_2, window_bounds = array<i64: 1, 128>}, {pipeline_mode = #tpu.pipeline_mode<synchronous>, transform_indices = @transform_3, window_bounds = array<i64: 9, 128, 128>}, {pipeline_mode = #tpu.pipeline_mode<synchronous>, transform_indices = @transform_4, window_bounds = array<i64: 1, 128>}, {transform_indices = @transform_5, window_bounds = array<i64: 1, 64, 128>}]} {
    %c8_i32 = arith.constant 8 : i32
    %0 = arith.muli %arg1, %c8_i32 : i32
    %c0_i32 = arith.constant 0 : i32
    %1 = arith.addi %0, %c0_i32 : i32
    %c0 = arith.constant 0 : index
    %2 = arith.index_cast %1 : i32 to index
    %c0_0 = arith.constant 0 : index
    %c0_1 = arith.constant 0 : index
    %c0_2 = arith.constant 0 : index
    %c0_3 = arith.constant 0 : index
    %3 = vector.load %arg2[%c0, %2, %c0_0, %c0_1, %c0_2, %c0_3] : memref<1x11x2x2x9x4xbf16, #tpu.memory_space<vmem>>, vector<1x10x1x1x8x4xbf16>
    %4 = vector.shape_cast %3 : vector<1x10x1x1x8x4xbf16> to vector<10x8x4xbf16>
    %5 = vector.shape_cast %4 : vector<10x8x4xbf16> to vector<80x4xbf16>
    %c0_4 = arith.constant 0 : index
    %c0_5 = arith.constant 0 : index
    %c0_6 = arith.constant 0 : index
    %6 = vector.load %arg3[%c0_4, %c0_5, %c0_6] : memref<9x4x128xbf16, #tpu.memory_space<vmem>>, vector<1x4x128xbf16>
    %7 = vector.shape_cast %6 : vector<1x4x128xbf16> to vector<4x128xbf16>
    %cst = arith.constant dense<0.000000e+00> : vector<80x128xf32>
    %8 = tpu.matmul %5, %7, %cst {dimension_numbers = #tpu.dot_dimension_numbers<[1], [0], [0], [1], [0, 0, 1, 1], [], []>} : vector<80x4xbf16>, vector<4x128xbf16>, vector<80x128xf32> -> vector<80x128xf32>
    %c0_7 = arith.constant 0 : index
    %c0_8 = arith.constant 0 : index
    %9 = vector.load %arg9[%c0_7, %c0_8] : memref<80x128xf32, #tpu.memory_space<vmem>>, vector<80x128xf32>
    tpu.vector_store %arg9[%c0_7, %c0_8], %8 {strides = array<i32>} : memref<80x128xf32, #tpu.memory_space<vmem>>, vector<80x128xf32>,
    %c0_i32_9 = arith.constant 0 : i32
    %10 = arith.addi %0, %c0_i32_9 : i32
    %c0_10 = arith.constant 0 : index
    %11 = arith.index_cast %10 : i32 to index
    %c0_11 = arith.constant 0 : index
    %c1 = arith.constant 1 : index
    %c0_12 = arith.constant 0 : index
    %c0_13 = arith.constant 0 : index
    %12 = vector.load %arg2[%c0_10, %11, %c0_11, %c1, %c0_12, %c0_13] : memref<1x11x2x2x9x4xbf16, #tpu.memory_space<vmem>>, vector<1x10x1x1x8x4xbf16>
    %13 = vector.shape_cast %12 : vector<1x10x1x1x8x4xbf16> to vector<10x8x4xbf16>
    %14 = vector.shape_cast %13 : vector<10x8x4xbf16> to vector<80x4xbf16>
    %c1_14 = arith.constant 1 : index
    %c0_15 = arith.constant 0 : index
    %c0_16 = arith.constant 0 : index
    %15 = vector.load %arg3[%c1_14, %c0_15, %c0_16] : memref<9x4x128xbf16, #tpu.memory_space<vmem>>, vector<1x4x128xbf16>
    %16 = vector.shape_cast %15 : vector<1x4x128xbf16> to vector<4x128xbf16>
    %cst_17 = arith.constant dense<0.000000e+00> : vector<80x128xf32>
    %17 = tpu.matmul %14, %16, %cst_17 {dimension_numbers = #tpu.dot_dimension_numbers<[1], [0], [0], [1], [0, 0, 1, 1], [], []>} : vector<80x4xbf16>, vector<4x128xbf16>, vector<80x128xf32> -> vector<80x128xf32>
    %c0_18 = arith.constant 0 : index
    %c0_19 = arith.constant 0 : index
    %18 = vector.load %arg9[%c0_18, %c0_19] : memref<80x128xf32, #tpu.memory_space<vmem>>, vector<80x128xf32>
    %19 = arith.addf %18, %17 : vector<80x128xf32>
    %c0_20 = arith.constant 0 : index
    %c0_21 = arith.constant 0 : index
    %20 = vector.load %arg9[%c0_20, %c0_21] : memref<80x128xf32, #tpu.memory_space<vmem>>, vector<80x128xf32>
    tpu.vector_store %arg9[%c0_20, %c0_21], %19 {strides = array<i32>} : memref<80x128xf32, #tpu.memory_space<vmem>>, vector<80x128xf32>,
    %c0_i32_22 = arith.constant 0 : i32
    %21 = arith.addi %0, %c0_i32_22 : i32
    %c0_23 = arith.constant 0 : index
    %22 = arith.index_cast %21 : i32 to index
    %c0_24 = arith.constant 0 : index
    %c0_25 = arith.constant 0 : index
    %c1_26 = arith.constant 1 : index
    %c0_27 = arith.constant 0 : index
    %23 = vector.load %arg2[%c0_23, %22, %c0_24, %c0_25, %c1_26, %c0_27] : memref<1x11x2x2x9x4xbf16, #tpu.memory_space<vmem>>, vector<1x10x1x1x8x4xbf16>
    %24 = vector.shape_cast %23 : vector<1x10x1x1x8x4xbf16> to vector<10x8x4xbf16>
    %25 = vector.shape_cast %24 : vector<10x8x4xbf16> to vector<80x4xbf16>
    %c2 = arith.constant 2 : index
    %c0_28 = arith.constant 0 : index
    %c0_29 = arith.constant 0 : index
    %26 = vector.load %arg3[%c2, %c0_28, %c0_29] : memref<9x4x128xbf16, #tpu.memory_space<vmem>>, vector<1x4x128xbf16>
    %27 = vector.shape_cast %26 : vector<1x4x128xbf16> to vector<4x128xbf16>
    %cst_30 = arith.constant dense<0.000000e+00> : vector<80x128xf32>
    %28 = tpu.matmul %25, %27, %cst_30 {dimension_numbers = #tpu.dot_dimension_numbers<[1], [0], [0], [1], [0, 0, 1, 1], [], []>} : vector<80x4xbf16>, vector<4x128xbf16>, vector<80x128xf32> -> vector<80x128xf32>
    %c0_31 = arith.constant 0 : index
    %c0_32 = arith.constant 0 : index
    %29 = vector.load %arg9[%c0_31, %c0_32] : memref<80x128xf32, #tpu.memory_space<vmem>>, vector<80x128xf32>
    %30 = arith.addf %29, %28 : vector<80x128xf32>
    %c0_33 = arith.constant 0 : index
    %c0_34 = arith.constant 0 : index
    %31 = vector.load %arg9[%c0_33, %c0_34] : memref<80x128xf32, #tpu.memory_space<vmem>>, vector<80x128xf32>
    tpu.vector_store %arg9[%c0_33, %c0_34], %30 {strides = array<i32>} : memref<80x128xf32, #tpu.memory_space<vmem>>, vector<80x128xf32>,
    %c0_i32_35 = arith.constant 0 : i32
    %32 = arith.addi %0, %c0_i32_35 : i32
    %c0_36 = arith.constant 0 : index
    %33 = arith.index_cast %32 : i32 to index
    %c1_37 = arith.constant 1 : index
    %c0_38 = arith.constant 0 : index
    %c0_39 = arith.constant 0 : index
    %c0_40 = arith.constant 0 : index
    %34 = vector.load %arg2[%c0_36, %33, %c1_37, %c0_38, %c0_39, %c0_40] : memref<1x11x2x2x9x4xbf16, #tpu.memory_space<vmem>>, vector<1x10x1x1x8x4xbf16>
    %35 = vector.shape_cast %34 : vector<1x10x1x1x8x4xbf16> to vector<10x8x4xbf16>
    %36 = vector.shape_cast %35 : vector<10x8x4xbf16> to vector<80x4xbf16>
    %c3 = arith.constant 3 : index
    %c0_41 = arith.constant 0 : index
    %c0_42 = arith.constant 0 : index
    %37 = vector.load %arg3[%c3, %c0_41, %c0_42] : memref<9x4x128xbf16, #tpu.memory_space<vmem>>, vector<1x4x128xbf16>
    %38 = vector.shape_cast %37 : vector<1x4x128xbf16> to vector<4x128xbf16>
    %cst_43 = arith.constant dense<0.000000e+00> : vector<80x128xf32>
    %39 = tpu.matmul %36, %38, %cst_43 {dimension_numbers = #tpu.dot_dimension_numbers<[1], [0], [0], [1], [0, 0, 1, 1], [], []>} : vector<80x4xbf16>, vector<4x128xbf16>, vector<80x128xf32> -> vector<80x128xf32>
    %c0_44 = arith.constant 0 : index
    %c0_45 = arith.constant 0 : index
    %40 = vector.load %arg9[%c0_44, %c0_45] : memref<80x128xf32, #tpu.memory_space<vmem>>, vector<80x128xf32>
    %41 = arith.addf %40, %39 : vector<80x128xf32>
    %c0_46 = arith.constant 0 : index
    %c0_47 = arith.constant 0 : index
    %42 = vector.load %arg9[%c0_46, %c0_47] : memref<80x128xf32, #tpu.memory_space<vmem>>, vector<80x128xf32>
    tpu.vector_store %arg9[%c0_46, %c0_47], %41 {strides = array<i32>} : memref<80x128xf32, #tpu.memory_space<vmem>>, vector<80x128xf32>,
    %c0_i32_48 = arith.constant 0 : i32
    %43 = arith.addi %0, %c0_i32_48 : i32
    %c0_49 = arith.constant 0 : index
    %44 = arith.index_cast %43 : i32 to index
    %c1_50 = arith.constant 1 : index
    %c1_51 = arith.constant 1 : index
    %c0_52 = arith.constant 0 : index
    %c0_53 = arith.constant 0 : index
    %45 = vector.load %arg2[%c0_49, %44, %c1_50, %c1_51, %c0_52, %c0_53] : memref<1x11x2x2x9x4xbf16, #tpu.memory_space<vmem>>, vector<1x10x1x1x8x4xbf16>
    %46 = vector.shape_cast %45 : vector<1x10x1x1x8x4xbf16> to vector<10x8x4xbf16>
    %47 = vector.shape_cast %46 : vector<10x8x4xbf16> to vector<80x4xbf16>
    %c4 = arith.constant 4 : index
    %c0_54 = arith.constant 0 : index
    %c0_55 = arith.constant 0 : index
    %48 = vector.load %arg3[%c4, %c0_54, %c0_55] : memref<9x4x128xbf16, #tpu.memory_space<vmem>>, vector<1x4x128xbf16>
    %49 = vector.shape_cast %48 : vector<1x4x128xbf16> to vector<4x128xbf16>
    %cst_56 = arith.constant dense<0.000000e+00> : vector<80x128xf32>
    %50 = tpu.matmul %47, %49, %cst_56 {dimension_numbers = #tpu.dot_dimension_numbers<[1], [0], [0], [1], [0, 0, 1, 1], [], []>} : vector<80x4xbf16>, vector<4x128xbf16>, vector<80x128xf32> -> vector<80x128xf32>
    %c0_57 = arith.constant 0 : index
    %c0_58 = arith.constant 0 : index
    %51 = vector.load %arg9[%c0_57, %c0_58] : memref<80x128xf32, #tpu.memory_space<vmem>>, vector<80x128xf32>
    %52 = arith.addf %51, %50 : vector<80x128xf32>
    %c0_59 = arith.constant 0 : index
    %c0_60 = arith.constant 0 : index
    %53 = vector.load %arg9[%c0_59, %c0_60] : memref<80x128xf32, #tpu.memory_space<vmem>>, vector<80x128xf32>
    tpu.vector_store %arg9[%c0_59, %c0_60], %52 {strides = array<i32>} : memref<80x128xf32, #tpu.memory_space<vmem>>, vector<80x128xf32>,
    %c0_i32_61 = arith.constant 0 : i32
    %54 = arith.addi %0, %c0_i32_61 : i32
    %c0_62 = arith.constant 0 : index
    %55 = arith.index_cast %54 : i32 to index
    %c1_63 = arith.constant 1 : index
    %c0_64 = arith.constant 0 : index
    %c1_65 = arith.constant 1 : index
    %c0_66 = arith.constant 0 : index
    %56 = vector.load %arg2[%c0_62, %55, %c1_63, %c0_64, %c1_65, %c0_66] : memref<1x11x2x2x9x4xbf16, #tpu.memory_space<vmem>>, vector<1x10x1x1x8x4xbf16>
    %57 = vector.shape_cast %56 : vector<1x10x1x1x8x4xbf16> to vector<10x8x4xbf16>
    %58 = vector.shape_cast %57 : vector<10x8x4xbf16> to vector<80x4xbf16>
    %c5 = arith.constant 5 : index
    %c0_67 = arith.constant 0 : index
    %c0_68 = arith.constant 0 : index
    %59 = vector.load %arg3[%c5, %c0_67, %c0_68] : memref<9x4x128xbf16, #tpu.memory_space<vmem>>, vector<1x4x128xbf16>
    %60 = vector.shape_cast %59 : vector<1x4x128xbf16> to vector<4x128xbf16>
    %cst_69 = arith.constant dense<0.000000e+00> : vector<80x128xf32>
    %61 = tpu.matmul %58, %60, %cst_69 {dimension_numbers = #tpu.dot_dimension_numbers<[1], [0], [0], [1], [0, 0, 1, 1], [], []>} : vector<80x4xbf16>, vector<4x128xbf16>, vector<80x128xf32> -> vector<80x128xf32>
    %c0_70 = arith.constant 0 : index
    %c0_71 = arith.constant 0 : index
    %62 = vector.load %arg9[%c0_70, %c0_71] : memref<80x128xf32, #tpu.memory_space<vmem>>, vector<80x128xf32>
    %63 = arith.addf %62, %61 : vector<80x128xf32>
    %c0_72 = arith.constant 0 : index
    %c0_73 = arith.constant 0 : index
    %64 = vector.load %arg9[%c0_72, %c0_73] : memref<80x128xf32, #tpu.memory_space<vmem>>, vector<80x128xf32>
    tpu.vector_store %arg9[%c0_72, %c0_73], %63 {strides = array<i32>} : memref<80x128xf32, #tpu.memory_space<vmem>>, vector<80x128xf32>,
    %c1_i32 = arith.constant 1 : i32
    %65 = arith.addi %0, %c1_i32 : i32
    %c0_74 = arith.constant 0 : index
    %66 = arith.index_cast %65 : i32 to index
    %c0_75 = arith.constant 0 : index
    %c0_76 = arith.constant 0 : index
    %c0_77 = arith.constant 0 : index
    %c0_78 = arith.constant 0 : index
    %67 = vector.load %arg2[%c0_74, %66, %c0_75, %c0_76, %c0_77, %c0_78] : memref<1x11x2x2x9x4xbf16, #tpu.memory_space<vmem>>, vector<1x10x1x1x8x4xbf16>
    %68 = vector.shape_cast %67 : vector<1x10x1x1x8x4xbf16> to vector<10x8x4xbf16>
    %69 = vector.shape_cast %68 : vector<10x8x4xbf16> to vector<80x4xbf16>
    %c6 = arith.constant 6 : index
    %c0_79 = arith.constant 0 : index
    %c0_80 = arith.constant 0 : index
    %70 = vector.load %arg3[%c6, %c0_79, %c0_80] : memref<9x4x128xbf16, #tpu.memory_space<vmem>>, vector<1x4x128xbf16>
    %71 = vector.shape_cast %70 : vector<1x4x128xbf16> to vector<4x128xbf16>
    %cst_81 = arith.constant dense<0.000000e+00> : vector<80x128xf32>
    %72 = tpu.matmul %69, %71, %cst_81 {dimension_numbers = #tpu.dot_dimension_numbers<[1], [0], [0], [1], [0, 0, 1, 1], [], []>} : vector<80x4xbf16>, vector<4x128xbf16>, vector<80x128xf32> -> vector<80x128xf32>
    %c0_82 = arith.constant 0 : index
    %c0_83 = arith.constant 0 : index
    %73 = vector.load %arg9[%c0_82, %c0_83] : memref<80x128xf32, #tpu.memory_space<vmem>>, vector<80x128xf32>
    %74 = arith.addf %73, %72 : vector<80x128xf32>
    %c0_84 = arith.constant 0 : index
    %c0_85 = arith.constant 0 : index
    %75 = vector.load %arg9[%c0_84, %c0_85] : memref<80x128xf32, #tpu.memory_space<vmem>>, vector<80x128xf32>
    tpu.vector_store %arg9[%c0_84, %c0_85], %74 {strides = array<i32>} : memref<80x128xf32, #tpu.memory_space<vmem>>, vector<80x128xf32>,
    %c1_i32_86 = arith.constant 1 : i32
    %76 = arith.addi %0, %c1_i32_86 : i32
    %c0_87 = arith.constant 0 : index
    %77 = arith.index_cast %76 : i32 to index
    %c0_88 = arith.constant 0 : index
    %c1_89 = arith.constant 1 : index
    %c0_90 = arith.constant 0 : index
    %c0_91 = arith.constant 0 : index
    %78 = vector.load %arg2[%c0_87, %77, %c0_88, %c1_89, %c0_90, %c0_91] : memref<1x11x2x2x9x4xbf16, #tpu.memory_space<vmem>>, vector<1x10x1x1x8x4xbf16>
    %79 = vector.shape_cast %78 : vector<1x10x1x1x8x4xbf16> to vector<10x8x4xbf16>
    %80 = vector.shape_cast %79 : vector<10x8x4xbf16> to vector<80x4xbf16>
    %c7 = arith.constant 7 : index
    %c0_92 = arith.constant 0 : index
    %c0_93 = arith.constant 0 : index
    %81 = vector.load %arg3[%c7, %c0_92, %c0_93] : memref<9x4x128xbf16, #tpu.memory_space<vmem>>, vector<1x4x128xbf16>
    %82 = vector.shape_cast %81 : vector<1x4x128xbf16> to vector<4x128xbf16>
    %cst_94 = arith.constant dense<0.000000e+00> : vector<80x128xf32>
    %83 = tpu.matmul %80, %82, %cst_94 {dimension_numbers = #tpu.dot_dimension_numbers<[1], [0], [0], [1], [0, 0, 1, 1], [], []>} : vector<80x4xbf16>, vector<4x128xbf16>, vector<80x128xf32> -> vector<80x128xf32>
    %c0_95 = arith.constant 0 : index
    %c0_96 = arith.constant 0 : index
    %84 = vector.load %arg9[%c0_95, %c0_96] : memref<80x128xf32, #tpu.memory_space<vmem>>, vector<80x128xf32>
    %85 = arith.addf %84, %83 : vector<80x128xf32>
    %c0_97 = arith.constant 0 : index
    %c0_98 = arith.constant 0 : index
    %86 = vector.load %arg9[%c0_97, %c0_98] : memref<80x128xf32, #tpu.memory_space<vmem>>, vector<80x128xf32>
    tpu.vector_store %arg9[%c0_97, %c0_98], %85 {strides = array<i32>} : memref<80x128xf32, #tpu.memory_space<vmem>>, vector<80x128xf32>,
    %c1_i32_99 = arith.constant 1 : i32
    %87 = arith.addi %0, %c1_i32_99 : i32
    %c0_100 = arith.constant 0 : index
    %88 = arith.index_cast %87 : i32 to index
    %c0_101 = arith.constant 0 : index
    %c0_102 = arith.constant 0 : index
    %c1_103 = arith.constant 1 : index
    %c0_104 = arith.constant 0 : index
    %89 = vector.load %arg2[%c0_100, %88, %c0_101, %c0_102, %c1_103, %c0_104] : memref<1x11x2x2x9x4xbf16, #tpu.memory_space<vmem>>, vector<1x10x1x1x8x4xbf16>
    %90 = vector.shape_cast %89 : vector<1x10x1x1x8x4xbf16> to vector<10x8x4xbf16>
    %91 = vector.shape_cast %90 : vector<10x8x4xbf16> to vector<80x4xbf16>
    %c8 = arith.constant 8 : index
    %c0_105 = arith.constant 0 : index
    %c0_106 = arith.constant 0 : index
    %92 = vector.load %arg3[%c8, %c0_105, %c0_106] : memref<9x4x128xbf16, #tpu.memory_space<vmem>>, vector<1x4x128xbf16>
    %93 = vector.shape_cast %92 : vector<1x4x128xbf16> to vector<4x128xbf16>
    %cst_107 = arith.constant dense<0.000000e+00> : vector<80x128xf32>
    %94 = tpu.matmul %91, %93, %cst_107 {dimension_numbers = #tpu.dot_dimension_numbers<[1], [0], [0], [1], [0, 0, 1, 1], [], []>} : vector<80x4xbf16>, vector<4x128xbf16>, vector<80x128xf32> -> vector<80x128xf32>
    %c0_108 = arith.constant 0 : index
    %c0_109 = arith.constant 0 : index
    %95 = vector.load %arg9[%c0_108, %c0_109] : memref<80x128xf32, #tpu.memory_space<vmem>>, vector<80x128xf32>
    %96 = arith.addf %95, %94 : vector<80x128xf32>
    %c0_110 = arith.constant 0 : index
    %c0_111 = arith.constant 0 : index
    %97 = vector.load %arg9[%c0_110, %c0_111] : memref<80x128xf32, #tpu.memory_space<vmem>>, vector<80x128xf32>
    tpu.vector_store %arg9[%c0_110, %c0_111], %96 {strides = array<i32>} : memref<80x128xf32, #tpu.memory_space<vmem>>, vector<80x128xf32>,
    %c0_112 = arith.constant 0 : index
    %c0_113 = arith.constant 0 : index
    %98 = vector.load %arg9[%c0_112, %c0_113] : memref<80x128xf32, #tpu.memory_space<vmem>>, vector<80x128xf32>
    %c0_114 = arith.constant 0 : index
    %c0_115 = arith.constant 0 : index
    %99 = vector.load %arg4[%c0_114, %c0_115] : memref<1x128xf32, #tpu.memory_space<vmem>>, vector<1x128xf32>
    %100 = vector.broadcast %99 : vector<1x128xf32> to vector<80x128xf32>
    %101 = arith.addf %98, %100 : vector<80x128xf32>
    %cst_116 = arith.constant 0.000000e+00 : f32
    %102 = vector.broadcast %cst_116 : f32 to vector<80x128xf32>
    %103 = arith.maximumf %101, %102 : vector<80x128xf32>
    %104 = vector.shape_cast %103 : vector<80x128xf32> to vector<10x8x128xf32>
    %105 = arith.truncf %104 : vector<10x8x128xf32> to vector<10x8x128xbf16>
    %cst_117 = arith.constant 0.000000e+00 : bf16
    %106 = vector.broadcast %cst_117 : bf16 to vector<10x1x128xbf16>
    %c0_118 = arith.constant 0 : index
    %c0_119 = arith.constant 0 : index
    %c0_120 = arith.constant 0 : index
    %107 = vector.load %arg8[%c0_118, %c0_119, %c0_120] : memref<10x10x128xbf16, #tpu.memory_space<vmem>>, vector<10x1x128xbf16>
    tpu.vector_store %arg8[%c0_118, %c0_119, %c0_120], %106 {strides = array<i32>} : memref<10x10x128xbf16, #tpu.memory_space<vmem>>, vector<10x1x128xbf16>,
    %c0_121 = arith.constant 0 : index
    %c9 = arith.constant 9 : index
    %c0_122 = arith.constant 0 : index
    %108 = vector.load %arg8[%c0_121, %c9, %c0_122] : memref<10x10x128xbf16, #tpu.memory_space<vmem>>, vector<10x1x128xbf16>
    tpu.vector_store %arg8[%c0_121, %c9, %c0_122], %106 {strides = array<i32>} : memref<10x10x128xbf16, #tpu.memory_space<vmem>>, vector<10x1x128xbf16>,
    %c0_123 = arith.constant 0 : index
    %c1_124 = arith.constant 1 : index
    %c0_125 = arith.constant 0 : index
    %109 = vector.load %arg8[%c0_123, %c1_124, %c0_125] : memref<10x10x128xbf16, #tpu.memory_space<vmem>>, vector<10x8x128xbf16>
    tpu.vector_store %arg8[%c0_123, %c1_124, %c0_125], %105 {strides = array<i32>} : memref<10x10x128xbf16, #tpu.memory_space<vmem>>, vector<10x8x128xbf16>,
    %cst_126 = arith.constant 0.000000e+00 : bf16
    %110 = vector.broadcast %cst_126 : bf16 to vector<1x10x128xbf16>
    %c0_i32_127 = arith.constant 0 : i32
    %111 = arith.cmpi eq, %arg1, %c0_i32_127 : i32
    %112 = arith.extui %111 : i1 to i32
    %c0_i32_128 = arith.constant 0 : i32
    %113 = arith.cmpi ne, %112, %c0_i32_128 : i32
    scf.if %113 {
      %c0_235 = arith.constant 0 : index
      %c0_236 = arith.constant 0 : index
      %c0_237 = arith.constant 0 : index
      %194 = vector.load %arg8[%c0_235, %c0_236, %c0_237] : memref<10x10x128xbf16, #tpu.memory_space<vmem>>, vector<1x10x128xbf16>
      tpu.vector_store %arg8[%c0_235, %c0_236, %c0_237], %110 {strides = array<i32>} : memref<10x10x128xbf16, #tpu.memory_space<vmem>>, vector<1x10x128xbf16>,
    } else {
    }
    %c0_i32_129 = arith.constant 0 : i32
    %114 = arith.cmpi eq, %arg1, %c0_i32_129 : i32
    %115 = arith.extui %114 : i1 to i32
    %c0_i32_130 = arith.constant 0 : i32
    %116 = arith.cmpi ne, %115, %c0_i32_130 : i32
    scf.if %116 {
      %c9_235 = arith.constant 9 : index
      %c0_236 = arith.constant 0 : index
      %c0_237 = arith.constant 0 : index
      %194 = vector.load %arg8[%c9_235, %c0_236, %c0_237] : memref<10x10x128xbf16, #tpu.memory_space<vmem>>, vector<1x10x128xbf16>
      tpu.vector_store %arg8[%c9_235, %c0_236, %c0_237], %110 {strides = array<i32>} : memref<10x10x128xbf16, #tpu.memory_space<vmem>>, vector<1x10x128xbf16>,
    } else {
    }
    %c0_131 = arith.constant 0 : index
    %c0_132 = arith.constant 0 : index
    %c0_133 = arith.constant 0 : index
    %117 = vector.load %arg8[%c0_131, %c0_132, %c0_133] : memref<10x10x128xbf16, #tpu.memory_space<vmem>>, vector<8x8x128xbf16>
    %118 = vector.shape_cast %117 : vector<8x8x128xbf16> to vector<64x128xbf16>
    %c0_134 = arith.constant 0 : index
    %c0_135 = arith.constant 0 : index
    %c0_136 = arith.constant 0 : index
    %119 = vector.load %arg5[%c0_134, %c0_135, %c0_136] : memref<9x128x128xbf16, #tpu.memory_space<vmem>>, vector<1x128x128xbf16>
    %120 = vector.shape_cast %119 : vector<1x128x128xbf16> to vector<128x128xbf16>
    %cst_137 = arith.constant dense<0.000000e+00> : vector<64x128xf32>
    %121 = tpu.matmul %118, %120, %cst_137 {dimension_numbers = #tpu.dot_dimension_numbers<[1], [0], [0], [1], [0, 0, 1, 1], [], []>} : vector<64x128xbf16>, vector<128x128xbf16>, vector<64x128xf32> -> vector<64x128xf32>
    %c0_138 = arith.constant 0 : index
    %c0_139 = arith.constant 0 : index
    %122 = vector.load %arg10[%c0_138, %c0_139] : memref<64x128xf32, #tpu.memory_space<vmem>>, vector<64x128xf32>
    tpu.vector_store %arg10[%c0_138, %c0_139], %121 {strides = array<i32>} : memref<64x128xf32, #tpu.memory_space<vmem>>, vector<64x128xf32>,
    %c0_140 = arith.constant 0 : index
    %c1_141 = arith.constant 1 : index
    %c0_142 = arith.constant 0 : index
    %123 = vector.load %arg8[%c0_140, %c1_141, %c0_142] : memref<10x10x128xbf16, #tpu.memory_space<vmem>>, vector<8x8x128xbf16>
    %124 = vector.shape_cast %123 : vector<8x8x128xbf16> to vector<64x128xbf16>
    %c1_143 = arith.constant 1 : index
    %c0_144 = arith.constant 0 : index
    %c0_145 = arith.constant 0 : index
    %125 = vector.load %arg5[%c1_143, %c0_144, %c0_145] : memref<9x128x128xbf16, #tpu.memory_space<vmem>>, vector<1x128x128xbf16>
    %126 = vector.shape_cast %125 : vector<1x128x128xbf16> to vector<128x128xbf16>
    %cst_146 = arith.constant dense<0.000000e+00> : vector<64x128xf32>
    %127 = tpu.matmul %124, %126, %cst_146 {dimension_numbers = #tpu.dot_dimension_numbers<[1], [0], [0], [1], [0, 0, 1, 1], [], []>} : vector<64x128xbf16>, vector<128x128xbf16>, vector<64x128xf32> -> vector<64x128xf32>
    %c0_147 = arith.constant 0 : index
    %c0_148 = arith.constant 0 : index
    %128 = vector.load %arg10[%c0_147, %c0_148] : memref<64x128xf32, #tpu.memory_space<vmem>>, vector<64x128xf32>
    %129 = arith.addf %128, %127 : vector<64x128xf32>
    %c0_149 = arith.constant 0 : index
    %c0_150 = arith.constant 0 : index
    %130 = vector.load %arg10[%c0_149, %c0_150] : memref<64x128xf32, #tpu.memory_space<vmem>>, vector<64x128xf32>
    tpu.vector_store %arg10[%c0_149, %c0_150], %129 {strides = array<i32>} : memref<64x128xf32, #tpu.memory_space<vmem>>, vector<64x128xf32>,
    %c0_151 = arith.constant 0 : index
    %c2_152 = arith.constant 2 : index
    %c0_153 = arith.constant 0 : index
    %131 = vector.load %arg8[%c0_151, %c2_152, %c0_153] : memref<10x10x128xbf16, #tpu.memory_space<vmem>>, vector<8x8x128xbf16>
    %132 = vector.shape_cast %131 : vector<8x8x128xbf16> to vector<64x128xbf16>
    %c2_154 = arith.constant 2 : index
    %c0_155 = arith.constant 0 : index
    %c0_156 = arith.constant 0 : index
    %133 = vector.load %arg5[%c2_154, %c0_155, %c0_156] : memref<9x128x128xbf16, #tpu.memory_space<vmem>>, vector<1x128x128xbf16>
    %134 = vector.shape_cast %133 : vector<1x128x128xbf16> to vector<128x128xbf16>
    %cst_157 = arith.constant dense<0.000000e+00> : vector<64x128xf32>
    %135 = tpu.matmul %132, %134, %cst_157 {dimension_numbers = #tpu.dot_dimension_numbers<[1], [0], [0], [1], [0, 0, 1, 1], [], []>} : vector<64x128xbf16>, vector<128x128xbf16>, vector<64x128xf32> -> vector<64x128xf32>
    %c0_158 = arith.constant 0 : index
    %c0_159 = arith.constant 0 : index
    %136 = vector.load %arg10[%c0_158, %c0_159] : memref<64x128xf32, #tpu.memory_space<vmem>>, vector<64x128xf32>
    %137 = arith.addf %136, %135 : vector<64x128xf32>
    %c0_160 = arith.constant 0 : index
    %c0_161 = arith.constant 0 : index
    %138 = vector.load %arg10[%c0_160, %c0_161] : memref<64x128xf32, #tpu.memory_space<vmem>>, vector<64x128xf32>
    tpu.vector_store %arg10[%c0_160, %c0_161], %137 {strides = array<i32>} : memref<64x128xf32, #tpu.memory_space<vmem>>, vector<64x128xf32>,
    %c1_162 = arith.constant 1 : index
    %c0_163 = arith.constant 0 : index
    %c0_164 = arith.constant 0 : index
    %139 = vector.load %arg8[%c1_162, %c0_163, %c0_164] : memref<10x10x128xbf16, #tpu.memory_space<vmem>>, vector<8x8x128xbf16>
    %140 = vector.shape_cast %139 : vector<8x8x128xbf16> to vector<64x128xbf16>
    %c3_165 = arith.constant 3 : index
    %c0_166 = arith.constant 0 : index
    %c0_167 = arith.constant 0 : index
    %141 = vector.load %arg5[%c3_165, %c0_166, %c0_167] : memref<9x128x128xbf16, #tpu.memory_space<vmem>>, vector<1x128x128xbf16>
    %142 = vector.shape_cast %141 : vector<1x128x128xbf16> to vector<128x128xbf16>
    %cst_168 = arith.constant dense<0.000000e+00> : vector<64x128xf32>
    %143 = tpu.matmul %140, %142, %cst_168 {dimension_numbers = #tpu.dot_dimension_numbers<[1], [0], [0], [1], [0, 0, 1, 1], [], []>} : vector<64x128xbf16>, vector<128x128xbf16>, vector<64x128xf32> -> vector<64x128xf32>
    %c0_169 = arith.constant 0 : index
    %c0_170 = arith.constant 0 : index
    %144 = vector.load %arg10[%c0_169, %c0_170] : memref<64x128xf32, #tpu.memory_space<vmem>>, vector<64x128xf32>
    %145 = arith.addf %144, %143 : vector<64x128xf32>
    %c0_171 = arith.constant 0 : index
    %c0_172 = arith.constant 0 : index
    %146 = vector.load %arg10[%c0_171, %c0_172] : memref<64x128xf32, #tpu.memory_space<vmem>>, vector<64x128xf32>
    tpu.vector_store %arg10[%c0_171, %c0_172], %145 {strides = array<i32>} : memref<64x128xf32, #tpu.memory_space<vmem>>, vector<64x128xf32>,
    %c1_173 = arith.constant 1 : index
    %c1_174 = arith.constant 1 : index
    %c0_175 = arith.constant 0 : index
    %147 = vector.load %arg8[%c1_173, %c1_174, %c0_175] : memref<10x10x128xbf16, #tpu.memory_space<vmem>>, vector<8x8x128xbf16>
    %148 = vector.shape_cast %147 : vector<8x8x128xbf16> to vector<64x128xbf16>
    %c4_176 = arith.constant 4 : index
    %c0_177 = arith.constant 0 : index
    %c0_178 = arith.constant 0 : index
    %149 = vector.load %arg5[%c4_176, %c0_177, %c0_178] : memref<9x128x128xbf16, #tpu.memory_space<vmem>>, vector<1x128x128xbf16>
    %150 = vector.shape_cast %149 : vector<1x128x128xbf16> to vector<128x128xbf16>
    %cst_179 = arith.constant dense<0.000000e+00> : vector<64x128xf32>
    %151 = tpu.matmul %148, %150, %cst_179 {dimension_numbers = #tpu.dot_dimension_numbers<[1], [0], [0], [1], [0, 0, 1, 1], [], []>} : vector<64x128xbf16>, vector<128x128xbf16>, vector<64x128xf32> -> vector<64x128xf32>
    %c0_180 = arith.constant 0 : index
    %c0_181 = arith.constant 0 : index
    %152 = vector.load %arg10[%c0_180, %c0_181] : memref<64x128xf32, #tpu.memory_space<vmem>>, vector<64x128xf32>
    %153 = arith.addf %152, %151 : vector<64x128xf32>
    %c0_182 = arith.constant 0 : index
    %c0_183 = arith.constant 0 : index
    %154 = vector.load %arg10[%c0_182, %c0_183] : memref<64x128xf32, #tpu.memory_space<vmem>>, vector<64x128xf32>
    tpu.vector_store %arg10[%c0_182, %c0_183], %153 {strides = array<i32>} : memref<64x128xf32, #tpu.memory_space<vmem>>, vector<64x128xf32>,
    %c1_184 = arith.constant 1 : index
    %c2_185 = arith.constant 2 : index
    %c0_186 = arith.constant 0 : index
    %155 = vector.load %arg8[%c1_184, %c2_185, %c0_186] : memref<10x10x128xbf16, #tpu.memory_space<vmem>>, vector<8x8x128xbf16>
    %156 = vector.shape_cast %155 : vector<8x8x128xbf16> to vector<64x128xbf16>
    %c5_187 = arith.constant 5 : index
    %c0_188 = arith.constant 0 : index
    %c0_189 = arith.constant 0 : index
    %157 = vector.load %arg5[%c5_187, %c0_188, %c0_189] : memref<9x128x128xbf16, #tpu.memory_space<vmem>>, vector<1x128x128xbf16>
    %158 = vector.shape_cast %157 : vector<1x128x128xbf16> to vector<128x128xbf16>
    %cst_190 = arith.constant dense<0.000000e+00> : vector<64x128xf32>
    %159 = tpu.matmul %156, %158, %cst_190 {dimension_numbers = #tpu.dot_dimension_numbers<[1], [0], [0], [1], [0, 0, 1, 1], [], []>} : vector<64x128xbf16>, vector<128x128xbf16>, vector<64x128xf32> -> vector<64x128xf32>
    %c0_191 = arith.constant 0 : index
    %c0_192 = arith.constant 0 : index
    %160 = vector.load %arg10[%c0_191, %c0_192] : memref<64x128xf32, #tpu.memory_space<vmem>>, vector<64x128xf32>
    %161 = arith.addf %160, %159 : vector<64x128xf32>
    %c0_193 = arith.constant 0 : index
    %c0_194 = arith.constant 0 : index
    %162 = vector.load %arg10[%c0_193, %c0_194] : memref<64x128xf32, #tpu.memory_space<vmem>>, vector<64x128xf32>
    tpu.vector_store %arg10[%c0_193, %c0_194], %161 {strides = array<i32>} : memref<64x128xf32, #tpu.memory_space<vmem>>, vector<64x128xf32>,
    %c2_195 = arith.constant 2 : index
    %c0_196 = arith.constant 0 : index
    %c0_197 = arith.constant 0 : index
    %163 = vector.load %arg8[%c2_195, %c0_196, %c0_197] : memref<10x10x128xbf16, #tpu.memory_space<vmem>>, vector<8x8x128xbf16>
    %164 = vector.shape_cast %163 : vector<8x8x128xbf16> to vector<64x128xbf16>
    %c6_198 = arith.constant 6 : index
    %c0_199 = arith.constant 0 : index
    %c0_200 = arith.constant 0 : index
    %165 = vector.load %arg5[%c6_198, %c0_199, %c0_200] : memref<9x128x128xbf16, #tpu.memory_space<vmem>>, vector<1x128x128xbf16>
    %166 = vector.shape_cast %165 : vector<1x128x128xbf16> to vector<128x128xbf16>
    %cst_201 = arith.constant dense<0.000000e+00> : vector<64x128xf32>
    %167 = tpu.matmul %164, %166, %cst_201 {dimension_numbers = #tpu.dot_dimension_numbers<[1], [0], [0], [1], [0, 0, 1, 1], [], []>} : vector<64x128xbf16>, vector<128x128xbf16>, vector<64x128xf32> -> vector<64x128xf32>
    %c0_202 = arith.constant 0 : index
    %c0_203 = arith.constant 0 : index
    %168 = vector.load %arg10[%c0_202, %c0_203] : memref<64x128xf32, #tpu.memory_space<vmem>>, vector<64x128xf32>
    %169 = arith.addf %168, %167 : vector<64x128xf32>
    %c0_204 = arith.constant 0 : index
    %c0_205 = arith.constant 0 : index
    %170 = vector.load %arg10[%c0_204, %c0_205] : memref<64x128xf32, #tpu.memory_space<vmem>>, vector<64x128xf32>
    tpu.vector_store %arg10[%c0_204, %c0_205], %169 {strides = array<i32>} : memref<64x128xf32, #tpu.memory_space<vmem>>, vector<64x128xf32>,
    %c2_206 = arith.constant 2 : index
    %c1_207 = arith.constant 1 : index
    %c0_208 = arith.constant 0 : index
    %171 = vector.load %arg8[%c2_206, %c1_207, %c0_208] : memref<10x10x128xbf16, #tpu.memory_space<vmem>>, vector<8x8x128xbf16>
    %172 = vector.shape_cast %171 : vector<8x8x128xbf16> to vector<64x128xbf16>
    %c7_209 = arith.constant 7 : index
    %c0_210 = arith.constant 0 : index
    %c0_211 = arith.constant 0 : index
    %173 = vector.load %arg5[%c7_209, %c0_210, %c0_211] : memref<9x128x128xbf16, #tpu.memory_space<vmem>>, vector<1x128x128xbf16>
    %174 = vector.shape_cast %173 : vector<1x128x128xbf16> to vector<128x128xbf16>
    %cst_212 = arith.constant dense<0.000000e+00> : vector<64x128xf32>
    %175 = tpu.matmul %172, %174, %cst_212 {dimension_numbers = #tpu.dot_dimension_numbers<[1], [0], [0], [1], [0, 0, 1, 1], [], []>} : vector<64x128xbf16>, vector<128x128xbf16>, vector<64x128xf32> -> vector<64x128xf32>
    %c0_213 = arith.constant 0 : index
    %c0_214 = arith.constant 0 : index
    %176 = vector.load %arg10[%c0_213, %c0_214] : memref<64x128xf32, #tpu.memory_space<vmem>>, vector<64x128xf32>
    %177 = arith.addf %176, %175 : vector<64x128xf32>
    %c0_215 = arith.constant 0 : index
    %c0_216 = arith.constant 0 : index
    %178 = vector.load %arg10[%c0_215, %c0_216] : memref<64x128xf32, #tpu.memory_space<vmem>>, vector<64x128xf32>
    tpu.vector_store %arg10[%c0_215, %c0_216], %177 {strides = array<i32>} : memref<64x128xf32, #tpu.memory_space<vmem>>, vector<64x128xf32>,
    %c2_217 = arith.constant 2 : index
    %c2_218 = arith.constant 2 : index
    %c0_219 = arith.constant 0 : index
    %179 = vector.load %arg8[%c2_217, %c2_218, %c0_219] : memref<10x10x128xbf16, #tpu.memory_space<vmem>>, vector<8x8x128xbf16>
    %180 = vector.shape_cast %179 : vector<8x8x128xbf16> to vector<64x128xbf16>
    %c8_220 = arith.constant 8 : index
    %c0_221 = arith.constant 0 : index
    %c0_222 = arith.constant 0 : index
    %181 = vector.load %arg5[%c8_220, %c0_221, %c0_222] : memref<9x128x128xbf16, #tpu.memory_space<vmem>>, vector<1x128x128xbf16>
    %182 = vector.shape_cast %181 : vector<1x128x128xbf16> to vector<128x128xbf16>
    %cst_223 = arith.constant dense<0.000000e+00> : vector<64x128xf32>
    %183 = tpu.matmul %180, %182, %cst_223 {dimension_numbers = #tpu.dot_dimension_numbers<[1], [0], [0], [1], [0, 0, 1, 1], [], []>} : vector<64x128xbf16>, vector<128x128xbf16>, vector<64x128xf32> -> vector<64x128xf32>
    %c0_224 = arith.constant 0 : index
    %c0_225 = arith.constant 0 : index
    %184 = vector.load %arg10[%c0_224, %c0_225] : memref<64x128xf32, #tpu.memory_space<vmem>>, vector<64x128xf32>
    %185 = arith.addf %184, %183 : vector<64x128xf32>
    %c0_226 = arith.constant 0 : index
    %c0_227 = arith.constant 0 : index
    %186 = vector.load %arg10[%c0_226, %c0_227] : memref<64x128xf32, #tpu.memory_space<vmem>>, vector<64x128xf32>
    tpu.vector_store %arg10[%c0_226, %c0_227], %185 {strides = array<i32>} : memref<64x128xf32, #tpu.memory_space<vmem>>, vector<64x128xf32>,
    %c0_228 = arith.constant 0 : index
    %c0_229 = arith.constant 0 : index
    %187 = vector.load %arg10[%c0_228, %c0_229] : memref<64x128xf32, #tpu.memory_space<vmem>>, vector<64x128xf32>
    %c0_230 = arith.constant 0 : index
    %c0_231 = arith.constant 0 : index
    %188 = vector.load %arg6[%c0_230, %c0_231] : memref<1x128xf32, #tpu.memory_space<vmem>>, vector<1x128xf32>
    %189 = vector.broadcast %188 : vector<1x128xf32> to vector<64x128xf32>
    %190 = arith.addf %187, %189 : vector<64x128xf32>
    %c0_232 = arith.constant 0 : index
    %c0_233 = arith.constant 0 : index
    %c0_234 = arith.constant 0 : index
    %191 = vector.load %arg7[%c0_232, %c0_233, %c0_234] : memref<1x64x128xf32, #tpu.memory_space<vmem>>, vector<1x64x128xf32>
    %192 = vector.shape_cast %191 : vector<1x64x128xf32> to vector<64x128xf32>
    %193 = vector.shape_cast %190 : vector<64x128xf32> to vector<1x64x128xf32>
    tpu.vector_store %arg7[%c0_232, %c0_233, %c0_234], %193 {strides = array<i32>} : memref<1x64x128xf32, #tpu.memory_space<vmem>>, vector<1x64x128xf32>,
    return
  }
  func.func @transform_0(%arg0: i32, %arg1: i32) -> (i32, i32, i32, i32, i32, i32) {
    %c0_i32 = arith.constant 0 : i32
    %c0_i32_0 = arith.constant 0 : i32
    %c0_i32_1 = arith.constant 0 : i32
    %c0_i32_2 = arith.constant 0 : i32
    %c0_i32_3 = arith.constant 0 : i32
    %c0_i32_4 = arith.constant 0 : i32
    return %arg0, %c0_i32, %c0_i32_0, %c0_i32_1, %c0_i32_2, %c0_i32_3 : i32, i32, i32, i32, i32, i32
  }
  func.func @transform_1(%arg0: i32, %arg1: i32) -> (i32, i32, i32) {
    %c0_i32 = arith.constant 0 : i32
    %c0_i32_0 = arith.constant 0 : i32
    %c0_i32_1 = arith.constant 0 : i32
    %c0_i32_2 = arith.constant 0 : i32
    return %c0_i32, %c0_i32_0, %c0_i32_1 : i32, i32, i32
  }
  func.func @transform_2(%arg0: i32, %arg1: i32) -> (i32, i32) {
    %c0_i32 = arith.constant 0 : i32
    %c0_i32_0 = arith.constant 0 : i32
    %c0_i32_1 = arith.constant 0 : i32
    return %c0_i32, %c0_i32_0 : i32, i32
  }
  func.func @transform_3(%arg0: i32, %arg1: i32) -> (i32, i32, i32) {
    %c0_i32 = arith.constant 0 : i32
    %c0_i32_0 = arith.constant 0 : i32
    %c0_i32_1 = arith.constant 0 : i32
    %c0_i32_2 = arith.constant 0 : i32
    return %c0_i32, %c0_i32_0, %c0_i32_1 : i32, i32, i32
  }
  func.func @transform_4(%arg0: i32, %arg1: i32) -> (i32, i32) {
    %c0_i32 = arith.constant 0 : i32
    %c0_i32_0 = arith.constant 0 : i32
    %c0_i32_1 = arith.constant 0 : i32
    return %c0_i32, %c0_i32_0 : i32, i32
  }
  func.func @transform_5(%arg0: i32, %arg1: i32) -> (i32, i32, i32) {
    %c0_i32 = arith.constant 0 : i32
    %c0_i32_0 = arith.constant 0 : i32
    return %arg0, %arg1, %c0_i32 : i32, i32, i32
  }
}

</mosaic_0001>

<bundles_post_ra>
// kernel: resblock_forward.1
= control target key start
LH: loop header
LB: loop body
LE: loop exit
PB: predicated region body
PF: predicated region fallthrough
CT: control target
= control target key end

     0   :  { %s5975_s18 = smov 0   ;;  %s5977_s19 = smov 0   ;;  %s6972_s0 = inlined_call_operand.vmem [shape: bf16[2,11,2,2,9,4], index: 0, kind: input, shape index: {}]   ;;  %s6973_s1 = inlined_call_operand.vmem [shape: bf16[9,4,128], index: 1, kind: input, shape index: {}]   ;;  %s6974_s2 = inlined_call_operand.vmem [shape: f32[1,128], index: 2, kind: input, shape index: {}]   ;;  %s6975_s3 = inlined_call_operand.vmem [shape: bf16[9,128,128], index: 3, kind: input, shape index: {}]   ;;  %s6976_s4 = inlined_call_operand.vmem [shape: f32[1,128], index: 4, kind: input, shape index: {}]   ;;  %s6977_s5 = inlined_call_operand.vmem [shape: f32[2,64,128], index: 5, kind: output, shape index: {}]  }
   0x1   :  { %s5979_s20 = smov 0  }
   0x2 LB: > { %s27_s21 = sadd.s32 1, %s5936_s19  ;;  %p4689_p0 = scmp.ge.s32.totalorder %s5940_s20, 1  ;;  %s5940_s20 = sphi %s5979_s20, %s15_s20   ;;  %s5936_s19 = sphi %s5977_s19, %s6989_s19   ;;  %s5932_s18 = sphi %s5975_s18, %s6988_s18  }
   0x3   : > { %p29_p1 = scmp.ge.s32.totalorder %s27_s21, 2  ;;  %p201_p2 = scmp.lt.s32.totalorder %s5940_s20, 3 }
   0x5   : > { %s6991_s21 = smov (%p29_p1, %s27_s21), 0  ;;  %p202_p3 = pnand %p4689_p0, %p201_p2 }
   0x6   : > { %v263_v0 = vld [vmem:[%s6973_s1] sm:$0x3] (!%p202_p3)  ;;  %vm305_vm0 = vcmask (!%p202_p3), 1041408   ;;  %p233_p4 = scmp.lt.s32.totalorder (!%p202_p3), %s5932_s18, 1  ;;  %v5942_v1 = vmov (!%p202_p3), 0.0   ;;  %vm5943_vm1 = vmmov (!%p202_p3), 0  }
   0x7   : > { %205 = sbr.rel (%p202_p3) target bundleno = 1031 (0x407), region = 40  ;;  %5328 = vmatprep.subr.bf16.mxu0 (!%p202_p3), %v5942_v1  ;;  %v307_v2 = vsel (!%p202_p3), %vm305_vm0, %v263_v0, 0  ;;  %5330 = vmatprep.mubr.msk.bf16.mxu0 (!%p202_p3), %vm5943_vm1, %v5942_v1  ;;  %v4713_v3 = vld [vmem:[%s6973_s1 + $0x2] sm:$0x3] (!%p202_p3)  ;;  %vm289_vm2 = vcmask (!%p202_p3), 31744   ;;  %vm2142_vm6 = vcmask (!%p202_p3), 1040384  }
   0x8   : > { %5329 = vmatpush3.bf16.msra.mxu0 (!%p202_p3), %v307_v2  ;;  %5482 = vmatprep.subr.bf16.mxu1 (!%p202_p3), %v5942_v1  ;;  %v448_v7 = vsel (!%p202_p3), %vm305_vm0, %v4713_v3, 0  ;;  %v4724_v20 = vld [vmem:[%s6973_s1 + $0x4] sm:$0x3] (!%p202_p3)  ;;  %vm573_vm3 = vsmask.f32 (!%p202_p3), 3328  ;;  %vm2337_vm11 = vcmask (!%p202_p3), 1043456  }
   0x9   : > { %5350 = vmatprep.subr.bf16.mxu0 (!%p202_p3), %v5942_v1  ;;  %5484 = vmatprep.mubr.msk.bf16.mxu1 (!%p202_p3), %vm5943_vm1, %v5942_v1  ;;  %v749_v23 = vsel (!%p202_p3), %vm305_vm0, %v4724_v20, 0  ;;  %vm574_vm4 = vsmask.f32 (!%p202_p3), 7440  ;;  %v4745_v58 = vld [vmem:[%s6973_s1 + $0x6] sm:$0x3] (!%p202_p3)  ;;  %vm2907_vm13 = vcmask (!%p202_p3), 1042432  }
   0xa   : > { %vm6083_vm5 = vmor (!%p202_p3), %vm573_vm3, %vm574_vm4  ;;  %vm2143_vm7 = vsmask.f32 (!%p202_p3), 256  ;;  %vm2175_vm8 = vsmask.f32 (!%p202_p3), 7938  ;;  %vm2908_vm14 = vcmask (!%p202_p3), 1046532  }
   0xb   : > { %vm6473_vm9 = vmand (!%p202_p3), %vm2142_vm6, %vm2143_vm7 }
   0xc   : > { %vm6480_vm10 = vmand (!%p202_p3), %vm2142_vm6, %vm2175_vm8 }
   0xd   : > { %vm6602_vm12 = vmand (!%p202_p3), %vm2337_vm11, %vm2175_vm8 }
   0xe   : > { %s6993_s18 = smov (!%p233_p4, %s5932_s18), 1  ;;  %vm6706_vm15 = vmor %vm2907_vm13, %vm2908_vm14 }
   0xf   : > { %s5806_s24 = smul.u32 352, %s6993_s18  ;;  %s5155_s22 = sshll.u32 %s6993_s18, 6 }
  0x10   : > { %s246_s27 = scalar_lea.vmem %s6977_s5, %s5155_s22 }
  0x11   : > { %s6013_s29 = scalar_lea.vmem %s6972_s0, %s5806_s24 }
  0x12   : > { %v253_v4 = vld [vmem:[%s6013_s29] sm:$0xf]  ;;  %v4703_v21 = vld [vmem:[%s6013_s29 + $0x8] sm:$0xf]  ;;  %v554_v39 = vld [vmem:[%s6013_s29 + $0x4] sm:$0x1] }
  0x13   : > { %v254_v5 = vld [vmem:[%s6013_s29 + $0x20] sm:$0xf]  ;;  %v4704_v22 = vld [vmem:[%s6013_s29 + $0x28] sm:$0xf]  ;;  %v556_v40 = vld [vmem:[%s6013_s29 + $0x24] sm:$0x1] }
  0x14   : > { %v4693_v6 = vcombine.low %v253_v4, %v254_v5  ;;  %v255_v8 = vld [vmem:[%s6013_s29 + $0x40] sm:$0xf]  ;;  %v4714_v24 = vcombine.low %v4703_v21, %v4704_v22  ;;  %v4705_v25 = vld [vmem:[%s6013_s29 + $0x48] sm:$0xf]  ;;  %v586_v49 = vshll.u32 %v554_v39, 16  ;;  %v600_v50 = vshll.u32 %v556_v40, 16 }
  0x15   : > { %v256_v9 = vld [vmem:[%s6013_s29 + $0x60] sm:$0xf]  ;;  %v4706_v26 = vld [vmem:[%s6013_s29 + $0x68] sm:$0xf]  ;;  %v558_v59 = vld [vmem:[%s6013_s29 + $0x44] sm:$0x1] }
  0x16   : > { %5331 = vmatmul.mubr.msk.bf16.vlgmr.msra.gmra.mrb[0].mxu0 %vm289_vm2, %v4693_v6  ;;  %v4694_v10 = vcombine.low %v255_v8, %v256_v9  ;;  %v257_v11 = vld [vmem:[%s6013_s29 + $0x80] sm:$0xf]  ;;  %v4715_v27 = vcombine.low %v4705_v25, %v4706_v26  ;;  %v4707_v29 = vld [vmem:[%s6013_s29 + $0x88] sm:$0xf]  ;;  %v588_v60 = vrot.slane %v586_v49, 5  ;;  %v602_v61 = vrot.slane %v600_v50, 5 }
  0x17   : > { %5351 = vmatpush3.bf16.msra.mxu0 %v448_v7  ;;  %5334 = vmatprep.mubr.msk.bf16.mxu0 %vm5943_vm1, %v5942_v1  ;;  %v258_v12 = vld [vmem:[%s6013_s29 + $0xa0] sm:$0xf]  ;;  %v4708_v30 = vld [vmem:[%s6013_s29 + $0xa8] sm:$0xf]  ;;  %v560_v62 = vld [vmem:[%s6013_s29 + $0x64] sm:$0x1] }
  0x18   : > { %5372 = vmatprep.subr.bf16.mxu0 %v5942_v1  ;;  %v4695_v13 = vcombine.low %v257_v11, %v258_v12  ;;  %v259_v14 = vld [vmem:[%s6013_s29 + $0xc0] sm:$0xf]  ;;  %v4716_v33 = vcombine.low %v4707_v29, %v4708_v30  ;;  %v4709_v35 = vld [vmem:[%s6013_s29 + $0xc8] sm:$0xf]  ;;  %v614_v12 = vshll.u32 %v558_v59, 16 }
  0x19   : > { %v260_v15 = vld [vmem:[%s6013_s29 + $0xe0] sm:$0xf]  ;;  %v4710_v36 = vld [vmem:[%s6013_s29 + $0xe8] sm:$0xf]  ;;  %v562_v21 = vld [vmem:[%s6013_s29 + $0x84] sm:$0x1] }
  0x1a   : > { %v4696_v16 = vcombine.low %v259_v14, %v260_v15  ;;  %v261_v17 = vld [vmem:[%s6013_s29 + $0x100] sm:$0xf]  ;;  %v4717_v41 = vcombine.low %v4709_v35, %v4710_v36  ;;  %v4711_v48 = vld [vmem:[%s6013_s29 + $0x108] sm:$0xf]  ;;  %v628_v14 = vshll.u32 %v560_v62, 16  ;;  %v642_v35 = vshll.u32 %v562_v21, 16 }
  0x1b   : > { %v262_v18 = vld [vmem:[%s6013_s29 + $0x120] sm:$0xf]  ;;  %v4712_v53 = vld [vmem:[%s6013_s29 + $0x128] sm:$0xf]  ;;  %v564_v25 = vld [vmem:[%s6013_s29 + $0xa4] sm:$0x1] }
  0x1c   : > { %v4697_v19 = vcombine.low %v261_v17, %v262_v18  ;;  %v553_v28 = vld [vmem:[%s6013_s29] sm:$0xf]  ;;  %v4718_v2 = vcombine.low %v4711_v48, %v4712_v53  ;;  %v630_v30 = vrot.slane %v628_v14, 5  ;;  %v5915_v6 = vld [vmem:[%s6975_s3 + $0x228] sm:$0xff]  }
  0x1d   : > { %v577_v31 = vshrl.u32 %v553_v28, 16  ;;  %v580_v32 = vshll.u32 %v553_v28, 16  ;;  %v555_v34 = vld [vmem:[%s6013_s29 + $0x20] sm:$0xf] }
  0x1e   : > { %5335 = vmatmul.mubr.msk.bf16.gmra.mrb[4].mxu0 %vm289_vm2, %v4694_v10  ;;  %v591_v37 = vshrl.u32 %v555_v34, 16  ;;  %v594_v38 = vshll.u32 %v555_v34, 16  ;;  %v557_v44 = vld [vmem:[%s6013_s29 + $0x40] sm:$0xf]  ;;  %v910_v10 = vsel %vm305_vm0, %v4745_v58, 0 }
  0x1f   : > { %5338 = vmatprep.mubr.msk.bf16.mxu0 %vm5943_vm1, %v5942_v1  ;;  %v579_v42 = vrot.slane %v577_v31, 4  ;;  %v582_v43 = vrot.slane %v580_v32, 5  ;;  %v559_v47 = vld [vmem:[%s6013_s29 + $0x60] sm:$0xf]  ;;  %v605_v51 = vshrl.u32 %v557_v44, 16  ;;  %v608_v52 = vshll.u32 %v557_v44, 16 }
  0x20   : > { %v593_v45 = vrot.slane %v591_v37, 4  ;;  %v596_v46 = vrot.slane %v594_v38, 5  ;;  %v619_v55 = vshrl.u32 %v559_v47, 16  ;;  %v622_v57 = vshll.u32 %v559_v47, 16  ;;  %v561_v5 = vld [vmem:[%s6013_s29 + $0x80] sm:$0xf] }
  0x21   : > { %v583_v54 = vor.u32 %v582_v43, %v579_v42  ;;  %v607_v63 = vrot.slane %v605_v51, 4  ;;  %v610_v0 = vrot.slane %v608_v52, 5  ;;  %v563_v9 = vld [vmem:[%s6013_s29 + $0xa0] sm:$0xf]  ;;  %v633_v15 = vshrl.u32 %v561_v5, 16 }
  0x22   : > { %v597_v56 = vor.u32 %v596_v46, %v593_v45  ;;  %v621_v4 = vrot.slane %v619_v55, 4  ;;  %v624_v8 = vrot.slane %v622_v57, 5  ;;  %v650_v20 = vshll.u32 %v563_v9, 16  ;;  %v565_v28 = vld [vmem:[%s6013_s29 + $0xc0] sm:$0xf] }
  0x23   : > { %v584_v3 = vrot.slane %v583_v54, 4  ;;  %v611_v11 = vor.u32 %v610_v0, %v607_v63  ;;  %v635_v26 = vrot.slane %v633_v15, 4  ;;  %v656_v37 = vshll.u32 %v564_v25, 16  ;;  %v566_v44 = vld [vmem:[%s6013_s29 + $0xc4] sm:$0x1] }
  0x24   : > { %v598_v7 = vrot.slane %v597_v56, 4  ;;  %v625_v18 = vor.u32 %v624_v8, %v621_v4  ;;  %v652_v32 = vrot.slane %v650_v20, 5  ;;  %v661_v38 = vshrl.u32 %v565_v28, 16  ;;  %v568_v46 = vld [vmem:[%s6013_s29 + $0xe4] sm:$0x1] }
  0x25   : > { %v612_v22 = vrot.slane %v611_v11, 4  ;;  %v664_v39 = vshll.u32 %v565_v28, 16  ;;  %v644_v45 = vrot.slane %v642_v35, 5  ;;  %v569_v51 = vld [vmem:[%s6013_s29 + $0x100] sm:$0xf]  ;;  %v658_v53 = vrot.slane %v656_v37, 5 }
  0x26   : > { %5339 = vmatmul.mubr.msk.bf16.gmra.mrb[8].mxu0 %vm289_vm2, %v4695_v13  ;;  %v589_v13 = vsel %vm6083_vm5, %v584_v3, %v588_v60  ;;  %v603_v17 = vsel %vm6083_vm5, %v598_v7, %v602_v61  ;;  %v626_v29 = vrot.slane %v625_v18, 4  ;;  %v663_v49 = vrot.slane %v661_v38, 4  ;;  %v571_v56 = vld [vmem:[%s6013_s29 + $0x120] sm:$0xf]  ;;  %v572_v15 = vld [vmem:[%s6013_s29 + $0x124] sm:$0x1] }
  0x27   : > { %5342 = vmatprep.mubr.msk.bf16.mxu0 %vm5943_vm1, %v5942_v1  ;;  %v666_v50 = vrot.slane %v664_v39, 5  ;;  %v670_v57 = vshll.u32 %v566_v44, 16  ;;  %v684_v58 = vshll.u32 %v568_v46, 16  ;;  %v689_v61 = vshrl.u32 %v569_v51, 16  ;;  %v4735_v35 = vld [vmem:[%s6013_s29 + $0x10] sm:$0xf] }
  0x28   : > { %v631_v40 = vsel %vm6083_vm5, %v626_v29, %v630_v30  ;;  %v692_v62 = vshll.u32 %v569_v51, 16  ;;  %v706_v3 = vshll.u32 %v571_v56, 16  ;;  %v712_v21 = vshll.u32 %v572_v15, 16  ;;  %v4839_v30 = vld [vmem:[%s6973_s1 + $0xe] sm:$0x3] }
  0x29   : > { %v667_v60 = vor.u32 %v666_v50, %v663_v49  ;;  %v672_v4 = vrot.slane %v670_v57, 5  ;;  %v686_v8 = vrot.slane %v684_v58, 5  ;;  %v4766_v37 = vld [vmem:[%s6973_s1 + $0x8] sm:$0x3]  ;;  %v4738_v44 = vld [vmem:[%s6013_s29 + $0x70] sm:$0xf] }
  0x2a   : > { %v708_v14 = vrot.slane %v706_v3, 5  ;;  %v1071_v39 = vsel %vm305_vm0, %v4766_v37, 0  ;;  %v4833_v46 = vld [vmem:[%s6013_s29 + $0xa8] sm:$0xf]  ;;  %v4739_v49 = vld [vmem:[%s6013_s29 + $0x90] sm:$0xf] }
  0x2b   : > { %v668_v7 = vrot.slane %v667_v60, 4  ;;  %v4740_v50 = vld [vmem:[%s6013_s29 + $0xb0] sm:$0xf]  ;;  %v4837_v58 = vld [vmem:[%s6013_s29 + $0x128] sm:$0xf] }
  0x2c   : > { %v4748_v51 = vcombine.low %v4739_v49, %v4740_v50  ;;  %v4797_v3 = vld [vmem:[%s6973_s1 + $0xa] sm:$0x3]  ;;  %v4762_v15 = vld [vmem:[%s6013_s29 + $0xd8] sm:$0xf] }
  0x2e   : > { %5343 = vmatmul.mubr.msk.bf16.gmra.mrb[12].mxu0 %vm289_vm2, %v4696_v16  ;;  %v636_v16 = vshll.u32 %v561_v5, 16 }
  0x2f   : > { %5346 = vmatprep.mubr.msk.bf16.mxu0 %vm5943_vm1, %v5942_v1 }
  0x36   : > { %5347 = vmatmul.mubr.msk.bf16.gmra.mrb[16].mxu0 %vm289_vm2, %v4697_v19  ;;  %v647_v19 = vshrl.u32 %v563_v9, 16  ;;  %v570_v9 = vld [vmem:[%s6013_s29 + $0x104] sm:$0x1] }
  0x37   : > { %5352 = vmatprep.mubr.msk.bf16.mxu0 %vm5943_vm1, %v5942_v1 }
  0x38   : > { %v649_v31 = vrot.slane %v647_v19, 4 }
  0x3e   : > { %5353 = vmatmul.mubr.msk.bf16.vlgmr.msra.gmra.mrb[20].mxu0 %vm289_vm2, %v4714_v24  ;;  %v4725_v24 = vcombine.low %v589_v13, %v603_v17  ;;  %v698_v17 = vshll.u32 %v570_v9, 16 }
  0x3f   : > { %5373 = vmatpush3.bf16.msra.mxu0 %v749_v23  ;;  %5356 = vmatprep.mubr.msk.bf16.mxu0 %vm5943_vm1, %v5942_v1  ;;  %v616_v23 = vrot.slane %v614_v12, 5  ;;  %v694_v12 = vrot.slane %v692_v62, 5  ;;  %v4744_v62 = vld [vmem:[%s6013_s29 + $0x130] sm:$0xf] }
  0x40   : > { %5394 = vmatprep.subr.bf16.mxu0 %v5942_v1 }
  0x41   : > { %v617_v34 = vsel %vm6083_vm5, %v612_v22, %v616_v23 }
  0x42   : > { %v4726_v47 = vcombine.low %v617_v34, %v631_v40  ;;  %v4831_v40 = vld [vmem:[%s6013_s29 + $0x68] sm:$0xf] }
  0x46   : > { %5357 = vmatmul.mubr.msk.bf16.gmra.mrb[24].mxu0 %vm289_vm2, %v4715_v27  ;;  %v638_v27 = vrot.slane %v636_v16, 5  ;;  %v673_v16 = vsel %vm6083_vm5, %v668_v7, %v672_v4  ;;  %v4758_v7 = vld [vmem:[%s6013_s29 + $0x58] sm:$0xf] }
  0x47   : > { %5360 = vmatprep.mubr.msk.bf16.mxu0 %vm5943_vm1, %v5942_v1 }
  0x48   : > { %v639_v36 = vor.u32 %v638_v27, %v635_v26  ;;  %v714_v26 = vrot.slane %v712_v21, 5  ;;  %v4781_v21 = vld [vmem:[%s6013_s29 + $0x50] sm:$0xf] }
  0x4a   : > { %v640_v48 = vrot.slane %v639_v36, 4  ;;  %v4736_v36 = vld [vmem:[%s6013_s29 + $0x30] sm:$0xf] }
  0x4b   : > { %v4746_v38 = vcombine.low %v4735_v35, %v4736_v36  ;;  %v4765_v35 = vld [vmem:[%s6013_s29 + $0x138] sm:$0xf] }
  0x4c   : > { %v645_v59 = vsel %vm6083_vm5, %v640_v48, %v644_v45 }
  0x4e   : > { %5361 = vmatmul.mubr.msk.bf16.gmra.mrb[28].mxu0 %vm289_vm2, %v4716_v33  ;;  %v567_v33 = vld [vmem:[%s6013_s29 + $0xe0] sm:$0xf] }
  0x4f   : > { %5364 = vmatprep.mubr.msk.bf16.mxu0 %vm5943_vm1, %v5942_v1  ;;  %v675_v42 = vshrl.u32 %v567_v33, 16  ;;  %v678_v43 = vshll.u32 %v567_v33, 16  ;;  %v4830_v33 = vld [vmem:[%s6013_s29 + $0x48] sm:$0xf] }
  0x51   : > { %v677_v54 = vrot.slane %v675_v42, 4  ;;  %v680_v55 = vrot.slane %v678_v43, 5  ;;  %v4737_v43 = vld [vmem:[%s6013_s29 + $0x50] sm:$0xf] }
  0x52   : > { %v4747_v45 = vcombine.low %v4737_v43, %v4738_v44  ;;  %v4782_v44 = vld [vmem:[%s6013_s29 + $0x54] sm:$0x1] }
  0x53   : > { %v681_v0 = vor.u32 %v680_v55, %v677_v54  ;;  %v4741_v55 = vld [vmem:[%s6013_s29 + $0xd0] sm:$0xf] }
  0x55   : > { %v682_v11 = vrot.slane %v681_v0, 4  ;;  %v4756_v0 = vld [vmem:[%s6013_s29 + $0x18] sm:$0xf] }
  0x56   : > { %5365 = vmatmul.mubr.msk.bf16.gmra.mrb[32].mxu0 %vm289_vm2, %v4717_v41  ;;  %v653_v41 = vor.u32 %v652_v32, %v649_v31  ;;  %v1692_v31 = vsel %vm305_vm0, %v4839_v30, 0  ;;  %v4829_v32 = vld [vmem:[%s6013_s29 + $0x28] sm:$0xf]  ;;  %v1225_v30 = vshrl.u32 %v4781_v21, 16 }
  0x57   : > { %5368 = vmatprep.mubr.msk.bf16.mxu0 %vm5943_vm1, %v5942_v1  ;;  %v687_v18 = vsel %vm6083_vm5, %v682_v11, %v686_v8  ;;  %5483 = vmatpush3.bf16.msra.mxu1 %v1692_v31  ;;  %v4840_v34 = vcombine.low %v4829_v32, %v4830_v33  ;;  %v4759_v8 = vld [vmem:[%s6013_s29 + $0x78] sm:$0xf]  ;;  %v1228_v31 = vshll.u32 %v4781_v21, 16 }
  0x58   : > { %v654_v52 = vrot.slane %v653_v41, 4  ;;  %v4728_v22 = vcombine.low %v673_v16, %v687_v18  ;;  %v4832_v41 = vld [vmem:[%s6013_s29 + $0x88] sm:$0xf]  ;;  %v4768_v9 = vcombine.low %v4758_v7, %v4759_v8  ;;  %v4761_v11 = vld [vmem:[%s6013_s29 + $0xb8] sm:$0xf] }
  0x59   : > { %v4841_v42 = vcombine.low %v4831_v40, %v4832_v41  ;;  %v4763_v16 = vld [vmem:[%s6013_s29 + $0xf8] sm:$0xf]  ;;  %v1227_v40 = vrot.slane %v1225_v30, 4  ;;  %v1230_v41 = vrot.slane %v1228_v31, 5 }
  0x5a   : > { %v659_v63 = vsel %vm6083_vm5, %v654_v52, %v658_v53  ;;  %5485 = vmatmul.mubr.msk.bf16.vlgmr.msra.gmra.mrb[0].mxu1 %vm289_vm2, %v4840_v34  ;;  %v4835_v52 = vld [vmem:[%s6013_s29 + $0xe8] sm:$0xf]  ;;  %v4764_v34 = vld [vmem:[%s6013_s29 + $0x118] sm:$0xf] }
  0x5b   : > { %v4727_v5 = vcombine.low %v645_v59, %v659_v63  ;;  %5488 = vmatprep.mubr.msk.bf16.mxu1 %vm5943_vm1, %v5942_v1  ;;  %v4836_v53 = vld [vmem:[%s6013_s29 + $0x108] sm:$0xf] }
  0x5c   : > { %v4843_v54 = vcombine.low %v4835_v52, %v4836_v53  ;;  %v4838_v59 = vld [vmem:[%s6013_s29 + $0x148] sm:$0xf]  ;;  %v1231_v53 = vor.u32 %v1230_v41, %v1227_v40 }
  0x5d   : > { %v4844_v60 = vcombine.low %v4837_v58, %v4838_v59 }
  0x5e   : > { %5369 = vmatmul.mubr.msk.bf16.gmra.mrb[36].mxu0 %vm289_vm2, %v4718_v2  ;;  %v703_v2 = vshrl.u32 %v571_v56, 16  ;;  %v4742_v56 = vld [vmem:[%s6013_s29 + $0xf0] sm:$0xf] }
  0x5f   : > { %5374 = vmatprep.mubr.msk.bf16.mxu0 %vm5943_vm1, %v5942_v1  ;;  %v4749_v57 = vcombine.low %v4741_v55, %v4742_v56 }
  0x60   : > { %v705_v13 = vrot.slane %v703_v2, 4  ;;  %v4757_v2 = vld [vmem:[%s6013_s29 + $0x38] sm:$0xf] }
  0x61   : > { %v4767_v4 = vcombine.low %v4756_v0, %v4757_v2 }
  0x62   : > { %v709_v20 = vor.u32 %v708_v14, %v705_v13  ;;  %5489 = vmatmul.mubr.msk.bf16.gmra.mrb[4].mxu1 %vm289_vm2, %v4841_v42  ;;  %v4777_v13 = vld [vmem:[%s6013_s29 + $0x10] sm:$0xf] }
  0x63   : > { %5492 = vmatprep.mubr.msk.bf16.mxu1 %vm5943_vm1, %v5942_v1  ;;  %v4779_v14 = vld [vmem:[%s6013_s29 + $0x30] sm:$0xf]  ;;  %v1200_v18 = vshll.u32 %v4777_v13, 16 }
  0x64   : > { %v710_v25 = vrot.slane %v709_v20, 4  ;;  %v1214_v20 = vshll.u32 %v4779_v14, 16 }
  0x66   : > { %5375 = vmatmul.mubr.msk.bf16.vlgmr.msra.gmra.mrb[40].mxu0 %vm289_vm2, %v4725_v24  ;;  %v700_v24 = vrot.slane %v698_v17, 5  ;;  %v715_v28 = vsel %vm6083_vm5, %v710_v25, %v714_v26  ;;  %v1197_v17 = vshrl.u32 %v4777_v13, 16  ;;  %v1202_v26 = vrot.slane %v1200_v18, 5  ;;  %v4789_v13 = vld [vmem:[%s6013_s29 + $0xd0] sm:$0xf] }
  0x67   : > { %5395 = vmatpush3.bf16.msra.mxu0 %v910_v10  ;;  %5378 = vmatprep.mubr.msk.bf16.mxu0 %vm5943_vm1, %v5942_v1  ;;  %v691_v10 = vrot.slane %v689_v61, 4  ;;  %v4743_v61 = vld [vmem:[%s6013_s29 + $0x110] sm:$0xf] }
  0x68   : > { %5416 = vmatprep.subr.bf16.mxu0 %v5942_v1  ;;  %v4750_v63 = vcombine.low %v4743_v61, %v4744_v62  ;;  %v1199_v25 = vrot.slane %v1197_v17, 4 }
  0x69   : > { %v695_v19 = vor.u32 %v694_v12, %v691_v10  ;;  %v4760_v10 = vld [vmem:[%s6013_s29 + $0x98] sm:$0xf] }
  0x6a   : > { %v4769_v12 = vcombine.low %v4760_v10, %v4761_v11  ;;  %v1203_v36 = vor.u32 %v1202_v26, %v1199_v25  ;;  %v4786_v11 = vld [vmem:[%s6013_s29 + $0x94] sm:$0x1] }
  0x6b   : > { %v696_v23 = vrot.slane %v695_v19, 4  ;;  %v1211_v19 = vshrl.u32 %v4779_v14, 16  ;;  %v4791_v14 = vld [vmem:[%s6013_s29 + $0xf0] sm:$0xf] }
  0x6c   : > { %v1204_v49 = vrot.slane %v1203_v36, 4  ;;  %v1298_v25 = vshll.u32 %v4791_v14, 16  ;;  %v4792_v36 = vld [vmem:[%s6013_s29 + $0xf4] sm:$0x1] }
  0x6d   : > { %v701_v27 = vsel %vm6083_vm5, %v696_v23, %v700_v24  ;;  %v4770_v23 = vcombine.low %v4762_v15, %v4763_v16  ;;  %v4778_v24 = vld [vmem:[%s6013_s29 + $0x14] sm:$0x1] }
  0x6e   : > { %5379 = vmatmul.mubr.msk.bf16.gmra.mrb[44].mxu0 %vm289_vm2, %v4726_v47  ;;  %v4729_v29 = vcombine.low %v701_v27, %v715_v28  ;;  %v4834_v47 = vld [vmem:[%s6013_s29 + $0xc8] sm:$0xf]  ;;  %v1213_v27 = vrot.slane %v1211_v19, 4  ;;  %v1216_v28 = vrot.slane %v1214_v20, 5  ;;  %v1206_v37 = vshll.u32 %v4778_v24, 16 }
  0x6f   : > { %5382 = vmatprep.mubr.msk.bf16.mxu0 %vm5943_vm1, %v5942_v1  ;;  %v4842_v48 = vcombine.low %v4833_v46, %v4834_v47  ;;  %v4771_v46 = vcombine.low %v4764_v34, %v4765_v35  ;;  %v4785_v47 = vld [vmem:[%s6013_s29 + $0x90] sm:$0xf]  ;;  %v1262_v19 = vshll.u32 %v4786_v11, 16  ;;  %v1295_v24 = vshrl.u32 %v4791_v14, 16  ;;  %v4790_v35 = vld [vmem:[%s6013_s29 + $0xd4] sm:$0x1] }
  0x70   : > { %v1208_v50 = vrot.slane %v1206_v37, 5  ;;  %v1256_v58 = vshll.u32 %v4785_v47, 16  ;;  %v1300_v34 = vrot.slane %v1298_v25, 5  ;;  %v4793_v37 = vld [vmem:[%s6013_s29 + $0x110] sm:$0xf] }
  0x71   : > { %5493 = vmatmul.mubr.msk.bf16.gmra.mrb[8].mxu1 %vm289_vm2, %v4842_v48  ;;  %v4787_v48 = vld [vmem:[%s6013_s29 + $0xb0] sm:$0xf]  ;;  %v4809_v25 = vld [vmem:[%s6013_s29 + $0x40] sm:$0xf] }
  0x72   : > { %5496 = vmatprep.mubr.msk.bf16.mxu1 %vm5943_vm1, %v5942_v1  ;;  %v1267_v59 = vshrl.u32 %v4787_v48, 16  ;;  %v1209_v61 = vsel %vm6083_vm5, %v1204_v49, %v1208_v50  ;;  %v1258_v7 = vrot.slane %v1256_v58, 5 }
  0x74   : > { %v1269_v8 = vrot.slane %v1267_v59, 4 }
  0x76   : > { %5383 = vmatmul.mubr.msk.bf16.gmra.mrb[48].mxu0 %vm289_vm2, %v4727_v5  ;;  %v1369_v5 = vsel %vm305_vm0, %v4797_v3, 0 }
  0x77   : > { %5386 = vmatprep.mubr.msk.bf16.mxu0 %vm5943_vm1, %v5942_v1 }
  0x79   : > { %5497 = vmatmul.mubr.msk.bf16.gmra.mrb[12].mxu1 %vm289_vm2, %v4843_v54  ;;  %v1234_v54 = vshll.u32 %v4782_v44, 16  ;;  %v1304_v44 = vshll.u32 %v4792_v36, 16 }
  0x7a   : > { %5500 = vmatprep.mubr.msk.bf16.mxu1 %vm5943_vm1, %v5942_v1 }
  0x7b   : > { %v1236_v0 = vrot.slane %v1234_v54, 5 }
  0x7e   : > { %5387 = vmatmul.mubr.msk.bf16.gmra.mrb[52].mxu0 %vm289_vm2, %v4728_v22  ;;  %v4783_v22 = vld [vmem:[%s6013_s29 + $0x70] sm:$0xf] }
  0x7f   : > { %5390 = vmatprep.mubr.msk.bf16.mxu0 %vm5943_vm1, %v5942_v1  ;;  %v1239_v32 = vshrl.u32 %v4783_v22, 16  ;;  %v1242_v33 = vshll.u32 %v4783_v22, 16  ;;  %v1281_v22 = vshrl.u32 %v4789_v13, 16 }
  0x81   : > { %5501 = vmatmul.mubr.msk.bf16.gmra.mrb[16].mxu1 %vm289_vm2, %v4844_v60  ;;  %v1241_v42 = vrot.slane %v1239_v32, 4  ;;  %v1244_v43 = vrot.slane %v1242_v33, 5  ;;  %v1270_v60 = vshll.u32 %v4787_v48, 16  ;;  %v1283_v31 = vrot.slane %v1281_v22, 4 }
  0x82   : > { %v1297_v33 = vrot.slane %v1295_v24, 4  ;;  %v4808_v24 = vld [vmem:[%s6013_s29 + $0x20] sm:$0xf] }
  0x83   : > { %v1245_v55 = vor.u32 %v1244_v43, %v1241_v42  ;;  %v1290_v42 = vshll.u32 %v4790_v35, 16 }
  0x84   : > { %v1301_v43 = vor.u32 %v1300_v34, %v1297_v33  ;;  %v4810_v33 = vld [vmem:[%s6013_s29 + $0x60] sm:$0xf] }
  0x85   : > { %v1246_v2 = vrot.slane %v1245_v55, 4  ;;  %v1306_v55 = vrot.slane %v1304_v44, 5  ;;  %v4811_v34 = vld [vmem:[%s6013_s29 + $0x80] sm:$0xf] }
  0x86   : > { %5391 = vmatmul.mubr.msk.bf16.gmra.mrb[56].mxu0 %vm289_vm2, %v4729_v29  ;;  %v4780_v29 = vld [vmem:[%s6013_s29 + $0x34] sm:$0x1]  ;;  %v1302_v54 = vrot.slane %v1301_v43, 4 }
  0x87   : > { %5396 = vmatprep.mubr.msk.bf16.mxu0 %vm5943_vm1, %v5942_v1 }
  0x8e   : > { %5397 = vmatmul.mubr.msk.bf16.vlgmr.msra.gmra.mrb[60].mxu0 %vm289_vm2, %v4746_v38  ;;  %v1217_v38 = vor.u32 %v1216_v28, %v1213_v27  ;;  %v1264_v28 = vrot.slane %v1262_v19, 5 }
  0x8f   : > { %5417 = vmatpush3.bf16.msra.mxu0 %v1071_v39  ;;  %5400 = vmatprep.mubr.msk.bf16.mxu0 %vm5943_vm1, %v5942_v1  ;;  %v1220_v39 = vshll.u32 %v4780_v29, 16 }
  0x90   : > { %5438 = vmatprep.subr.bf16.mxu0 %v5942_v1 }
  0x91   : > { %v1222_v52 = vrot.slane %v1220_v39, 5 }
  0x96   : > { %5401 = vmatmul.mubr.msk.bf16.gmra.mrb[64].mxu0 %vm289_vm2, %v4747_v45  ;;  %v4784_v45 = vld [vmem:[%s6013_s29 + $0x74] sm:$0x1] }
  0x97   : > { %5404 = vmatprep.mubr.msk.bf16.mxu0 %vm5943_vm1, %v5942_v1  ;;  %v1248_v56 = vshll.u32 %v4784_v45, 16  ;;  %v1309_v45 = vshrl.u32 %v4793_v37, 16 }
  0x99   : > { %v1250_v3 = vrot.slane %v1248_v56, 5 }
  0x9b   : > { %v1251_v17 = vsel %vm6083_vm5, %v1246_v2, %v1250_v3  ;;  %v1307_v2 = vsel %vm6083_vm5, %v1302_v54, %v1306_v55  ;;  %v4815_v54 = vld [vmem:[%s6013_s29 + $0x100] sm:$0xf] }
  0x9e   : > { %5405 = vmatmul.mubr.msk.bf16.gmra.mrb[68].mxu0 %vm289_vm2, %v4748_v51  ;;  %v1218_v51 = vrot.slane %v1217_v38, 4  ;;  %v4795_v38 = vld [vmem:[%s6013_s29 + $0x130] sm:$0xf] }
  0x9f   : > { %5408 = vmatprep.mubr.msk.bf16.mxu0 %vm5943_vm1, %v5942_v1  ;;  %v1326_v48 = vshll.u32 %v4795_v38, 16 }
  0xa0   : > { %v1223_v62 = vsel %vm6083_vm5, %v1218_v51, %v1222_v52 }
  0xa1   : > { %v4798_v10 = vcombine.low %v1209_v61, %v1223_v62  ;;  %v4794_v62 = vld [vmem:[%s6013_s29 + $0x114] sm:$0x1] }
  0xa6   : > { %5409 = vmatmul.mubr.msk.bf16.gmra.mrb[72].mxu0 %vm289_vm2, %v4749_v57  ;;  %v1253_v57 = vshrl.u32 %v4785_v47, 16  ;;  %v1323_v47 = vshrl.u32 %v4795_v38, 16 }
  0xa7   : > { %5412 = vmatprep.mubr.msk.bf16.mxu0 %vm5943_vm1, %v5942_v1 }
  0xa8   : > { %v1325_v59 = vrot.slane %v1323_v47, 4 }
  0xae   : > { %5413 = vmatmul.mubr.msk.bf16.gmra.mrb[76].mxu0 %vm289_vm2, %v4750_v63  ;;  %v1232_v63 = vrot.slane %v1231_v53, 4  ;;  %v1292_v53 = vrot.slane %v1290_v42, 5 }
  0xaf   : > { %5418 = vmatprep.mubr.msk.bf16.mxu0 %vm5943_vm1, %v5942_v1 }
  0xb0   : > { %v1237_v16 = vsel %vm6083_vm5, %v1232_v63, %v1236_v0  ;;  %v4796_v63 = vld [vmem:[%s6013_s29 + $0x134] sm:$0x1] }
  0xb1   : > { %v4799_v26 = vcombine.low %v1237_v16, %v1251_v17 }
  0xb6   : > { %5419 = vmatmul.mubr.msk.bf16.vlgmr.msra.gmra.mrb[80].mxu0 %vm289_vm2, %v4767_v4  ;;  %v4818_v4 = vld [vmem:[%s6973_s1 + $0xc] sm:$0x3] }
  0xb7   : > { %5439 = vmatpush3.bf16.msra.mxu0 %v1369_v5  ;;  %5422 = vmatprep.mubr.msk.bf16.mxu0 %vm5943_vm1, %v5942_v1  ;;  %v1255_v5 = vrot.slane %v1253_v57, 4  ;;  %v1531_v15 = vsel %vm305_vm0, %v4818_v4, 0  ;;  %v1311_v57 = vrot.slane %v1309_v45, 4  ;;  %v1318_v4 = vshll.u32 %v4794_v62, 16 }
  0xb8   : > { %5460 = vmatprep.subr.bf16.mxu0 %v5942_v1 }
  0xb9   : > { %v1259_v18 = vor.u32 %v1258_v7, %v1255_v5  ;;  %v1332_v7 = vshll.u32 %v4796_v63, 16 }
  0xbb   : > { %v1260_v27 = vrot.slane %v1259_v18, 4 }
  0xbd   : > { %v1265_v39 = vsel %vm6083_vm5, %v1260_v27, %v1264_v28  ;;  %v4870_v27 = vld [vmem:[%s6973_s1 + $0x10] sm:$0x3] }
  0xbe   : > { %5423 = vmatmul.mubr.msk.bf16.gmra.mrb[84].mxu0 %vm289_vm2, %v4768_v9  ;;  %v1272_v9 = vrot.slane %v1270_v60, 5  ;;  %v1328_v60 = vrot.slane %v1326_v48, 5 }
  0xbf   : > { %5426 = vmatprep.mubr.msk.bf16.mxu0 %vm5943_vm1, %v5942_v1 }
  0xc0   : > { %v1273_v20 = vor.u32 %v1272_v9, %v1269_v8  ;;  %v1329_v5 = vor.u32 %v1328_v60, %v1325_v59 }
  0xc2   : > { %v1274_v29 = vrot.slane %v1273_v20, 4  ;;  %v1330_v14 = vrot.slane %v1329_v5, 4 }
  0xc6   : > { %5427 = vmatmul.mubr.msk.bf16.gmra.mrb[88].mxu0 %vm289_vm2, %v4769_v12  ;;  %v4788_v12 = vld [vmem:[%s6013_s29 + $0xb4] sm:$0x1] }
  0xc7   : > { %5430 = vmatprep.mubr.msk.bf16.mxu0 %vm5943_vm1, %v5942_v1  ;;  %v1276_v21 = vshll.u32 %v4788_v12, 16 }
  0xc9   : > { %v1278_v30 = vrot.slane %v1276_v21, 5 }
  0xcb   : > { %v1279_v40 = vsel %vm6083_vm5, %v1274_v29, %v1278_v30  ;;  %v4819_v29 = vcombine.low %v4808_v24, %v4809_v25  ;;  %v4857_v25 = vld [vmem:[%s6013_s29 + $0x84] sm:$0x1] }
  0xcc   : > { %v4800_v50 = vcombine.low %v1265_v39, %v1279_v40  ;;  %v4812_v40 = vld [vmem:[%s6013_s29 + $0xa0] sm:$0xf] }
  0xce   : > { %5431 = vmatmul.mubr.msk.bf16.gmra.mrb[92].mxu0 %vm289_vm2, %v4770_v23  ;;  %v1284_v23 = vshll.u32 %v4789_v13, 16  ;;  %v1320_v13 = vrot.slane %v1318_v4, 5 }
  0xcf   : > { %5434 = vmatprep.mubr.msk.bf16.mxu0 %vm5943_vm1, %v5942_v1 }
  0xd0   : > { %v1286_v32 = vrot.slane %v1284_v23, 5 }
  0xd2   : > { %v1287_v41 = vor.u32 %v1286_v32, %v1283_v31  ;;  %v1990_v32 = vsel %vm305_vm0, %v4870_v27, 0 }
  0xd4   : > { %v1288_v52 = vrot.slane %v1287_v41, 4  ;;  %v4813_v41 = vld [vmem:[%s6013_s29 + $0xc0] sm:$0xf] }
  0xd5   : > { %v4821_v45 = vcombine.low %v4812_v40, %v4813_v41  ;;  %v4860_v40 = vld [vmem:[%s6013_s29 + $0xc0] sm:$0xf] }
  0xd6   : > { %5435 = vmatmul.mubr.msk.bf16.gmra.mrb[96].mxu0 %vm289_vm2, %v4771_v46  ;;  %v1312_v46 = vshll.u32 %v4793_v37, 16  ;;  %v1293_v0 = vsel %vm6083_vm5, %v1288_v52, %v1292_v53  ;;  %v4820_v37 = vcombine.low %v4810_v33, %v4811_v34 }
  0xd7   : > { %5440 = vmatprep.mubr.msk.bf16.mxu0 %vm5943_vm1, %v5942_v1 }
  0xd8   : > { %v1314_v58 = vrot.slane %v1312_v46, 5  ;;  %v4850_v46 = vld [vmem:[%s6013_s29 + $0x20] sm:$0xf] }
  0xd9   : > { %v1818_v52 = vshrl.u32 %v4850_v46, 16  ;;  %v1821_v53 = vshll.u32 %v4850_v46, 16  ;;  %v1869_v46 = vshll.u32 %v4857_v25, 16 }
  0xda   : > { %v1315_v3 = vor.u32 %v1314_v58, %v1311_v57  ;;  %v4854_v58 = vld [vmem:[%s6013_s29 + $0x60] sm:$0xf] }
  0xdb   : > { %v1820_v60 = vrot.slane %v1818_v52, 4 }
  0xdc   : > { %v1316_v12 = vrot.slane %v1315_v3, 4  ;;  %v1823_v3 = vrot.slane %v1821_v53, 5 }
  0xde   : > { %5441 = vmatmul.mubr.msk.bf16.vlgmr.msra.gmra.mrb[100].mxu0 %vm289_vm2, %v4798_v10  ;;  %v4801_v10 = vcombine.low %v1293_v0, %v1307_v2  ;;  %v1321_v17 = vsel %vm6083_vm5, %v1316_v12, %v1320_v13  ;;  %v4851_v0 = vld [vmem:[%s6013_s29 + $0x24] sm:$0x1] }
  0xdf   : > { %5461 = vmatpush3.bf16.msra.mxu0 %v1531_v15  ;;  %5444 = vmatprep.mubr.msk.bf16.mxu0 %vm5943_vm1, %v5942_v1  ;;  %v1334_v15 = vrot.slane %v1332_v7, 5  ;;  %v4853_v2 = vld [vmem:[%s6013_s29 + $0x44] sm:$0x1] }
  0xe0   : > { %5504 = vmatprep.subr.bf16.mxu0 %v5942_v1 }
  0xe1   : > { %v1335_v18 = vsel %vm6083_vm5, %v1330_v14, %v1334_v15  ;;  %v4816_v15 = vld [vmem:[%s6013_s29 + $0x120] sm:$0xf] }
  0xe2   : > { %v4802_v21 = vcombine.low %v1321_v17, %v1335_v18  ;;  %v1824_v17 = vor.u32 %v1823_v3, %v1820_v60  ;;  %v1827_v18 = vshll.u32 %v4851_v0, 16 }
  0xe6   : > { %5445 = vmatmul.mubr.msk.bf16.gmra.mrb[104].mxu0 %vm289_vm2, %v4799_v26 }
  0xe7   : > { %5448 = vmatprep.mubr.msk.bf16.mxu0 %vm5943_vm1, %v5942_v1 }
  0xe9   : > { %v6266_v49 = vpop.f32.mrb[0].mxu0 }
  0xea   : > { %v5332_v51 = vpop.f32.mrb[1].mxu0 }
  0xeb   : > { %v6268_v56 = vpop.f32.mrb[2].mxu0  ;;  %v4852_v51 = vld [vmem:[%s6013_s29 + $0x40] sm:$0xf] }
  0xec   : > { %v5333_v61 = vpop.f32.mrb[3].mxu0  ;;  %v1832_v55 = vshrl.u32 %v4852_v51, 16  ;;  %v1835_v57 = vshll.u32 %v4852_v51, 16 }
  0xee   : > { %5449 = vmatmul.mubr.msk.bf16.gmra.mrb[108].mxu0 %vm289_vm2, %v4800_v50  ;;  %v1834_v5 = vrot.slane %v1832_v55, 4  ;;  %v1837_v7 = vrot.slane %v1835_v57, 5 }
  0xef   : > { %5452 = vmatprep.mubr.msk.bf16.mxu0 %vm5943_vm1, %v5942_v1 }
  0xf1   : > { %v6279_v8 = vpop.f32.mrb[4].mxu0 }
  0xf2   : > { %v5336_v9 = vpop.f32.mrb[5].mxu0 }
  0xf3   : > { %v6281_v11 = vpop.f32.mrb[6].mxu0  ;;  %v1846_v9 = vshrl.u32 %v4854_v58, 16 }
  0xf4   : > { %v5337_v16 = vpop.f32.mrb[7].mxu0 }
  0xf5   : > { %v4817_v16 = vld [vmem:[%s6013_s29 + $0x140] sm:$0xf] }
  0xf6   : > { %5453 = vmatmul.mubr.msk.bf16.gmra.mrb[112].mxu0 %vm289_vm2, %v4801_v10  ;;  %v1849_v10 = vshll.u32 %v4854_v58, 16 }
  0xf7   : > { %5456 = vmatprep.mubr.msk.bf16.mxu0 %vm5943_vm1, %v5942_v1 }
  0xf8   : > { %v1851_v24 = vrot.slane %v1849_v10, 5 }
  0xf9   : > { %v6290_v19 = vpop.f32.mrb[8].mxu0 }
  0xfa   : > { %v5340_v20 = vpop.f32.mrb[9].mxu0 }
  0xfb   : > { %v6292_v22 = vpop.f32.mrb[10].mxu0  ;;  %v1841_v20 = vshll.u32 %v4853_v2, 16 }
  0xfc   : > { %v5341_v23 = vpop.f32.mrb[11].mxu0 }
  0xfd   : > { %v1848_v23 = vrot.slane %v1846_v9, 4  ;;  %v4862_v9 = vld [vmem:[%s6013_s29 + $0xe0] sm:$0xf] }
  0xfe   : > { %5457 = vmatmul.mubr.msk.bf16.gmra.mrb[116].mxu0 %vm289_vm2, %v4802_v21  ;;  %v1838_v21 = vor.u32 %v1837_v7, %v1834_v5  ;;  %v4861_v5 = vld [vmem:[%s6013_s29 + $0xc4] sm:$0x1] }
  0xff   : > { %5462 = vmatprep.mubr.msk.bf16.mxu0 %vm5943_vm1, %v5942_v1 }
 0x101   : > { %v6299_v26 = vpop.f32.mrb[12].mxu0 }
 0x102   : > { %v5344_v28 = vpop.f32.mrb[13].mxu0 }
 0x103   : > { %v6304_v30 = vpop.f32.mrb[14].mxu0 }
 0x104   : > { %v5345_v31 = vpop.f32.mrb[15].mxu0 }
 0x105   : > { %v4823_v31 = vcombine.low %v4816_v15, %v4817_v16 }
 0x106   : > { %5463 = vmatmul.mubr.msk.bf16.vlgmr.msra.gmra.mrb[120].mxu0 %vm289_vm2, %v4819_v29 }
 0x107   : > { %5505 = vmatpush3.bf16.msra.mxu0 %v1990_v32  ;;  %5466 = vmatprep.mubr.msk.bf16.mxu0 %vm5943_vm1, %v5942_v1  ;;  %v4858_v32 = vld [vmem:[%s6013_s29 + $0xa0] sm:$0xf] }
 0x108   : > { %v1874_v52 = vshrl.u32 %v4858_v32, 16  ;;  %v1877_v53 = vshll.u32 %v4858_v32, 16 }
 0x109   : > { %v6312_v35 = vpop.f32.mrb[16].mxu0 }
 0x10a   : > { %v5348_v36 = vpop.f32.mrb[17].mxu0  ;;  %v1876_v60 = vrot.slane %v1874_v52, 4 }
 0x10b   : > { %v6314_v38 = vpop.f32.mrb[18].mxu0  ;;  %v1825_v36 = vrot.slane %v1824_v17, 4 }
 0x10c   : > { %v5349_v39 = vpop.f32.mrb[19].mxu0 }
 0x10d   : > { %v1843_v39 = vrot.slane %v1841_v20, 5  ;;  %v1902_v20 = vshrl.u32 %v4862_v9, 16 }
 0x10e   : > { %5467 = vmatmul.mubr.msk.bf16.gmra.mrb[124].mxu0 %vm289_vm2, %v4820_v37  ;;  %v1829_v37 = vrot.slane %v1827_v18, 5  ;;  %v1897_v18 = vshll.u32 %v4861_v5, 16 }
 0x10f   : > { %5470 = vmatprep.mubr.msk.bf16.mxu0 %vm5943_vm1, %v5942_v1 }
 0x111   : > { %v484_v42 = vpop.f32.mrb[20].mxu0 }
 0x112   : > { %v6322_v43 = vadd.f32 %v484_v42, %v6266_v49  ;;  %v5354_v44 = vpop.f32.mrb[21].mxu0  ;;  %v4814_v49 = vld [vmem:[%s6013_s29 + $0xe0] sm:$0xf]  ;;  %v1839_v42 = vrot.slane %v1838_v21, 4  ;;  %v1905_v21 = vshll.u32 %v4862_v9, 16 }
 0x113   : > { %v487_v47 = vpop.f32.mrb[22].mxu0  ;;  %v4822_v63 = vcombine.low %v4814_v49, %v4815_v54  ;;  %v1852_v44 = vor.u32 %v1851_v24, %v1848_v23  ;;  %v1891_v49 = vshll.u32 %v4860_v40, 16  ;;  %v1830_v54 = vsel %vm6083_vm5, %v1825_v36, %v1829_v37 }
 0x114   : > { %v6326_v48 = vadd.f32 %v487_v47, %v6268_v56  ;;  %v5355_v50 = vpop.f32.mrb[23].mxu0  ;;  %v4856_v56 = vld [vmem:[%s6013_s29 + $0x80] sm:$0xf]  ;;  %v1907_v32 = vrot.slane %v1905_v21, 5 }
 0x115   : > { %v1863_v14 = vshll.u32 %v4856_v56, 16  ;;  %v1853_v55 = vrot.slane %v1852_v44, 4  ;;  %v1893_v7 = vrot.slane %v1891_v49, 5  ;;  %v4865_v44 = vld [vmem:[%s6013_s29 + $0x104] sm:$0x1] }
 0x116   : > { %5471 = vmatmul.mubr.msk.bf16.gmra.mrb[128].mxu0 %vm289_vm2, %v4821_v45 }
 0x117   : > { %5474 = vmatprep.mubr.msk.bf16.mxu0 %vm5943_vm1, %v5942_v1  ;;  %v1865_v28 = vrot.slane %v1863_v14, 5 }
 0x119   : > { %v492_v59 = vpop.f32.mrb[24].mxu0 }
 0x11a   : > { %v6337_v61 = vadd.f32 %v492_v59, %v6279_v8  ;;  %v5358_v62 = vpop.f32.mrb[25].mxu0  ;;  %v1860_v8 = vshrl.u32 %v4856_v56, 16  ;;  %v1871_v59 = vrot.slane %v1869_v46, 5  ;;  %v1879_v56 = vrot.slane %v1877_v53, 5 }
 0x11b   : > { %v495_v4 = vpop.f32.mrb[26].mxu0 }
 0x11c   : > { %v6342_v12 = vadd.f32 %v495_v4, %v6281_v11  ;;  %v5359_v13 = vpop.f32.mrb[27].mxu0  ;;  %v4855_v11 = vld [vmem:[%s6013_s29 + $0x64] sm:$0x1]  ;;  %v1862_v27 = vrot.slane %v1860_v8, 4  ;;  %v1880_v17 = vor.u32 %v1879_v56, %v1876_v60 }
 0x11d   : > { %v1855_v45 = vshll.u32 %v4855_v11, 16  ;;  %v4864_v13 = vld [vmem:[%s6013_s29 + $0x100] sm:$0xf] }
 0x11e   : > { %5475 = vmatmul.mubr.msk.bf16.gmra.mrb[132].mxu0 %vm289_vm2, %v4822_v63  ;;  %v1866_v51 = vor.u32 %v1865_v28, %v1862_v27  ;;  %v4859_v63 = vld [vmem:[%s6013_s29 + $0xa4] sm:$0x1]  ;;  %v1916_v24 = vshrl.u32 %v4864_v13, 16  ;;  %v1919_v11 = vshll.u32 %v4864_v13, 16  ;;  %v1881_v25 = vrot.slane %v1880_v17, 4 }
 0x11f   : > { %5478 = vmatprep.mubr.msk.bf16.mxu0 %vm5943_vm1, %v5942_v1  ;;  %v1857_v57 = vrot.slane %v1855_v45, 5 }
 0x120   : > { %v1867_v58 = vrot.slane %v1866_v51, 4  ;;  %v4868_v51 = vld [vmem:[%s6013_s29 + $0x140] sm:$0xf] }
 0x121   : > { %v500_v29 = vpop.f32.mrb[28].mxu0  ;;  %v1858_v15 = vsel %vm6083_vm5, %v1853_v55, %v1857_v57  ;;  %v1944_v55 = vshrl.u32 %v4868_v51, 16  ;;  %v1947_v57 = vshll.u32 %v4868_v51, 16 }
 0x122   : > { %v6353_v33 = vadd.f32 %v500_v29, %v6290_v19  ;;  %v5362_v34 = vpop.f32.mrb[29].mxu0  ;;  %v1888_v19 = vshrl.u32 %v4860_v40, 16  ;;  %v1872_v16 = vsel %vm6083_vm5, %v1867_v58, %v1871_v59  ;;  %v1899_v29 = vrot.slane %v1897_v18, 5 }
 0x123   : > { %v503_v41 = vpop.f32.mrb[30].mxu0  ;;  %v1921_v40 = vrot.slane %v1919_v11, 5  ;;  %v1946_v9 = vrot.slane %v1944_v55, 4 }
 0x124   : > { %v6357_v47 = vadd.f32 %v503_v41, %v6292_v22  ;;  %v5363_v50 = vpop.f32.mrb[31].mxu0  ;;  %v1844_v22 = vsel %vm6083_vm5, %v1839_v42, %v1843_v39  ;;  %v1890_v0 = vrot.slane %v1888_v19, 4  ;;  %v1918_v39 = vrot.slane %v1916_v24, 4  ;;  %v4863_v42 = vld [vmem:[%s6013_s29 + $0xe4] sm:$0x1] }
 0x125   : > { %v4871_v4 = vcombine.low %v1830_v54, %v1844_v22  ;;  %v4866_v50 = vld [vmem:[%s6013_s29 + $0x120] sm:$0xf]  ;;  %v1911_v19 = vshll.u32 %v4863_v42, 16  ;;  %v1925_v54 = vshll.u32 %v4865_v44, 16 }
 0x126   : > { %5479 = vmatmul.mubr.msk.bf16.gmra.mrb[136].mxu0 %vm289_vm2, %v4823_v31  ;;  %v1894_v23 = vor.u32 %v1893_v7, %v1890_v0  ;;  %v1904_v31 = vrot.slane %v1902_v20, 4  ;;  %v1922_v49 = vor.u32 %v1921_v40, %v1918_v39  ;;  %v1933_v22 = vshll.u32 %v4866_v50, 16 }
 0x127   : > { %5506 = vmatprep.mubr.msk.bf16.mxu0 %vm5943_vm1, %v5942_v1 }
 0x128   : > { %v1895_v37 = vrot.slane %v1894_v23, 4  ;;  %v1908_v53 = vor.u32 %v1907_v32, %v1904_v31  ;;  %v1923_v0 = vrot.slane %v1922_v49, 4  ;;  %v1935_v7 = vrot.slane %v1933_v22, 5 }
 0x129   : > { %v508_v62 = vpop.f32.mrb[32].mxu0 }
 0x12a   : > { %v6368_v2 = vadd.f32 %v508_v62, %v6299_v26  ;;  %v5366_v3 = vpop.f32.mrb[33].mxu0  ;;  %v1883_v26 = vshll.u32 %v4859_v63, 16  ;;  %v1909_v60 = vrot.slane %v1908_v53, 4  ;;  %v1913_v63 = vrot.slane %v1911_v19, 5 }
 0x12b   : > { %v511_v10 = vpop.f32.mrb[34].mxu0  ;;  %v1927_v3 = vrot.slane %v1925_v54, 5 }
 0x12c   : > { %v6374_v8 = vadd.f32 %v511_v10, %v6304_v30  ;;  %v5367_v14 = vpop.f32.mrb[35].mxu0  ;;  %v4872_v30 = vcombine.low %v1858_v15, %v1872_v16  ;;  %v1885_v28 = vrot.slane %v1883_v26, 5  ;;  %v1949_v10 = vrot.slane %v1947_v57, 5  ;;  %v4867_v15 = vld [vmem:[%s6013_s29 + $0x124] sm:$0x1] }
 0x12d   : > { %v4869_v16 = vld [vmem:[%s6013_s29 + $0x144] sm:$0x1]  ;;  %v1914_v17 = vsel %vm6083_vm5, %v1909_v60, %v1913_v63  ;;  %v1939_v18 = vshll.u32 %v4867_v15, 16  ;;  %v6426_v54 = vpop.f32.mrb[0].mxu1 }
 0x12e   : > { %5507 = vmatmul.mubr.msk.bf16.vlgmr.msra.gmra.mrb[140].mxu0 %vm289_vm2, %v4871_v4  ;;  %v1886_v52 = vsel %vm6083_vm5, %v1881_v25, %v1885_v28  ;;  %v1950_v20 = vor.u32 %v1949_v10, %v1946_v9  ;;  %v1953_v21 = vshll.u32 %v4869_v16, 16  ;;  %v5486_v22 = vpop.f32.mrb[1].mxu1 }
 0x12f   : > { %5510 = vmatprep.mubr.msk.bf16.mxu0 %vm5943_vm1, %v5942_v1  ;;  %v6429_v55 = vpop.f32.mrb[2].mxu1  ;;  %v5836_v22 = vld [vmem:[%s6975_s3 + $0x10] sm:$0xff]  }
 0x130   : > { %v1951_v28 = vrot.slane %v1950_v20, 4  ;;  %v5487_v57 = vpop.f32.mrb[3].mxu1 }
 0x131   : > { %v516_v27 = vpop.f32.mrb[36].mxu0 }
 0x132   : > { %v6384_v34 = vadd.f32 %v516_v27, %v6312_v35  ;;  %v5370_v36 = vpop.f32.mrb[37].mxu0  ;;  %v1900_v35 = vsel %vm6083_vm5, %v1895_v37, %v1899_v29  ;;  %v1941_v27 = vrot.slane %v1939_v18, 5  ;;  %v1955_v29 = vrot.slane %v1953_v21, 5 }
 0x133   : > { %v519_v41 = vpop.f32.mrb[38].mxu0  ;;  %v4873_v59 = vcombine.low %v1886_v52, %v1900_v35 }
 0x134   : > { %v6389_v45 = vadd.f32 %v519_v41, %v6314_v38  ;;  %v5371_v46 = vpop.f32.mrb[39].mxu0  ;;  %v1930_v38 = vshrl.u32 %v4866_v50, 16 }
 0x135   : > { %v6433_v60 = vpop.f32.mrb[4].mxu1 }
 0x136   : > { %5511 = vmatmul.mubr.msk.bf16.gmra.mrb[144].mxu0 %vm289_vm2, %v4872_v30  ;;  %v1932_v5 = vrot.slane %v1930_v38, 4  ;;  %v5490_v63 = vpop.f32.mrb[5].mxu1 }
 0x137   : > { %5514 = vmatprep.mubr.msk.bf16.mxu0 %vm5943_vm1, %v5942_v1  ;;  %v2151_v63 = vld [vmem:[#allocation2 + $0x10] sm:$0x1] }
 0x138   : > { %v1936_v26 = vor.u32 %v1935_v7, %v1932_v5 }
 0x139   : > { %v785_v58 = vpop.f32.mrb[40].mxu0 }
 0x13a   : > { %v834_v56 = vadd.f32 %v785_v58, %v6322_v43  ;;  %v5376_v62 = vpop.f32.mrb[41].mxu0  ;;  %v1928_v43 = vsel %vm6083_vm5, %v1923_v0, %v1927_v3  ;;  %v1937_v25 = vrot.slane %v1936_v26, 4  ;;  %v6437_v0 = vpop.f32.mrb[6].mxu1 }
 0x13b   : > { %v788_v4 = vpop.f32.mrb[42].mxu0  ;;  %v4874_v11 = vcombine.low %v1914_v17, %v1928_v43  ;;  %v5491_v3 = vpop.f32.mrb[7].mxu1 }
 0x13c   : > { %v835_v13 = vadd.f32 %v788_v4, %v6326_v48  ;;  %v5377_v14 = vpop.f32.mrb[43].mxu0  ;;  %v1942_v36 = vsel %vm6083_vm5, %v1937_v25, %v1941_v27  ;;  %v2183_v3 = vld [vmem:[#allocation2 + $0x14] sm:$0x1] }
 0x13e   : > { %5515 = vmatmul.mubr.msk.bf16.gmra.mrb[148].mxu0 %vm289_vm2, %v4873_v59 }
 0x13f   : > { %5518 = vmatprep.mubr.msk.bf16.mxu0 %vm5943_vm1, %v5942_v1 }
 0x141   : > { %v793_v23 = vpop.f32.mrb[44].mxu0 }
 0x142   : > { %v836_v48 = vadd.f32 %v793_v23, %v6337_v61  ;;  %v5380_v24 = vpop.f32.mrb[45].mxu0  ;;  %v1956_v61 = vsel %vm6083_vm5, %v1951_v28, %v1955_v29 }
 0x143   : > { %v796_v30 = vpop.f32.mrb[46].mxu0  ;;  %v4875_v41 = vcombine.low %v1942_v36, %v1956_v61  ;;  %v5834_v36 = vld [vmem:[%s6975_s3] sm:$0xff]  }
 0x144   : > { %v837_v31 = vadd.f32 %v796_v30, %v6342_v12  ;;  %v5381_v32 = vpop.f32.mrb[47].mxu0  ;;  %v6441_v9 = vpop.f32.mrb[8].mxu1  ;;  %5526 = vmatprep.subr.bf16.mxu1 %v5834_v36 }
 0x145   : > { %v5494_v14 = vpop.f32.mrb[9].mxu1  ;;  %5527 = vmatpush3.bf16.msra.mxu1 %v5834_v36  ;;  %v2192_v36 = vld [vmem:[#allocation2 + $0x2c] sm:$0x1] }
 0x146   : > { %5519 = vmatmul.mubr.msk.bf16.gmra.mrb[152].mxu0 %vm289_vm2, %v4874_v11  ;;  %v6445_v15 = vpop.f32.mrb[10].mxu1  ;;  %v2154_v14 = vld [vmem:[#allocation2 + $0x18] sm:$0x1] }
 0x147   : > { %5522 = vmatprep.mubr.msk.bf16.mxu0 %vm5943_vm1, %v5942_v1 }
 0x149   : > { %v801_v37 = vpop.f32.mrb[48].mxu0 }
 0x14a   : > { %v838_v39 = vadd.f32 %v801_v37, %v6353_v33  ;;  %v5384_v40 = vpop.f32.mrb[49].mxu0 }
 0x14b   : > { %v804_v42 = vpop.f32.mrb[50].mxu0 }
 0x14c   : > { %v839_v12 = vadd.f32 %v804_v42, %v6357_v47  ;;  %v5385_v44 = vpop.f32.mrb[51].mxu0 }
 0x14e   : > { %5523 = vmatmul.mubr.msk.bf16.gmra.mrb[156].mxu0 %vm289_vm2, %v4875_v41 }
 0x151   : > { %v809_v46 = vpop.f32.mrb[52].mxu0 }
 0x152   : > { %v840_v1 = vadd.f32 %v809_v46, %v6368_v2  ;;  %v5388_v50 = vpop.f32.mrb[53].mxu0  ;;  %v5835_v46 = vld [vmem:[%s6975_s3 + $0x8] sm:$0xff]  }
 0x153   : > { %v812_v51 = vpop.f32.mrb[54].mxu0  ;;  %v2145_v50 = vld [vmem:[#allocation2] sm:$0x1]  ;;  %5528 = vmatprep.subr.bf16.mxu1 %v5835_v46 }
 0x154   : > { %v841_v52 = vadd.f32 %v812_v51, %v6374_v8  ;;  %v5389_v53 = vpop.f32.mrb[55].mxu0  ;;  %v2177_v51 = vld [vmem:[#allocation2 + $0x4] sm:$0x1]  ;;  %5529 = vmatpush3.bf16.msra.mxu1 %v5835_v46 }
 0x155   : > { %5530 = vmatprep.subr.bf16.mxu1 %v5836_v22 }
 0x158   : > { %5531 = vmatpush3.bf16.msra.mxu1 %v5836_v22 }
 0x159   : > { %v817_v35 = vpop.f32.mrb[56].mxu0 }
 0x15a   : > { %v842_v19 = vadd.f32 %v817_v35, %v6384_v34  ;;  %v5392_v33 = vpop.f32.mrb[57].mxu0  ;;  %v2178_v35 = vsel %vm6480_vm10, 0, %v2177_v51 }
 0x15b   : > { %v820_v49 = vpop.f32.mrb[58].mxu0  ;;  %v2180_v33 = vld [vmem:[#allocation2 + $0xc] sm:$0x1]  ;;  %2179 = vst [vmem:[#allocation2 + $0x4] sm:$0x1] %v2178_v35 }
 0x15c   : > { %v843_v47 = vadd.f32 %v820_v49, %v6389_v45  ;;  %v5393_v38 = vpop.f32.mrb[59].mxu0  ;;  %v2195_v35 = vld [vmem:[#allocation2 + $0x34] sm:$0x1] }
 0x15d   : > { %v2181_v38 = vsel %vm6480_vm10, 0, %v2180_v33  ;;  %v2196_v33 = vsel %vm6480_vm10, 0, %v2195_v35 }
 0x15e   : > { %2182 = vst [vmem:[#allocation2 + $0xc] sm:$0x1] %v2181_v38  ;;  %2197 = vst [vmem:[#allocation2 + $0x34] sm:$0x1] %v2196_v33 }
 0x161   : > { %v946_v2 = vpop.f32.mrb[60].mxu0 }
 0x162   : > { %v6431_v58 = vadd.f32 %v946_v2, %v834_v56  ;;  %v5398_v59 = vpop.f32.mrb[61].mxu0 }
 0x163   : > { %v949_v8 = vpop.f32.mrb[62].mxu0 }
 0x164   : > { %v6435_v62 = vadd.f32 %v949_v8, %v835_v13  ;;  %v5399_v34 = vpop.f32.mrb[63].mxu0  ;;  %v5495_v13 = vpop.f32.mrb[11].mxu1 }
 0x165   : > { %v6449_v18 = vpop.f32.mrb[12].mxu1  ;;  %v2186_v13 = vld [vmem:[#allocation2 + $0x1c] sm:$0x1] }
 0x166   : > { %v5498_v23 = vpop.f32.mrb[13].mxu1 }
 0x169   : > { %v954_v45 = vpop.f32.mrb[64].mxu0 }
 0x16a   : > { %v6439_v4 = vadd.f32 %v954_v45, %v836_v48  ;;  %v5402_v5 = vpop.f32.mrb[65].mxu0  ;;  %v6453_v48 = vpop.f32.mrb[14].mxu1  ;;  %v5837_v45 = vld [vmem:[%s6975_s3 + $0x18] sm:$0xff]  }
 0x16b   : > { %v957_v7 = vpop.f32.mrb[66].mxu0  ;;  %v5499_v24 = vpop.f32.mrb[15].mxu1  ;;  %v2184_v5 = vsel %vm6480_vm10, 0, %v2183_v3  ;;  %5532 = vmatprep.subr.bf16.mxu1 %v5837_v45 }
 0x16c   : > { %v6443_v56 = vadd.f32 %v957_v7, %v837_v31  ;;  %v5403_v10 = vpop.f32.mrb[67].mxu0  ;;  %v6457_v28 = vpop.f32.mrb[16].mxu1  ;;  %2185 = vst [vmem:[#allocation2 + $0x14] sm:$0x1] %v2184_v5  ;;  %5533 = vmatpush3.bf16.msra.mxu1 %v5837_v45 }
 0x16d   : > { %v5502_v32 = vpop.f32.mrb[17].mxu1 }
 0x16e   : > { %v6464_v61 = vpop.f32.mrb[18].mxu1  ;;  %v2160_v32 = vld [vmem:[#allocation2 + $0x28] sm:$0x1] }
 0x16f   : > { %v5503_v37 = vpop.f32.mrb[19].mxu1 }
 0x171   : > { %v962_v16 = vpop.f32.mrb[68].mxu0 }
 0x172   : > { %v6447_v17 = vadd.f32 %v962_v16, %v838_v39  ;;  %v5406_v43 = vpop.f32.mrb[69].mxu0  ;;  %v5838_v16 = vld [vmem:[%s6975_s3 + $0x20] sm:$0xff]  }
 0x173   : > { %v965_v26 = vpop.f32.mrb[70].mxu0  ;;  %5534 = vmatprep.subr.bf16.mxu1 %v5838_v16 }
 0x174   : > { %v6451_v20 = vadd.f32 %v965_v26, %v839_v12  ;;  %v5407_v21 = vpop.f32.mrb[71].mxu0  ;;  %v2155_v26 = vsel %vm6473_vm9, 0, %v2154_v14  ;;  %5535 = vmatpush3.bf16.msra.mxu1 %v5838_v16  ;;  %v2172_v14 = vld [vmem:[#allocation2 + $0x48] sm:$0x1] }
 0x175   : > { %v2187_v21 = vsel %vm6480_vm10, 0, %v2186_v13  ;;  %2156 = vst [vmem:[#allocation2 + $0x18] sm:$0x1] %v2155_v26  ;;  %v2204_v13 = vld [vmem:[#allocation2 + $0x4c] sm:$0x1] }
 0x176   : > { %2188 = vst [vmem:[#allocation2 + $0x1c] sm:$0x1] %v2187_v21  ;;  %v2205_v26 = vsel %vm6480_vm10, 0, %v2204_v13 }
 0x177   : > { %2206 = vst [vmem:[#allocation2 + $0x4c] sm:$0x1] %v2205_v26 }
 0x179   : > { %v970_v11 = vpop.f32.mrb[72].mxu0 }
 0x17a   : > { %v6455_v30 = vadd.f32 %v970_v11, %v840_v1  ;;  %v5410_v25 = vpop.f32.mrb[73].mxu0  ;;  %v2157_v11 = vld [vmem:[#allocation2 + $0x20] sm:$0x1] }
 0x17b   : > { %v973_v27 = vpop.f32.mrb[74].mxu0  ;;  %v2189_v25 = vld [vmem:[#allocation2 + $0x24] sm:$0x1] }
 0x17c   : > { %v6459_v29 = vadd.f32 %v973_v27, %v841_v52  ;;  %v5411_v31 = vpop.f32.mrb[75].mxu0  ;;  %v2146_v52 = vsel %vm6473_vm9, 0, %v2145_v50  ;;  %v2158_v27 = vsel %vm6473_vm9, 0, %v2157_v11 }
 0x17d   : > { %2147 = vst [vmem:[#allocation2] sm:$0x1] %v2146_v52  ;;  %v2190_v31 = vsel %vm6480_vm10, 0, %v2189_v25  ;;  %2159 = vst [vmem:[#allocation2 + $0x20] sm:$0x1] %v2158_v27 }
 0x17e   : > { %2191 = vst [vmem:[#allocation2 + $0x24] sm:$0x1] %v2190_v31  ;;  %v2163_v52 = vld [vmem:[#allocation2 + $0x30] sm:$0x1] }
 0x181   : > { %v978_v39 = vpop.f32.mrb[76].mxu0 }
 0x182   : > { %v6466_v40 = vadd.f32 %v978_v39, %v842_v19  ;;  %v5414_v41 = vpop.f32.mrb[77].mxu0  ;;  %v2148_v19 = vld [vmem:[#allocation2 + $0x8] sm:$0x1] }
 0x183   : > { %v981_v42 = vpop.f32.mrb[78].mxu0  ;;  %v2161_v41 = vsel %vm6473_vm9, 0, %v2160_v32 }
 0x184   : > { %v6468_v12 = vadd.f32 %v981_v42, %v843_v47  ;;  %v5415_v44 = vpop.f32.mrb[79].mxu0  ;;  %v2149_v47 = vsel %vm6473_vm9, 0, %v2148_v19  ;;  %v2193_v42 = vsel %vm6480_vm10, 0, %v2192_v36  ;;  %2162 = vst [vmem:[#allocation2 + $0x28] sm:$0x1] %v2161_v41  ;;  %v2164_v19 = vsel %vm6473_vm9, 0, %v2163_v52 }
 0x185   : > { %2150 = vst [vmem:[#allocation2 + $0x8] sm:$0x1] %v2149_v47  ;;  %v5840_v44 = vld [vmem:[%s6975_s3 + $0x30] sm:$0xff]   ;;  %2194 = vst [vmem:[#allocation2 + $0x2c] sm:$0x1] %v2193_v42 }
 0x186   : > { %2165 = vst [vmem:[#allocation2 + $0x30] sm:$0x1] %v2164_v19  ;;  %v2198_v47 = vld [vmem:[#allocation2 + $0x3c] sm:$0x1] }
 0x189   : > { %v1107_v49 = vpop.f32.mrb[80].mxu0 }
 0x18a   : > { %v6494_v57 = vadd.f32 %v1107_v49, %v6431_v58  ;;  %v5420_v2 = vpop.f32.mrb[81].mxu0  ;;  %v2152_v58 = vsel %vm6473_vm9, 0, %v2151_v63  ;;  %v6552_v63 = vld [vmem:[%s6975_s3 + $0x40] sm:$0xff]  }
 0x18b   : > { %v1110_v59 = vpop.f32.mrb[82].mxu0  ;;  %2153 = vst [vmem:[#allocation2 + $0x10] sm:$0x1] %v2152_v58  ;;  %v2201_v58 = vld [vmem:[#allocation2 + $0x44] sm:$0x1] }
 0x18c   : > { %v6497_v8 = vadd.f32 %v1110_v59, %v6435_v62  ;;  %v5421_v34 = vpop.f32.mrb[83].mxu0 }
 0x18d   : > { %v2199_v34 = vsel %vm6480_vm10, 0, %v2198_v47 }
 0x18e   : > { %2200 = vst [vmem:[#allocation2 + $0x3c] sm:$0x1] %v2199_v34 }
 0x191   : > { %v1115_v7 = vpop.f32.mrb[84].mxu0 }
 0x192   : > { %v6507_v62 = vadd.f32 %v1115_v7, %v6439_v4  ;;  %v5424_v10 = vpop.f32.mrb[85].mxu0  ;;  %v5839_v4 = vld [vmem:[%s6975_s3 + $0x28] sm:$0xff]   ;;  %v2202_v7 = vsel %vm6480_vm10, 0, %v2201_v58 }
 0x193   : > { %v1118_v43 = vpop.f32.mrb[86].mxu0  ;;  %5536 = vmatprep.subr.bf16.mxu1 %v5839_v4  ;;  %2203 = vst [vmem:[#allocation2 + $0x44] sm:$0x1] %v2202_v7 }
 0x194   : > { %v6517_v23 = vadd.f32 %v1118_v43, %v6443_v56  ;;  %v5425_v24 = vpop.f32.mrb[87].mxu0  ;;  %5537 = vmatpush3.bf16.msra.mxu1 %v5839_v4  ;;  %v2173_v43 = vsel %vm6473_vm9, 0, %v2172_v14 }
 0x195   : > { %5538 = vmatprep.subr.bf16.mxu1 %v5840_v44  ;;  %2174 = vst [vmem:[#allocation2 + $0x48] sm:$0x1] %v2173_v43 }
 0x198   : > { %5539 = vmatpush3.bf16.msra.mxu1 %v5840_v44 }
 0x199   : > { %v1123_v56 = vpop.f32.mrb[88].mxu0 }
 0x19a   : > { %v6527_v37 = vadd.f32 %v1123_v56, %v6447_v17  ;;  %v5428_v39 = vpop.f32.mrb[89].mxu0  ;;  %v5842_v17 = vld [vmem:[%s6975_s3 + $0x38] sm:$0xff]  }
 0x19b   : > { %v1126_v46 = vpop.f32.mrb[90].mxu0  ;;  %5540 = vmatprep.subr.bf16.mxu1 %v5842_v17 }
 0x19c   : > { %v1161_v50 = vadd.f32 %v1126_v46, %v6451_v20  ;;  %v5429_v51 = vpop.f32.mrb[91].mxu0  ;;  %v2166_v20 = vld [vmem:[#allocation2 + $0x38] sm:$0x1]  ;;  %5541 = vmatpush3.bf16.msra.mxu1 %v5842_v17 }
 0x19d   : > { %v2167_v2 = vsel %vm6473_vm9, 0, %v2166_v20  ;;  %5550 = vmatprep.subr.bf16.mxu1 %v6552_v63 }
 0x19e   : > { %2168 = vst [vmem:[#allocation2 + $0x38] sm:$0x1] %v2167_v2 }
 0x1a1   : > { %v1131_v49 = vpop.f32.mrb[92].mxu0 }
 0x1a2   : > { %v1162_v38 = vadd.f32 %v1131_v49, %v6455_v30  ;;  %v5432_v22 = vpop.f32.mrb[93].mxu0  ;;  %v2169_v30 = vld [vmem:[#allocation2 + $0x40] sm:$0x1] }
 0x1a3   : > { %v1134_v59 = vpop.f32.mrb[94].mxu0  ;;  %v2170_v5 = vsel %vm6473_vm9, 0, %v2169_v30 }
 0x1a4   : > { %v1163_v3 = vadd.f32 %v1134_v59, %v6459_v29  ;;  %v5433_v45 = vpop.f32.mrb[95].mxu0  ;;  %2171 = vst [vmem:[#allocation2 + $0x40] sm:$0x1] %v2170_v5 }
 0x1a9   : > { %v1139_v10 = vpop.f32.mrb[96].mxu0 }
 0x1aa   : > { %v1164_v16 = vadd.f32 %v1139_v10, %v6466_v40  ;;  %v5436_v29 = vpop.f32.mrb[97].mxu0 }
 0x1ab   : > { %v1142_v21 = vpop.f32.mrb[98].mxu0 }
 0x1ac   : > { %v1165_v24 = vadd.f32 %v1142_v21, %v6468_v12  ;;  %v5437_v4 = vpop.f32.mrb[99].mxu0 }
 0x1b1   : > { %v1405_v11 = vpop.f32.mrb[100].mxu0 }
 0x1b2   : > { %v1454_v25 = vadd.f32 %v1405_v11, %v6494_v57  ;;  %v5442_v27 = vpop.f32.mrb[101].mxu0 }
 0x1b3   : > { %v1408_v31 = vpop.f32.mrb[102].mxu0 }
 0x1b4   : > { %v1455_v40 = vadd.f32 %v1408_v31, %v6497_v8  ;;  %v5443_v56 = vpop.f32.mrb[103].mxu0 }
 0x1b9   : > { %v1413_v32 = vpop.f32.mrb[104].mxu0 }
 0x1ba   : > { %v1456_v36 = vadd.f32 %v1413_v32, %v6507_v62  ;;  %v5446_v39 = vpop.f32.mrb[105].mxu0 }
 0x1bb   : > { %v1416_v53 = vpop.f32.mrb[106].mxu0 }
 0x1bc   : > { %v1457_v41 = vadd.f32 %v1416_v53, %v6517_v23  ;;  %v5447_v42 = vpop.f32.mrb[107].mxu0 }
 0x1c1   : > { %v1421_v44 = vpop.f32.mrb[108].mxu0 }
 0x1c2   : > { %v1458_v12 = vadd.f32 %v1421_v44, %v6527_v37  ;;  %v5450_v46 = vpop.f32.mrb[109].mxu0 }
 0x1c3   : > { %v1424_v51 = vpop.f32.mrb[110].mxu0 }
 0x1c4   : > { %v1459_v17 = vadd.f32 %v1424_v51, %v1161_v50  ;;  %v5451_v57 = vpop.f32.mrb[111].mxu0 }
 0x1c9   : > { %v1429_v52 = vpop.f32.mrb[112].mxu0 }
 0x1ca   : > { %v1460_v35 = vadd.f32 %v1429_v52, %v1162_v38  ;;  %v5454_v19 = vpop.f32.mrb[113].mxu0 }
 0x1cb   : > { %v1432_v8 = vpop.f32.mrb[114].mxu0 }
 0x1cc   : > { %v1461_v33 = vadd.f32 %v1432_v8, %v1163_v3  ;;  %v5455_v49 = vpop.f32.mrb[115].mxu0 }
 0x1d1   : > { %v1437_v20 = vpop.f32.mrb[116].mxu0 }
 0x1d2   : > { %v1462_v62 = vadd.f32 %v1437_v20, %v1164_v16  ;;  %v5458_v47 = vpop.f32.mrb[117].mxu0 }
 0x1d3   : > { %v1440_v22 = vpop.f32.mrb[118].mxu0 }
 0x1d4   : > { %v1463_v2 = vadd.f32 %v1440_v22, %v1165_v24  ;;  %v5459_v23 = vpop.f32.mrb[119].mxu0 }
 0x1d9   : > { %v1567_v59 = vpop.f32.mrb[120].mxu0 }
 0x1da   : > { %v1616_v34 = vadd.f32 %v1567_v59, %v1454_v25  ;;  %v5464_v45 = vpop.f32.mrb[121].mxu0 }
 0x1db   : > { %v1570_v37 = vpop.f32.mrb[122].mxu0  ;;  %v5851_v45 = vld [vmem:[%s6975_s3 + $0x68] sm:$0xff]  }
 0x1dc   : > { %v1617_v30 = vadd.f32 %v1570_v37, %v1455_v40  ;;  %v1777_v50 = vadd.f32 %v6426_v54, %v1616_v34  ;;  %v5465_v58 = vpop.f32.mrb[123].mxu0  ;;  %v2339_v37 = vld [vmem:[#allocation2] sm:$0xf] }
 0x1de   : > { %v1778_v38 = vadd.f32 %v6429_v55, %v1617_v30  ;;  %v2342_v30 = vld [vmem:[#allocation2 + $0x4] sm:$0x1] }
 0x1e1   : > { %v1575_v5 = vpop.f32.mrb[124].mxu0 }
 0x1e2   : > { %v1618_v7 = vadd.f32 %v1575_v5, %v1456_v36  ;;  %v5468_v3 = vpop.f32.mrb[125].mxu0 }
 0x1e3   : > { %v1578_v10 = vpop.f32.mrb[126].mxu0 }
 0x1e4   : > { %v1619_v14 = vadd.f32 %v1578_v10, %v1457_v41  ;;  %v1779_v13 = vadd.f32 %v6433_v60, %v1618_v7  ;;  %v5469_v16 = vpop.f32.mrb[127].mxu0  ;;  %v2345_v10 = vld [vmem:[#allocation2 + $0x8] sm:$0xf] }
 0x1e6   : > { %v1780_v29 = vadd.f32 %v6437_v0, %v1619_v14  ;;  %v2348_v14 = vld [vmem:[#allocation2 + $0xc] sm:$0x1] }
 0x1e9   : > { %v1583_v43 = vpop.f32.mrb[128].mxu0 }
 0x1ea   : > { %v1620_v26 = vadd.f32 %v1583_v43, %v1458_v12  ;;  %v5472_v21 = vpop.f32.mrb[129].mxu0 }
 0x1eb   : > { %v1586_v24 = vpop.f32.mrb[130].mxu0 }
 0x1ec   : > { %v1621_v4 = vadd.f32 %v1586_v24, %v1459_v17  ;;  %v6576_v54 = vadd.f32 %v6441_v9, %v1620_v26  ;;  %v5473_v11 = vpop.f32.mrb[131].mxu0 }
 0x1ed   : > { %v5944_v11 = vmov 0  }
 0x1ee   : > { %v6579_v55 = vadd.f32 %v6445_v15, %v1621_v4 }
 0x1f1   : > { %v1591_v25 = vpop.f32.mrb[132].mxu0 }
 0x1f2   : > { %v1622_v27 = vadd.f32 %v1591_v25, %v1460_v35  ;;  %v5476_v31 = vpop.f32.mrb[133].mxu0 }
 0x1f3   : > { %v1594_v40 = vpop.f32.mrb[134].mxu0 }
 0x1f4   : > { %v1623_v60 = vadd.f32 %v1594_v40, %v1461_v33  ;;  %v6582_v56 = vadd.f32 %v6449_v18, %v1622_v27  ;;  %v5477_v0 = vpop.f32.mrb[135].mxu0  ;;  %v6596_v18 = vld [vmem:[%s6974_s2] ss:$0 sm:$0xff] }
 0x1f6   : > { %v6585_v32 = vadd.f32 %v6453_v48, %v1623_v60 }
 0x1f9   : > { %v1599_v36 = vpop.f32.mrb[136].mxu0 }
 0x1fa   : > { %v1624_v39 = vadd.f32 %v1599_v36, %v1462_v62  ;;  %v5480_v9 = vpop.f32.mrb[137].mxu0 }
 0x1fb   : > { %v1602_v53 = vpop.f32.mrb[138].mxu0 }
 0x1fc   : > { %v1625_v41 = vadd.f32 %v1602_v53, %v1463_v2  ;;  %v6588_v15 = vadd.f32 %v6457_v28, %v1624_v39  ;;  %v5481_v42 = vpop.f32.mrb[139].mxu0 }
 0x1fe   : > { %v6591_v44 = vadd.f32 %v6464_v61, %v1625_v41 }
 0x201   : > { %v2026_v12 = vpop.f32.mrb[140].mxu0 }
 0x202   : > { %v2075_v48 = vadd.f32 %v2026_v12, %v1777_v50  ;;  %v5508_v46 = vpop.f32.mrb[141].mxu0 }
 0x203   : > { %v2029_v51 = vpop.f32.mrb[142].mxu0  ;;  %v2354_v46 = vld [vmem:[#allocation2 + $0x14] sm:$0x1] }
 0x204   : > { %v2112_v17 = vadd.f32 %v6596_v18, %v2075_v48  ;;  %v2076_v57 = vadd.f32 %v2029_v51, %v1778_v38  ;;  %v5509_v52 = vpop.f32.mrb[143].mxu0  ;;  %v2351_v48 = vld [vmem:[#allocation2 + $0x10] sm:$0xf] }
 0x206   : > { %v2122_v35 = vmax.f32 %v2112_v17, 0.0  ;;  %v2113_v28 = vadd.f32 %v6596_v18, %v2076_v57 }
 0x208   : > { %v5156_v19 = vpack.c.bf16 %v2122_v35, %v2122_v35  ;;  %v2123_v8 = vmax.f32 %v2113_v28, 0.0  ;;  %v2357_v28 = vld [vmem:[#allocation2 + $0x18] sm:$0xf] }
 0x209   : > { %v2034_v61 = vpop.f32.mrb[144].mxu0 }
 0x20a   : > { %v2238_v33 = vshrl.u32 %v5156_v19, 16  ;;  %v5157_v49 = vpack.c.bf16 %v2123_v8, %v2123_v8  ;;  %v2077_v20 = vadd.f32 %v2034_v61, %v1779_v13  ;;  %v5512_v62 = vpop.f32.mrb[145].mxu0  ;;  %v2241_v2 = vshll.u32 %v5156_v19, 16  ;;  %v2360_v19 = vld [vmem:[#allocation2 + $0x1c] sm:$0x1] }
 0x20b   : > { %v2037_v47 = vpop.f32.mrb[146].mxu0 }
 0x20c   : > { %v2240_v22 = vrot.slane %v2238_v33, 7  ;;  %v2246_v23 = vshrl.u32 %v5157_v49, 16  ;;  %v2114_v59 = vadd.f32 %v6596_v18, %v2077_v20  ;;  %v5513_v34 = vpop.f32.mrb[147].mxu0  ;;  %v2249_v50 = vshll.u32 %v5157_v49, 16 }
 0x20d   : > { %v2078_v58 = vadd.f32 %v2037_v47, %v1780_v29 }
 0x20e   : > { %v2243_v38 = vor.u32 %v2241_v2, %v2240_v22  ;;  %v2244_v5 = vrot.slane %v2240_v22, 4  ;;  %v2248_v7 = vrot.slane %v2246_v23, 7  ;;  %v2124_v3 = vmax.f32 %v2114_v59, 0.0 }
 0x20f   : > { %v2115_v13 = vadd.f32 %v6596_v18, %v2078_v58 }
 0x210   : > { %v2340_v16 = vsel %vm6602_vm12, %v2243_v38, %v2339_v37  ;;  %v2343_v43 = vsel %vm6473_vm9, %v2244_v5, %v2342_v30  ;;  %v2251_v26 = vor.u32 %v2249_v50, %v2248_v7  ;;  %v2252_v21 = vrot.slane %v2248_v7, 4 }
 0x211   : > { %2341 = vst [vmem:[#allocation2] sm:$0xf] %v2340_v16  ;;  %2344 = vst [vmem:[#allocation2 + $0x4] sm:$0x1] %v2343_v43  ;;  %v5158_v24 = vpack.c.bf16 %v2124_v3, %v2124_v3  ;;  %v2125_v29 = vmax.f32 %v2115_v13, 0.0  ;;  %v2042_v4 = vpop.f32.mrb[148].mxu0 }
 0x212   : > { %2403 = vst [vmem:[#allocation2] sm:$0xf] %v5944_v11  ;;  %2404 = vst [vmem:[#allocation2 + $0x4] sm:$0x1] %v5944_v11  ;;  %v2346_v25 = vsel %vm6602_vm12, %v2251_v26, %v2345_v10  ;;  %v2349_v27 = vsel %vm6473_vm9, %v2252_v21, %v2348_v14  ;;  %v2079_v31 = vadd.f32 %v2042_v4, %v6576_v54  ;;  %v5516_v40 = vpop.f32.mrb[149].mxu0 }
 0x213   : > { %2347 = vst [vmem:[#allocation2 + $0x8] sm:$0xf] %v2346_v25  ;;  %2350 = vst [vmem:[#allocation2 + $0xc] sm:$0x1] %v2349_v27  ;;  %v2254_v60 = vshrl.u32 %v5158_v24, 16  ;;  %v5159_v0 = vpack.c.bf16 %v2125_v29, %v2125_v29  ;;  %v2045_v36 = vpop.f32.mrb[150].mxu0 }
 0x214   : > { %v2116_v39 = vadd.f32 %v6596_v18, %v2079_v31  ;;  %v2080_v9 = vadd.f32 %v2045_v36, %v6579_v55  ;;  %v5517_v53 = vpop.f32.mrb[151].mxu0  ;;  %v2257_v42 = vshll.u32 %v5158_v24, 16  ;;  %v2366_v14 = vld [vmem:[#allocation2 + $0x24] sm:$0x1]  ;;  %v2369_v24 = vld [vmem:[#allocation2 + $0x28] sm:$0xf] }
 0x215   : > { %v2256_v41 = vrot.slane %v2254_v60, 7  ;;  %v2262_v12 = vshrl.u32 %v5159_v0, 16  ;;  %v2265_v35 = vshll.u32 %v5159_v0, 16  ;;  %v2372_v4 = vld [vmem:[#allocation2 + $0x2c] sm:$0x1] }
 0x216   : > { %v2126_v51 = vmax.f32 %v2116_v39, 0.0  ;;  %v2117_v17 = vadd.f32 %v6596_v18, %v2080_v9 }
 0x217   : > { %v2259_v54 = vor.u32 %v2257_v42, %v2256_v41  ;;  %v2260_v57 = vrot.slane %v2256_v41, 4  ;;  %v2264_v52 = vrot.slane %v2262_v12, 7 }
 0x218   : > { %v5160_v8 = vpack.c.bf16 %v2126_v51, %v2126_v51  ;;  %v2127_v61 = vmax.f32 %v2117_v17, 0.0 }
 0x219   : > { %v2352_v55 = vsel %vm6602_vm12, %v2259_v54, %v2351_v48  ;;  %v2355_v33 = vsel %vm6473_vm9, %v2260_v57, %v2354_v46  ;;  %v2267_v49 = vor.u32 %v2265_v35, %v2264_v52  ;;  %v2268_v20 = vrot.slane %v2264_v52, 4  ;;  %v2050_v62 = vpop.f32.mrb[152].mxu0  ;;  %v2577_v50 = vld [vmem:[#allocation2] sm:$0xf]  ;;  %v6642_v46 = vld [vmem:[#allocation2 + $0x4] sm:$0x1] }
 0x21a   : > { %2353 = vst [vmem:[#allocation2 + $0x10] sm:$0xf] %v2352_v55  ;;  %2356 = vst [vmem:[#allocation2 + $0x14] sm:$0x1] %v2355_v33  ;;  %v2270_v47 = vshrl.u32 %v5160_v8, 16  ;;  %v5161_v22 = vpack.c.bf16 %v2127_v61, %v2127_v61  ;;  %v2081_v2 = vadd.f32 %v2050_v62, %v6582_v56  ;;  %v5520_v23 = vpop.f32.mrb[153].mxu0 }
 0x21b   : > { %v2358_v59 = vsel %vm6602_vm12, %v2267_v49, %v2357_v28  ;;  %v2361_v34 = vsel %vm6473_vm9, %v2268_v20, %v2360_v19  ;;  %v2053_v37 = vpop.f32.mrb[154].mxu0  ;;  %v5841_v30 = vld [vmem:[#allocation2] ss:$8 sps:$4 sm:$0xff]   ;;  %v2273_v38 = vshll.u32 %v5160_v8, 16  ;;  %v2594_v27 = vshrl.u32 %v2577_v50, 16 }
 0x21c   : > { %2359 = vst [vmem:[#allocation2 + $0x18] sm:$0xf] %v2358_v59  ;;  %2362 = vst [vmem:[#allocation2 + $0x1c] sm:$0x1] %v2361_v34  ;;  %v2272_v58 = vrot.slane %v2270_v47, 7  ;;  %v2278_v5 = vshrl.u32 %v5161_v22, 16  ;;  %v2118_v7 = vadd.f32 %v6596_v18, %v2081_v2  ;;  %v2082_v16 = vadd.f32 %v2053_v37, %v6585_v32  ;;  %5542 = vmatprep.mubr.bf16.mxu1 %v5841_v30 }
 0x21d   : > { %v5521_v3 = vpop.f32.mrb[155].mxu0  ;;  %v2579_v10 = vld [vmem:[#allocation2 + $0x8] sm:$0xf]  ;;  %v2363_v56 = vld [vmem:[#allocation2 + $0x20] sm:$0xf]  ;;  %v2281_v13 = vshll.u32 %v5161_v22, 16 }
 0x21e   : > { %v2275_v43 = vor.u32 %v2273_v38, %v2272_v58  ;;  %v2276_v26 = vrot.slane %v2272_v58, 4  ;;  %v2280_v21 = vrot.slane %v2278_v5, 7  ;;  %v2128_v29 = vmax.f32 %v2118_v7, 0.0  ;;  %v2375_v20 = vld [vmem:[#allocation2 + $0x30] sm:$0xf] }
 0x21f   : > { %v2119_v25 = vadd.f32 %v6596_v18, %v2082_v16  ;;  %v2597_v31 = vshll.u32 %v2577_v50, 16  ;;  %v2608_v40 = vshrl.u32 %v2579_v10, 16  ;;  %v2611_v51 = vshll.u32 %v2579_v10, 16  ;;  %v2378_v22 = vld [vmem:[#allocation2 + $0x34] sm:$0x1] }
 0x220   : > { %v2364_v60 = vsel %vm6602_vm12, %v2275_v43, %v2363_v56  ;;  %v2367_v0 = vsel %vm6473_vm9, %v2276_v26, %v2366_v14  ;;  %v2283_v36 = vor.u32 %v2281_v13, %v2280_v21  ;;  %v2284_v32 = vrot.slane %v2280_v21, 4  ;;  %v2381_v2 = vld [vmem:[#allocation2 + $0x38] sm:$0xf]  ;;  %v2384_v58 = vld [vmem:[#allocation2 + $0x3c] sm:$0x1]  ;;  %v5846_v7 = vld [vmem:[%s6975_s3 + $0x50] sm:$0xff]  }
 0x221   : > { %2365 = vst [vmem:[#allocation2 + $0x20] sm:$0xf] %v2364_v60  ;;  %2368 = vst [vmem:[#allocation2 + $0x24] sm:$0x1] %v2367_v0  ;;  %v5162_v39 = vpack.c.bf16 %v2128_v29, %v2128_v29  ;;  %v2129_v9 = vmax.f32 %v2119_v25, 0.0  ;;  %v2058_v53 = vpop.f32.mrb[156].mxu0 }
 0x222   : > { %v2370_v41 = vsel %vm6602_vm12, %v2283_v36, %v2369_v24  ;;  %v2373_v42 = vsel %vm6473_vm9, %v2284_v32, %v2372_v4  ;;  %v2083_v12 = vadd.f32 %v2058_v53, %v6588_v15  ;;  %v5524_v48 = vpop.f32.mrb[157].mxu0  ;;  %v2596_v52 = vrot.slane %v2594_v27, 4  ;;  %v5845_v15 = vld [vmem:[%s6975_s3 + $0x48] sm:$0xff]   ;;  %v2387_v29 = vld [vmem:[#allocation2 + $0x40] sm:$0xf]  ;;  %v5848_v60 = vld [vmem:[%s6975_s3 + $0x58] sm:$0xff]  }
 0x223   : > { %2371 = vst [vmem:[#allocation2 + $0x28] sm:$0xf] %v2370_v41  ;;  %2374 = vst [vmem:[#allocation2 + $0x2c] sm:$0x1] %v2373_v42  ;;  %v2286_v17 = vshrl.u32 %v5162_v39, 16  ;;  %v5163_v54 = vpack.c.bf16 %v2129_v9, %v2129_v9  ;;  %v2061_v57 = vpop.f32.mrb[158].mxu0 }
 0x224   : > { %v2599_v35 = vrot.slane %v2597_v31, 5  ;;  %v2120_v28 = vadd.f32 %v6596_v18, %v2083_v12  ;;  %v2084_v19 = vadd.f32 %v2061_v57, %v6591_v44  ;;  %v5844_v8 = vld [vmem:[#allocation2 + $0x10] ss:$8 sps:$4 sm:$0xff]   ;;  %v2610_v61 = vrot.slane %v2608_v40, 4  ;;  %v5525_v47 = vpop.f32.mrb[159].mxu0 }
 0x225   : > { %v2613_v55 = vrot.slane %v2611_v51, 5  ;;  %v2288_v33 = vrot.slane %v2286_v17, 7  ;;  %v2289_v49 = vshll.u32 %v5162_v39, 16  ;;  %v2294_v62 = vshrl.u32 %v5163_v54, 16  ;;  %5543 = vmatmul.mubr.bf16.vlgmr.msra.gmra.mrb[20].mxu1 %v5844_v8  ;;  %v2580_v3 = vld [vmem:[#allocation2 + $0xc] sm:$0x1] }
 0x226   : > { %v2130_v23 = vmax.f32 %v2120_v28, 0.0  ;;  %v2121_v59 = vadd.f32 %v6596_v18, %v2084_v19  ;;  %v2603_v44 = vshll.u32 %v6642_v46, 16  ;;  %v2297_v50 = vshll.u32 %v5163_v54, 16  ;;  %5551 = vmatpush3.bf16.msra.mxu1 %v6552_v63  ;;  %v2390_v31 = vld [vmem:[#allocation2 + $0x44] sm:$0x1] }
 0x227   : > { %v2291_v34 = vor.u32 %v2289_v49, %v2288_v33  ;;  %v2292_v37 = vrot.slane %v2288_v33, 4  ;;  %v2296_v30 = vrot.slane %v2294_v62, 7  ;;  %5552 = vmatprep.subr.bf16.mxu1 %v5845_v15  ;;  %v2600_v10 = vor.u32 %v2599_v35, %v2596_v52  ;;  %v2393_v0 = vld [vmem:[#allocation2 + $0x48] sm:$0xf]  ;;  %v2396_v36 = vld [vmem:[#allocation2 + $0x4c] sm:$0x1] }
 0x228   : > { %v5164_v38 = vpack.c.bf16 %v2130_v23, %v2130_v23  ;;  %v2131_v5 = vmax.f32 %v2121_v59, 0.0  ;;  %v2614_v18 = vor.u32 %v2613_v55, %v2610_v61  ;;  %v2617_v4 = vshll.u32 %v2580_v3, 16  ;;  %v2583_v48 = vld [vmem:[#allocation2 + $0x18] sm:$0xf]  ;;  %v2581_v51 = vld [vmem:[#allocation2 + $0x10] sm:$0xf] }
 0x229   : > { %v2376_v56 = vsel %vm6602_vm12, %v2291_v34, %v2375_v20  ;;  %v2379_v14 = vsel %vm6473_vm9, %v2292_v37, %v2378_v22  ;;  %v2299_v13 = vor.u32 %v2297_v50, %v2296_v30  ;;  %v2300_v16 = vrot.slane %v2296_v30, 4  ;;  %v5849_v28 = vld [vmem:[%s6975_s3 + $0x60] sm:$0xff]  }
 0x22a   : > { %2377 = vst [vmem:[#allocation2 + $0x30] sm:$0xf] %v2376_v56  ;;  %2380 = vst [vmem:[#allocation2 + $0x34] sm:$0x1] %v2379_v14  ;;  %v2302_v63 = vshrl.u32 %v5164_v38, 16  ;;  %v5165_v43 = vpack.c.bf16 %v2131_v5, %v2131_v5  ;;  %5553 = vmatpush3.bf16.msra.mxu1 %v5845_v15  ;;  %v2305_v27 = vshll.u32 %v5164_v38, 16 }
 0x22b   : > { %v5847_v26 = vld [vmem:[#allocation2 + $0x20] ss:$8 sps:$4 sm:$0xff]   ;;  %v2382_v21 = vsel %vm6602_vm12, %v2299_v13, %v2381_v2  ;;  %v2385_v24 = vsel %vm6473_vm9, %v2300_v16, %v2384_v58  ;;  %5554 = vmatprep.subr.bf16.mxu1 %v5846_v7  ;;  %v2601_v32 = vrot.slane %v2600_v10, 4  ;;  %v2605_v39 = vrot.slane %v2603_v44, 5  ;;  %v2584_v5 = vld [vmem:[#allocation2 + $0x1c] sm:$0x1] }
 0x22c   : > { %2383 = vst [vmem:[#allocation2 + $0x38] sm:$0xf] %v2382_v21  ;;  %2386 = vst [vmem:[#allocation2 + $0x3c] sm:$0x1] %v2385_v24  ;;  %v2304_v25 = vrot.slane %v2302_v63, 7  ;;  %v2310_v40 = vshrl.u32 %v5165_v43, 16  ;;  %5546 = vmatprep.mubr.bf16.mxu1 %v5847_v26 }
 0x22d   : > { %v2615_v9 = vrot.slane %v2614_v18, 4  ;;  %v2313_v12 = vshll.u32 %v5165_v43, 16  ;;  %v2619_v46 = vrot.slane %v2617_v4, 5  ;;  %v2587_v17 = vld [vmem:[#allocation2 + $0x28] sm:$0xf]  ;;  %v2606_v19 = vsel %vm6083_vm5, %v2601_v32, %v2605_v39  ;;  %v5853_v4 = vld [vmem:[%s6975_s3 + $0x78] sm:$0xff]  }
 0x22e   : > { %v2307_v53 = vor.u32 %v2305_v27, %v2304_v25  ;;  %v2308_v41 = vrot.slane %v2304_v25, 4  ;;  %v2312_v42 = vrot.slane %v2310_v40, 7  ;;  %5555 = vmatpush3.bf16.msra.mxu1 %v5846_v7  ;;  %v2636_v15 = vshrl.u32 %v2583_v48, 16  ;;  %v2585_v55 = vld [vmem:[#allocation2 + $0x20] sm:$0xf] }
 0x22f   : > { %5556 = vmatprep.subr.bf16.mxu1 %v5848_v60  ;;  %v2620_v8 = vsel %vm6083_vm5, %v2615_v9, %v2619_v46  ;;  %v2639_v61 = vshll.u32 %v2583_v48, 16  ;;  %v2664_v20 = vshrl.u32 %v2587_v17, 16  ;;  %v2622_v47 = vshrl.u32 %v2581_v51, 16  ;;  %v2588_v56 = vld [vmem:[#allocation2 + $0x2c] sm:$0x1] }
 0x230   : > { %v2388_v54 = vsel %vm6602_vm12, %v2307_v53, %v2387_v29  ;;  %v2391_v57 = vsel %vm6473_vm9, %v2308_v41, %v2390_v31  ;;  %v2315_v52 = vor.u32 %v2313_v12, %v2312_v42  ;;  %v2316_v35 = vrot.slane %v2312_v42, 4  ;;  %v2582_v16 = vld [vmem:[#allocation2 + $0x14] sm:$0x1]  ;;  %v2586_v63 = vld [vmem:[#allocation2 + $0x24] sm:$0x1] }
 0x231   : > { %2389 = vst [vmem:[#allocation2 + $0x40] sm:$0xf] %v2388_v54  ;;  %2392 = vst [vmem:[#allocation2 + $0x44] sm:$0x1] %v2391_v57  ;;  %v2625_v22 = vshll.u32 %v2581_v51, 16  ;;  %v4920_v2 = vcombine.low %v2606_v19, %v2620_v8  ;;  %v2650_v23 = vshrl.u32 %v2585_v55, 16 }
 0x232   : > { %v2394_v33 = vsel %vm6602_vm12, %v2315_v52, %v2393_v0  ;;  %v2397_v49 = vsel %vm6473_vm9, %v2316_v35, %v2396_v36  ;;  %5557 = vmatpush3.bf16.msra.mxu1 %v5848_v60  ;;  %v2653_v1 = vshll.u32 %v2585_v55, 16  ;;  %v2667_v59 = vshll.u32 %v2587_v17, 16  ;;  %v2589_v10 = vld [vmem:[#allocation2 + $0x30] sm:$0xf]  ;;  %v5854_v42 = vld [vmem:[%s6975_s3 + $0x80] sm:$0xff]  }
 0x233   : > { %2395 = vst [vmem:[#allocation2 + $0x48] sm:$0xf] %v2394_v33  ;;  %2398 = vst [vmem:[#allocation2 + $0x4c] sm:$0x1] %v2397_v49  ;;  %v5850_v62 = vld [vmem:[#allocation2 + $0x30] ss:$8 sps:$4 sm:$0xff]   ;;  %5558 = vmatprep.subr.bf16.mxu1 %v5849_v28 }
 0x234   : > { %2406 = vst [vmem:[#allocation2 + $0x48] sm:$0xf] %v5944_v11  ;;  %2407 = vst [vmem:[#allocation2 + $0x4c] sm:$0x1] %v5944_v11  ;;  %5547 = vmatmul.mubr.bf16.gmra.mrb[24].mxu1 %v5850_v62  ;;  %v2638_v44 = vrot.slane %v2636_v15, 4  ;;  %v2641_v34 = vrot.slane %v2639_v61, 5 }
 0x235   : > { %5566 = vmatprep.mubr.bf16.mxu1 %v4920_v2  ;;  %v2666_v37 = vrot.slane %v2664_v20, 4  ;;  %v2669_v30 = vrot.slane %v2667_v59, 5  ;;  %v2591_v50 = vld [vmem:[#allocation2 + $0x38] sm:$0xf]  ;;  %v5852_v11 = vld [vmem:[%s6975_s3 + $0x70] sm:$0xff]   ;;  %v2624_v58 = vrot.slane %v2622_v47, 4 }
 0x236   : > { %5559 = vmatpush3.bf16.msra.mxu1 %v5849_v28  ;;  %v2627_v38 = vrot.slane %v2625_v22, 5  ;;  %v2652_v7 = vrot.slane %v2650_v23, 4  ;;  %v2655_v3 = vrot.slane %v2653_v1, 5  ;;  %v2642_v18 = vor.u32 %v2641_v34, %v2638_v44  ;;  %v2592_v46 = vld [vmem:[#allocation2 + $0x3c] sm:$0x1]  ;;  %v5855_v62 = vld [vmem:[%s6975_s3 + $0x88] sm:$0xff]  }
 0x237   : > { %5560 = vmatprep.subr.bf16.mxu1 %v5851_v45  ;;  %v2692_v14 = vshrl.u32 %v2591_v50, 16  ;;  %v2695_v13 = vshll.u32 %v2591_v50, 16  ;;  %v2670_v43 = vor.u32 %v2669_v30, %v2666_v37  ;;  %v2645_v21 = vshll.u32 %v2584_v5, 16  ;;  %v2875_v57 = vld [vmem:[#allocation2] sm:$0xe]  ;;  %v5856_v30 = vld [vmem:[%s6975_s3 + $0x90] sm:$0xff]  }
 0x238   : > { %v2628_v26 = vor.u32 %v2627_v38, %v2624_v58  ;;  %v2678_v24 = vshrl.u32 %v2589_v10, 16  ;;  %v2681_v29 = vshll.u32 %v2589_v10, 16  ;;  %v2656_v25 = vor.u32 %v2655_v3, %v2652_v7  ;;  %v2590_v28 = vld [vmem:[#allocation2 + $0x34] sm:$0x1]  ;;  %v2876_v19 = vld [vmem:[#allocation2 + $0x4] sm:$0x1] }
 0x239   : > { %v2673_v27 = vshll.u32 %v2588_v56, 16  ;;  %v2631_v31 = vshll.u32 %v2582_v16, 16  ;;  %v2643_v40 = vrot.slane %v2642_v18, 4  ;;  %v2694_v60 = vrot.slane %v2692_v14, 4  ;;  %v2877_v55 = vld [vmem:[#allocation2 + $0x8] sm:$0xe] }
 0x23a   : > { %5561 = vmatpush3.bf16.msra.mxu1 %v5851_v45  ;;  %v2697_v0 = vrot.slane %v2695_v13, 5  ;;  %v2659_v36 = vshll.u32 %v2586_v63, 16  ;;  %v2671_v32 = vrot.slane %v2670_v43, 4  ;;  %v2629_v39 = vrot.slane %v2628_v26, 4  ;;  %v2878_v33 = vld [vmem:[#allocation2 + $0xc] sm:$0x1] }
 0x23b   : > { %5562 = vmatprep.subr.bf16.mxu1 %v5852_v11  ;;  %v2647_v9 = vrot.slane %v2645_v21, 5  ;;  %v2680_v53 = vrot.slane %v2678_v24, 4  ;;  %v2683_v41 = vrot.slane %v2681_v29, 5  ;;  %v2657_v12 = vrot.slane %v2656_v25, 4  ;;  %v5857_v3 = vld [vmem:[%s6975_s3 + $0x98] sm:$0xff]   ;;  %v5858_v18 = vld [vmem:[%s6975_s3 + $0xa0] sm:$0xff]  }
 0x23c   : > { %v2675_v48 = vrot.slane %v2673_v27, 5  ;;  %v2633_v51 = vrot.slane %v2631_v31, 5  ;;  %v2698_v54 = vor.u32 %v2697_v0, %v2694_v60  ;;  %v2661_v52 = vrot.slane %v2659_v36, 5  ;;  %v5859_v56 = vld [vmem:[%s6975_s3 + $0xa8] sm:$0xff]   ;;  %v5860_v14 = vld [vmem:[%s6975_s3 + $0xb0] sm:$0xff]   ;;  %v5861_v16 = vld [vmem:[%s6975_s3 + $0xb8] sm:$0xff]  }
 0x23d   : > { %v2648_v17 = vsel %vm6083_vm5, %v2643_v40, %v2647_v9  ;;  %v2684_v15 = vor.u32 %v2683_v41, %v2680_v53  ;;  %v2701_v61 = vshll.u32 %v2592_v46, 16  ;;  %v2687_v22 = vshll.u32 %v2590_v28, 16  ;;  %v2881_v13 = vld [vmem:[#allocation2 + $0x18] sm:$0xe]  ;;  %v2879_v63 = vld [vmem:[#allocation2 + $0x10] sm:$0xe] }
 0x23e   : > { %5563 = vmatpush3.bf16.msra.mxu1 %v5852_v11  ;;  %v2676_v35 = vsel %vm6083_vm5, %v2671_v32, %v2675_v48  ;;  %v2634_v8 = vsel %vm6083_vm5, %v2629_v39, %v2633_v51  ;;  %v2662_v20 = vsel %vm6083_vm5, %v2657_v12, %v2661_v52  ;;  %v2699_v2 = vrot.slane %v2698_v54, 4  ;;  %v2880_v43 = vld [vmem:[#allocation2 + $0x14] sm:$0x1]  ;;  %v2882_v26 = vld [vmem:[#allocation2 + $0x1c] sm:$0x1]  ;;  %v5862_v36 = vld [vmem:[%s6975_s3 + $0xc0] sm:$0xff]  }
 0x23f   : > { %5564 = vmatprep.subr.bf16.mxu1 %v5853_v4  ;;  %v4921_v49 = vcombine.low %v2634_v8, %v2648_v17  ;;  %v4922_v47 = vcombine.low %v2662_v20, %v2676_v35  ;;  %v4932_v45 = vrot.slane %v2875_v57, 9  ;;  %v2912_v23 = vrot.slane %v2876_v19, 5  ;;  %v2885_v21 = vld [vmem:[#allocation2 + $0x28] sm:$0xe]  ;;  %v2886_v24 = vld [vmem:[#allocation2 + $0x2c] sm:$0x1] }
 0x240   : > { %v4933_v1 = vrot.slane %v2877_v55, 9  ;;  %v2916_v59 = vrot.slane %v2878_v33, 5  ;;  %v2685_v44 = vrot.slane %v2684_v15, 4  ;;  %v2703_v34 = vrot.slane %v2701_v61, 5  ;;  %v2883_v29 = vld [vmem:[#allocation2 + $0x20] sm:$0xe] }
 0x241   : > { %v2689_v50 = vrot.slane %v2687_v22, 5  ;;  %v2913_v58 = vsel %vm6706_vm15, %v4932_v45, %v2912_v23  ;;  %v4935_v25 = vrot.slane %v2881_v13, 9  ;;  %v2924_v27 = vrot.slane %v2882_v26, 5  ;;  %v2889_v41 = vld [vmem:[#allocation2 + $0x38] sm:$0xe]  ;;  %v5863_v51 = vld [vmem:[%s6975_s3 + $0xc8] sm:$0xff]  }
 0x242   : > { %5565 = vmatpush3.bf16.msra.mxu1 %v5853_v4  ;;  %v2704_v11 = vsel %vm6083_vm5, %v2699_v2, %v2703_v34  ;;  %v2917_v38 = vsel %vm6706_vm15, %v4933_v1, %v2916_v59  ;;  %v2884_v4 = vld [vmem:[#allocation2 + $0x24] sm:$0x1]  ;;  %v4937_v31 = vrot.slane %v2885_v21, 9  ;;  %v2932_v40 = vrot.slane %v2886_v24, 5  ;;  %v2887_v17 = vld [vmem:[#allocation2 + $0x30] sm:$0xe] }
 0x243   : > { %5574 = vmatprep.subr.bf16.mxu1 %v5854_v42  ;;  %v2690_v5 = vsel %vm6083_vm5, %v2685_v44, %v2689_v50  ;;  %v4956_v10 = vcombine.low %v2913_v58, %v2917_v38  ;;  %v4934_v60 = vrot.slane %v2879_v63, 9  ;;  %v2920_v0 = vrot.slane %v2880_v43, 5  ;;  %v2888_v54 = vld [vmem:[#allocation2 + $0x34] sm:$0x1]  ;;  %v5866_v33 = vld [vmem:[%s6975_s3 + $0xd8] sm:$0xff]   ;;  %v5867_v20 = vld [vmem:[%s6975_s3 + $0xe0] sm:$0xff]  }
 0x244   : > { %v4923_v7 = vcombine.low %v2690_v5, %v2704_v11  ;;  %v4936_v32 = vrot.slane %v2883_v29, 9  ;;  %v2928_v39 = vrot.slane %v2884_v4, 5  ;;  %v2925_v9 = vsel %vm6706_vm15, %v4935_v25, %v2924_v27  ;;  %v5864_v8 = vld [vmem:[%s6975_s3 + $0xd0] sm:$0xff]   ;;  %v3299_v2 = vld [vmem:[#allocation2 + $0x8] sm:$0xf]  ;;  %v5870_v1 = vld [vmem:[%s6975_s3 + $0xf8] sm:$0xff]  }
 0x245   : > { %5567 = vmatmul.mubr.bf16.vlgmr.msra.gmra.mrb[20].mxu1 %v4921_v49  ;;  %v2933_v53 = vsel %vm6706_vm15, %v4937_v31, %v2932_v40  ;;  %v2921_v12 = vsel %vm6706_vm15, %v4934_v60, %v2920_v0  ;;  %v4939_v52 = vrot.slane %v2889_v41, 9  ;;  %v4938_v28 = vrot.slane %v2887_v17, 9  ;;  %v5865_v49 = vld [vmem:[#allocation2 + $0x8] ss:$8 sps:$4 sm:$0xff]   ;;  %v5872_v50 = vld [vmem:[%s6975_s3 + $0x100] sm:$0xff]   ;;  %v5877_v25 = vld [vmem:[%s6975_s3 + $0x118] sm:$0xff]  }
 0x246   : > { %5570 = vmatprep.mubr.bf16.mxu1 %v4922_v47  ;;  %5575 = vmatpush3.bf16.msra.mxu1 %v5854_v42  ;;  %v2890_v42 = vld [vmem:[#allocation2 + $0x3c] sm:$0x1]  ;;  %v4957_v48 = vcombine.low %v2921_v12, %v2925_v9  ;;  %v2929_v46 = vsel %vm6706_vm15, %v4936_v32, %v2928_v39  ;;  %v2936_v19 = vrot.slane %v2888_v54, 5  ;;  %v3301_v47 = vld [vmem:[#allocation2 + $0x10] sm:$0xf]  ;;  %v3316_v59 = vshrl.u32 %v3299_v2, 16 }
 0x247   : > { %5576 = vmatprep.subr.bf16.mxu1 %v5855_v62  ;;  %v4958_v57 = vcombine.low %v2929_v46, %v2933_v53  ;;  %v2940_v35 = vrot.slane %v2890_v42, 5  ;;  %v5869_v22 = vld [vmem:[%s6975_s3 + $0xf0] sm:$0xff]   ;;  %v3330_v45 = vshrl.u32 %v3301_v47, 16  ;;  %v3333_v23 = vshll.u32 %v3301_v47, 16  ;;  %v5875_v29 = vld [vmem:[#allocation2 + $0x38] ss:$8 sps:$4 sm:$0xff]  }
 0x248   : > { %v2937_v61 = vsel %vm6706_vm15, %v4938_v28, %v2936_v19  ;;  %v3319_v44 = vshll.u32 %v3299_v2, 16  ;;  %v3318_v11 = vrot.slane %v3316_v59, 4  ;;  %v3302_v38 = vld [vmem:[#allocation2 + $0x14] sm:$0x1]  ;;  %v3305_v31 = vld [vmem:[#allocation2 + $0x20] sm:$0xf] }
 0x249   : > { %v2941_v15 = vsel %vm6706_vm15, %v4939_v52, %v2940_v35  ;;  %v3332_v34 = vrot.slane %v3330_v45, 4  ;;  %v5876_v63 = vld [vmem:[%s6975_s3 + $0x110] sm:$0xff]   ;;  %v5878_v60 = vld [vmem:[%s6975_s3 + $0x120] sm:$0xff]   ;;  %v3303_v0 = vld [vmem:[#allocation2 + $0x18] sm:$0xf]  ;;  %v3361_v32 = vshll.u32 %v3305_v31, 16 }
 0x24a   : > { %5577 = vmatpush3.bf16.msra.mxu1 %v5855_v62  ;;  %v4959_v55 = vcombine.low %v2937_v61, %v2941_v15  ;;  %v5868_v62 = vld [vmem:[%s6975_s3 + $0xe8] sm:$0xff]   ;;  %v3321_v58 = vrot.slane %v3319_v44, 5  ;;  %v3309_v40 = vld [vmem:[#allocation2 + $0x30] sm:$0xf]  ;;  %v3344_v41 = vshrl.u32 %v3303_v0, 16  ;;  %v3347_v42 = vshll.u32 %v3303_v0, 16 }
 0x24b   : > { %5578 = vmatprep.subr.bf16.mxu1 %v5856_v30  ;;  %v3307_v39 = vld [vmem:[#allocation2 + $0x28] sm:$0xf]  ;;  %v3386_v9 = vshrl.u32 %v3309_v40, 16  ;;  %v3389_v53 = vshll.u32 %v3309_v40, 16  ;;  %v3363_v17 = vrot.slane %v3361_v32, 5  ;;  %v5880_v35 = vld [vmem:[%s6975_s3 + $0x130] sm:$0xff]  }
 0x24c   : > { %v5879_v12 = vld [vmem:[%s6975_s3 + $0x128] sm:$0xff]   ;;  %v3375_v46 = vshll.u32 %v3307_v39, 16  ;;  %v3313_v52 = vld [vmem:[#allocation2 + $0x40] sm:$0xf]  ;;  %v3346_v28 = vrot.slane %v3344_v41, 4  ;;  %v3349_v19 = vrot.slane %v3347_v42, 5 }
 0x24d   : > { %5571 = vmatmul.mubr.bf16.gmra.mrb[24].mxu1 %v4923_v7  ;;  %v3300_v7 = vld [vmem:[#allocation2 + $0xc] sm:$0x1]  ;;  %v3388_v54 = vrot.slane %v3386_v9, 4  ;;  %v3304_v47 = vld [vmem:[#allocation2 + $0x1c] sm:$0x1] }
 0x24e   : > { %5579 = vmatpush3.bf16.msra.mxu1 %v5856_v30  ;;  %5590 = vmatprep.mubr.bf16.mxu1 %v4956_v10  ;;  %v3335_v30 = vrot.slane %v3333_v23, 5  ;;  %v5874_v10 = vld [vmem:[%s6975_s3 + $0x108] sm:$0xff]   ;;  %v3325_v13 = vshll.u32 %v3300_v7, 16  ;;  %v3377_v61 = vrot.slane %v3375_v46, 5  ;;  %v3350_v2 = vor.u32 %v3349_v19, %v3346_v28  ;;  %v5881_v44 = vld [vmem:[%s6975_s3 + $0x138] sm:$0xff]  }
 0x24f   : > { %5580 = vmatprep.subr.bf16.mxu1 %v5857_v3  ;;  %v3308_v23 = vld [vmem:[#allocation2 + $0x2c] sm:$0x1]  ;;  %v3599_v40 = vld [vmem:[#allocation2 + $0x10] sm:$0xe]  ;;  %v3597_v41 = vld [vmem:[#allocation2 + $0x8] sm:$0xe] }
 0x250   : > { %v3336_v5 = vor.u32 %v3335_v30, %v3332_v34  ;;  %v3327_v21 = vrot.slane %v3325_v13, 5  ;;  %v5883_v32 = vld [vmem:[%s6975_s3 + $0x148] sm:$0xff]  }
 0x251   : > { %v3598_v42 = vld [vmem:[#allocation2 + $0xc] sm:$0x1] }
 0x252   : > { %5581 = vmatpush3.bf16.msra.mxu1 %v5857_v3  ;;  %v5871_v3 = vld [vmem:[#allocation2 + $0x18] ss:$8 sps:$4 sm:$0xff]  }
 0x253   : > { %5582 = vmatprep.subr.bf16.mxu1 %v5858_v18 }
 0x256   : > { %5583 = vmatpush3.bf16.msra.mxu1 %v5858_v18  ;;  %v3322_v18 = vor.u32 %v3321_v58, %v3318_v11 }
 0x257   : > { %5584 = vmatprep.subr.bf16.mxu1 %v5859_v56 }
 0x258   : > { %v3323_v43 = vrot.slane %v3322_v18, 4 }
 0x25a   : > { %5585 = vmatpush3.bf16.msra.mxu1 %v5859_v56  ;;  %v3339_v56 = vshll.u32 %v3302_v38, 16  ;;  %v3328_v4 = vsel %vm6083_vm5, %v3323_v43, %v3327_v21 }
 0x25b   : > { %5586 = vmatprep.subr.bf16.mxu1 %v5860_v14 }
 0x25c   : > { %v3341_v26 = vrot.slane %v3339_v56, 5 }
 0x25e   : > { %5587 = vmatpush3.bf16.msra.mxu1 %v5860_v14  ;;  %v5873_v14 = vld [vmem:[#allocation2 + $0x28] ss:$8 sps:$4 sm:$0xff]  }
 0x25f   : > { %5588 = vmatprep.subr.bf16.mxu1 %v5861_v16 }
 0x262   : > { %5589 = vmatpush3.bf16.msra.mxu1 %v5861_v16  ;;  %v3337_v16 = vrot.slane %v3336_v5, 4  ;;  %v3381_v5 = vshll.u32 %v3308_v23, 16  ;;  %v3601_v23 = vld [vmem:[#allocation2 + $0x18] sm:$0xe] }
 0x263   : > { %5598 = vmatprep.subr.bf16.mxu1 %v5862_v36 }
 0x264   : > { %v3342_v24 = vsel %vm6083_vm5, %v3337_v16, %v3341_v26 }
 0x265   : > { %5591 = vmatmul.mubr.bf16.vlgmr.msra.gmra.mrb[20].mxu1 %v4957_v48  ;;  %v5012_v27 = vcombine.low %v3328_v4, %v3342_v24  ;;  %v3372_v48 = vshrl.u32 %v3307_v39, 16  ;;  %v3383_v24 = vrot.slane %v3381_v5, 5  ;;  %v3312_v4 = vld [vmem:[#allocation2 + $0x3c] sm:$0x1]  ;;  %v5890_v5 = vld [vmem:[%s6975_s3 + $0x180] sm:$0xff]  }
 0x266   : > { %5594 = vmatprep.mubr.bf16.mxu1 %v4958_v57  ;;  %5599 = vmatpush3.bf16.msra.mxu1 %v5862_v36  ;;  %v3358_v36 = vshrl.u32 %v3305_v31, 16  ;;  %v3391_v57 = vrot.slane %v3389_v53, 5  ;;  %v3409_v9 = vshll.u32 %v3312_v4, 16 }
 0x267   : > { %5600 = vmatprep.subr.bf16.mxu1 %v5863_v51  ;;  %v3374_v15 = vrot.slane %v3372_v48, 4 }
 0x269   : > { %v3378_v34 = vor.u32 %v3377_v61, %v3374_v15  ;;  %v5885_v61 = vld [vmem:[%s6975_s3 + $0x158] sm:$0xff]  }
 0x26a   : > { %5601 = vmatpush3.bf16.msra.mxu1 %v5863_v51  ;;  %v3360_v51 = vrot.slane %v3358_v36, 4 }
 0x26b   : > { %5602 = vmatprep.subr.bf16.mxu1 %v5864_v8  ;;  %v3379_v13 = vrot.slane %v3378_v34, 4  ;;  %v3605_v34 = vld [vmem:[#allocation2 + $0x28] sm:$0xe] }
 0x26d   : > { %5595 = vmatmul.mubr.bf16.gmra.mrb[24].mxu1 %v4959_v55  ;;  %v3311_v55 = vld [vmem:[#allocation2 + $0x38] sm:$0xf]  ;;  %v3384_v36 = vsel %vm6083_vm5, %v3379_v13, %v3383_v24 }
 0x26e   : > { %5603 = vmatpush3.bf16.msra.mxu1 %v5864_v8  ;;  %5614 = vmatprep.mubr.bf16.mxu1 %v5865_v49  ;;  %v3306_v8 = vld [vmem:[#allocation2 + $0x24] sm:$0x1]  ;;  %v3310_v49 = vld [vmem:[#allocation2 + $0x34] sm:$0x1]  ;;  %v3403_v59 = vshll.u32 %v3311_v55, 16 }
 0x26f   : > { %5604 = vmatprep.subr.bf16.mxu1 %v5866_v33  ;;  %v3367_v45 = vshll.u32 %v3306_v8, 16  ;;  %v3395_v30 = vshll.u32 %v3310_v49, 16  ;;  %v5887_v49 = vld [vmem:[%s6975_s3 + $0x168] sm:$0xff]  }
 0x270   : > { %v3405_v56 = vrot.slane %v3403_v59, 5 }
 0x271   : > { %v3397_v16 = vrot.slane %v3395_v30, 5  ;;  %v3606_v30 = vld [vmem:[#allocation2 + $0x2c] sm:$0x1] }
 0x272   : > { %5605 = vmatpush3.bf16.msra.mxu1 %v5866_v33  ;;  %v3364_v33 = vor.u32 %v3363_v17, %v3360_v51  ;;  %v5884_v17 = vld [vmem:[%s6975_s3 + $0x150] sm:$0xff]  }
 0x273   : > { %5606 = vmatprep.subr.bf16.mxu1 %v5867_v20 }
 0x274   : > { %v3365_v11 = vrot.slane %v3364_v33, 4  ;;  %v5886_v33 = vld [vmem:[%s6975_s3 + $0x160] sm:$0xff]  }
 0x276   : > { %5607 = vmatpush3.bf16.msra.mxu1 %v5867_v20  ;;  %v3414_v20 = vshrl.u32 %v3313_v52, 16 }
 0x277   : > { %5608 = vmatprep.subr.bf16.mxu1 %v5868_v62 }
 0x278   : > { %v3416_v58 = vrot.slane %v3414_v20, 4  ;;  %v5888_v20 = vld [vmem:[%s6975_s3 + $0x170] sm:$0xff]  }
 0x27a   : > { %5609 = vmatpush3.bf16.msra.mxu1 %v5868_v62  ;;  %v3417_v62 = vshll.u32 %v3313_v52, 16  ;;  %v3411_v52 = vrot.slane %v3409_v9, 5  ;;  %v5896_v9 = vld [vmem:[%s6975_s3 + $0x1a8] sm:$0xff]  }
 0x27b   : > { %5610 = vmatprep.subr.bf16.mxu1 %v5869_v22 }
 0x27c   : > { %v3419_v38 = vrot.slane %v3417_v62, 5  ;;  %v3603_v62 = vld [vmem:[#allocation2 + $0x20] sm:$0xe] }
 0x27d   : > { %v5027_v59 = vrot.slane %v3603_v62, 9 }
 0x27e   : > { %5611 = vmatpush3.bf16.msra.mxu1 %v5869_v22  ;;  %v3392_v22 = vor.u32 %v3391_v57, %v3388_v54  ;;  %v3420_v21 = vor.u32 %v3419_v38, %v3416_v58  ;;  %v5024_v54 = vrot.slane %v3597_v41, 9  ;;  %v3631_v57 = vrot.slane %v3598_v42, 5  ;;  %v5897_v41 = vld [vmem:[%s6975_s3 + $0x1b0] sm:$0xff]  }
 0x27f   : > { %5612 = vmatprep.subr.bf16.mxu1 %v5870_v1  ;;  %v5026_v58 = vrot.slane %v3601_v23, 9  ;;  %v4018_v42 = vld [vmem:[#allocation2 + $0x10] sm:$0xf] }
 0x280   : > { %v3393_v7 = vrot.slane %v3392_v22, 4  ;;  %v3421_v53 = vrot.slane %v3420_v21, 4  ;;  %v3632_v15 = vsel %vm6706_vm15, %v5024_v54, %v3631_v57  ;;  %v3607_v22 = vld [vmem:[#allocation2 + $0x30] sm:$0xe]  ;;  %v3610_v21 = vld [vmem:[#allocation2 + $0x3c] sm:$0x1] }
 0x282   : > { %5613 = vmatpush3.bf16.msra.mxu1 %v5870_v1  ;;  %v3400_v1 = vshrl.u32 %v3311_v55, 16 }
 0x283   : > { %5622 = vmatprep.subr.bf16.mxu1 %v5872_v50 }
 0x284   : > { %v3402_v18 = vrot.slane %v3400_v1, 4  ;;  %v3602_v1 = vld [vmem:[#allocation2 + $0x1c] sm:$0x1] }
 0x285   : > { %5615 = vmatmul.mubr.bf16.vlgmr.msra.gmra.mrb[20].mxu1 %v5871_v3  ;;  %v3351_v3 = vrot.slane %v3350_v2, 4  ;;  %v3608_v2 = vld [vmem:[#allocation2 + $0x34] sm:$0x1]  ;;  %v3639_v38 = vrot.slane %v3602_v1, 5 }
 0x286   : > { %5618 = vmatprep.mubr.bf16.mxu1 %v5873_v14  ;;  %5623 = vmatpush3.bf16.msra.mxu1 %v5872_v50  ;;  %v3353_v50 = vshll.u32 %v3304_v47, 16  ;;  %v5882_v14 = vld [vmem:[%s6975_s3 + $0x140] sm:$0xff]  }
 0x287   : > { %5624 = vmatprep.subr.bf16.mxu1 %v5874_v10  ;;  %v3604_v47 = vld [vmem:[#allocation2 + $0x24] sm:$0x1]  ;;  %v3640_v13 = vsel %vm6706_vm15, %v5026_v58, %v3639_v38  ;;  %v4022_v38 = vld [vmem:[#allocation2 + $0x20] sm:$0xf] }
 0x288   : > { %v3355_v43 = vrot.slane %v3353_v50, 5  ;;  %v5029_v50 = vrot.slane %v3607_v22, 9  ;;  %v5904_v22 = vld [vmem:[%s6975_s3 + $0x1d0] sm:$0xff]   ;;  %v5906_v58 = vld [vmem:[%s6975_s3 + $0x1e0] sm:$0xff]  }
 0x28a   : > { %5625 = vmatpush3.bf16.msra.mxu1 %v5874_v10  ;;  %v3369_v10 = vrot.slane %v3367_v45, 5  ;;  %v5889_v45 = vld [vmem:[%s6975_s3 + $0x178] sm:$0xff]  }
 0x28b   : > { %5626 = vmatprep.subr.bf16.mxu1 %v5876_v63 }
 0x28c   : > { %v3370_v26 = vsel %vm6083_vm5, %v3365_v11, %v3369_v10  ;;  %v3651_v11 = vrot.slane %v3608_v2, 5 }
 0x28d   : > { %5619 = vmatmul.mubr.bf16.gmra.mrb[24].mxu1 %v5875_v29  ;;  %v3398_v29 = vsel %vm6083_vm5, %v3393_v7, %v3397_v16  ;;  %v5028_v7 = vrot.slane %v3605_v34, 9  ;;  %v5905_v34 = vld [vmem:[%s6975_s3 + $0x1d8] sm:$0xff]  }
 0x28e   : > { %5627 = vmatpush3.bf16.msra.mxu1 %v5876_v63  ;;  %5638 = vmatprep.mubr.bf16.mxu1 %v5012_v27  ;;  %v3314_v63 = vld [vmem:[#allocation2 + $0x44] sm:$0x1]  ;;  %v3406_v27 = vor.u32 %v3405_v56, %v3402_v18  ;;  %v5014_v39 = vcombine.low %v3384_v36, %v3398_v29  ;;  %v3652_v18 = vsel %vm6706_vm15, %v5029_v50, %v3651_v11  ;;  %v3611_v56 = vld [vmem:[#allocation2 + $0x40] sm:$0xe]  ;;  %v5894_v36 = vld [vmem:[%s6975_s3 + $0x198] sm:$0xff]  }
 0x28f   : > { %5628 = vmatprep.subr.bf16.mxu1 %v5877_v25  ;;  %v3423_v31 = vshll.u32 %v3314_v63, 16  ;;  %v5031_v29 = vrot.slane %v3611_v56, 9  ;;  %v4024_v50 = vld [vmem:[#allocation2 + $0x28] sm:$0xf]  ;;  %v4028_v11 = vld [vmem:[#allocation2 + $0x38] sm:$0xf] }
 0x290   : > { %v3407_v46 = vrot.slane %v3406_v27, 4  ;;  %v3655_v27 = vrot.slane %v3610_v21, 5  ;;  %v4063_v56 = vshrl.u32 %v4022_v38, 16 }
 0x291   : > { %v3425_v51 = vrot.slane %v3423_v31, 5  ;;  %v5892_v31 = vld [vmem:[%s6975_s3 + $0x190] sm:$0xff]  }
 0x292   : > { %5629 = vmatpush3.bf16.msra.mxu1 %v5877_v25  ;;  %v3356_v25 = vsel %vm6083_vm5, %v3351_v3, %v3355_v43  ;;  %v3412_v19 = vsel %vm6083_vm5, %v3407_v46, %v3411_v52  ;;  %v3647_v3 = vrot.slane %v3606_v30, 5  ;;  %v5891_v43 = vld [vmem:[%s6975_s3 + $0x188] sm:$0xff]   ;;  %v5898_v46 = vld [vmem:[%s6975_s3 + $0x1b8] sm:$0xff]   ;;  %v5900_v52 = vld [vmem:[%s6975_s3 + $0x1c0] sm:$0xff]  }
 0x293   : > { %5630 = vmatprep.subr.bf16.mxu1 %v5878_v60  ;;  %v5013_v0 = vcombine.low %v3356_v25, %v3370_v26  ;;  %v3609_v26 = vld [vmem:[#allocation2 + $0x38] sm:$0xe] }
 0x294   : > { %v3648_v63 = vsel %vm6706_vm15, %v5028_v7, %v3647_v3  ;;  %v5030_v25 = vrot.slane %v3609_v26, 9  ;;  %v4080_v7 = vshll.u32 %v4024_v50, 16  ;;  %v4026_v3 = vld [vmem:[#allocation2 + $0x30] sm:$0xf] }
 0x295   : > { %v5050_v24 = vcombine.low %v3648_v63, %v3652_v18  ;;  %v4108_v18 = vshll.u32 %v4028_v11, 16  ;;  %v4094_v63 = vshll.u32 %v4026_v3, 16 }
 0x296   : > { %5631 = vmatpush3.bf16.msra.mxu1 %v5878_v60  ;;  %v3600_v60 = vld [vmem:[#allocation2 + $0x14] sm:$0x1]  ;;  %v4082_v26 = vrot.slane %v4080_v7, 5  ;;  %v5911_v7 = vld [vmem:[%s6975_s3 + $0x208] sm:$0xff]  }
 0x297   : > { %5632 = vmatprep.subr.bf16.mxu1 %v5879_v12  ;;  %v3635_v48 = vrot.slane %v3600_v60, 5  ;;  %v3656_v60 = vsel %vm6706_vm15, %v5030_v25, %v3655_v27  ;;  %v4065_v25 = vrot.slane %v4063_v56, 4 }
 0x29a   : > { %5633 = vmatpush3.bf16.msra.mxu1 %v5879_v12  ;;  %v5025_v12 = vrot.slane %v3599_v40, 9 }
 0x29b   : > { %5634 = vmatprep.subr.bf16.mxu1 %v5880_v35 }
 0x29c   : > { %v3636_v28 = vsel %vm6706_vm15, %v5025_v12, %v3635_v48 }
 0x29d   : > { %v5048_v55 = vcombine.low %v3632_v15, %v3636_v28  ;;  %v4019_v15 = vld [vmem:[#allocation2 + $0x14] sm:$0x1] }
 0x29e   : > { %5635 = vmatpush3.bf16.msra.mxu1 %v5880_v35  ;;  %v3426_v35 = vsel %vm6083_vm5, %v3421_v53, %v3425_v51  ;;  %v4020_v53 = vld [vmem:[#allocation2 + $0x18] sm:$0xf]  ;;  %v4035_v51 = vshrl.u32 %v4018_v42, 16  ;;  %v4044_v62 = vshll.u32 %v4019_v15, 16 }
 0x29f   : > { %5636 = vmatprep.subr.bf16.mxu1 %v5881_v44  ;;  %v5015_v8 = vcombine.low %v3412_v19, %v3426_v35  ;;  %v4049_v12 = vshrl.u32 %v4020_v53, 16  ;;  %v4052_v48 = vshll.u32 %v4020_v53, 16  ;;  %v4021_v19 = vld [vmem:[#allocation2 + $0x1c] sm:$0x1]  ;;  %v4023_v53 = vld [vmem:[#allocation2 + $0x24] sm:$0x1] }
 0x2a0   : > { %v4037_v35 = vrot.slane %v4035_v51, 4  ;;  %v4046_v23 = vrot.slane %v4044_v62, 5  ;;  %v5910_v62 = vld [vmem:[%s6975_s3 + $0x200] sm:$0xff]  }
 0x2a1   : > { %v4051_v54 = vrot.slane %v4049_v12, 4  ;;  %v4054_v57 = vrot.slane %v4052_v48, 5  ;;  %v4027_v48 = vld [vmem:[#allocation2 + $0x34] sm:$0x1] }
 0x2a2   : > { %5637 = vmatpush3.bf16.msra.mxu1 %v5881_v44  ;;  %v3643_v44 = vrot.slane %v3604_v47, 5 }
 0x2a3   : > { %5646 = vmatprep.subr.bf16.mxu1 %v5882_v14 }
 0x2a4   : > { %v3644_v10 = vsel %vm6706_vm15, %v5027_v59, %v3643_v44  ;;  %v5903_v59 = vld [vmem:[#allocation2 + $0x40] ss:$8 sps:$4 sm:$0xff]  }
 0x2a5   : > { %5639 = vmatmul.mubr.bf16.vlgmr.msra.gmra.mrb[20].mxu1 %v5013_v0  ;;  %v5049_v16 = vcombine.low %v3640_v13, %v3644_v10  ;;  %v4105_v10 = vshrl.u32 %v4028_v11, 16  ;;  %v5907_v13 = vld [vmem:[%s6975_s3 + $0x1e8] sm:$0xff]   ;;  %v4318_v11 = vld [vmem:[#allocation2 + $0x18] sm:$0xe] }
 0x2a6   : > { %5642 = vmatprep.mubr.bf16.mxu1 %v5014_v39  ;;  %5647 = vmatpush3.bf16.msra.mxu1 %v5882_v14  ;;  %v3612_v14 = vld [vmem:[#allocation2 + $0x44] sm:$0x1] }
 0x2a7   : > { %5648 = vmatprep.subr.bf16.mxu1 %v5883_v32  ;;  %v3659_v4 = vrot.slane %v3612_v14, 5  ;;  %v5895_v39 = vld [vmem:[%s6975_s3 + $0x1a0] sm:$0xff]   ;;  %v4066_v14 = vshll.u32 %v4022_v38, 16  ;;  %v4107_v21 = vrot.slane %v4105_v10, 4 }
 0x2a9   : > { %v3660_v40 = vsel %vm6706_vm15, %v5031_v29, %v3659_v4  ;;  %v4032_v29 = vld [vmem:[#allocation2 + $0x48] sm:$0xf]  ;;  %v4025_v4 = vld [vmem:[#allocation2 + $0x2c] sm:$0x1]  ;;  %v4068_v27 = vrot.slane %v4066_v14, 5 }
 0x2aa   : > { %5649 = vmatpush3.bf16.msra.mxu1 %v5883_v32  ;;  %v5051_v0 = vcombine.low %v3656_v60, %v3660_v40  ;;  %v5893_v32 = vld [vmem:[#allocation2 + $0x10] ss:$8 sps:$4 sm:$0xff]   ;;  %v4096_v60 = vrot.slane %v4094_v63, 5  ;;  %v4086_v12 = vshll.u32 %v4025_v4, 16 }
 0x2ab   : > { %5650 = vmatprep.subr.bf16.mxu1 %v5884_v17 }
 0x2ad   : > { %5643 = vmatmul.mubr.bf16.gmra.mrb[24].mxu1 %v5015_v8  ;;  %v4055_v8 = vor.u32 %v4054_v57, %v4051_v54 }
 0x2ae   : > { %5651 = vmatpush3.bf16.msra.mxu1 %v5884_v17  ;;  %5662 = vmatprep.mubr.bf16.mxu1 %v5048_v55  ;;  %v4038_v17 = vshll.u32 %v4018_v42, 16  ;;  %v5902_v55 = vld [vmem:[%s6975_s3 + $0x1c8] sm:$0xff]   ;;  %v4069_v42 = vor.u32 %v4068_v27, %v4065_v25 }
 0x2af   : > { %5652 = vmatprep.subr.bf16.mxu1 %v5885_v61  ;;  %v4056_v47 = vrot.slane %v4055_v8, 4  ;;  %v4100_v8 = vshll.u32 %v4027_v48, 16  ;;  %v4321_v48 = vld [vmem:[#allocation2 + $0x24] sm:$0x1] }
 0x2b0   : > { %v4040_v28 = vrot.slane %v4038_v17, 5  ;;  %v5909_v17 = vld [vmem:[%s6975_s3 + $0x1f8] sm:$0xff]  }
 0x2b2   : > { %5653 = vmatpush3.bf16.msra.mxu1 %v5885_v61  ;;  %v5899_v61 = vld [vmem:[#allocation2 + $0x20] ss:$8 sps:$4 sm:$0xff]  }
 0x2b3   : > { %5654 = vmatprep.subr.bf16.mxu1 %v5886_v33 }
 0x2b6   : > { %5655 = vmatpush3.bf16.msra.mxu1 %v5886_v33  ;;  %v4041_v33 = vor.u32 %v4040_v28, %v4037_v35 }
 0x2b7   : > { %5656 = vmatprep.subr.bf16.mxu1 %v5887_v49 }
 0x2b8   : > { %v4042_v2 = vrot.slane %v4041_v33, 4  ;;  %v4088_v33 = vrot.slane %v4086_v12, 5  ;;  %v4320_v12 = vld [vmem:[#allocation2 + $0x20] sm:$0xe] }
 0x2ba   : > { %5657 = vmatpush3.bf16.msra.mxu1 %v5887_v49  ;;  %v4058_v49 = vshll.u32 %v4021_v19, 16  ;;  %v4047_v44 = vsel %vm6083_vm5, %v4042_v2, %v4046_v23 }
 0x2bb   : > { %5658 = vmatprep.subr.bf16.mxu1 %v5888_v20 }
 0x2be   : > { %5659 = vmatpush3.bf16.msra.mxu1 %v5888_v20  ;;  %v5901_v20 = vld [vmem:[#allocation2 + $0x30] ss:$8 sps:$4 sm:$0xff]  }
 0x2bf   : > { %5660 = vmatprep.subr.bf16.mxu1 %v5889_v45 }
 0x2c2   : > { %5661 = vmatpush3.bf16.msra.mxu1 %v5889_v45  ;;  %v4060_v45 = vrot.slane %v4058_v49, 5 }
 0x2c3   : > { %5670 = vmatprep.subr.bf16.mxu1 %v5890_v5 }
 0x2c4   : > { %v4061_v1 = vsel %vm6083_vm5, %v4056_v47, %v4060_v45 }
 0x2c5   : > { %5663 = vmatmul.mubr.bf16.vlgmr.msra.gmra.mrb[20].mxu1 %v5049_v16  ;;  %v5104_v30 = vcombine.low %v4047_v44, %v4061_v1  ;;  %v4091_v16 = vshrl.u32 %v4026_v3, 16  ;;  %v4316_v3 = vld [vmem:[#allocation2 + $0x10] sm:$0xe] }
 0x2c6   : > { %5666 = vmatprep.mubr.bf16.mxu1 %v5050_v24  ;;  %5671 = vmatpush3.bf16.msra.mxu1 %v5890_v5  ;;  %v4077_v5 = vshrl.u32 %v4024_v50, 16  ;;  %v4110_v24 = vrot.slane %v4108_v18, 5 }
 0x2c7   : > { %5672 = vmatprep.subr.bf16.mxu1 %v5891_v43  ;;  %v4093_v40 = vrot.slane %v4091_v16, 4  ;;  %v5117_v16 = vrot.slane %v4318_v11, 9 }
 0x2c9   : > { %v4097_v54 = vor.u32 %v4096_v60, %v4093_v40  ;;  %v5913_v60 = vld [vmem:[%s6975_s3 + $0x218] sm:$0xff]  }
 0x2ca   : > { %5673 = vmatpush3.bf16.msra.mxu1 %v5891_v43  ;;  %v4079_v43 = vrot.slane %v4077_v5, 4 }
 0x2cb   : > { %5674 = vmatprep.subr.bf16.mxu1 %v5892_v31  ;;  %v4098_v47 = vrot.slane %v4097_v54, 4  ;;  %v4325_v54 = vld [vmem:[#allocation2 + $0x34] sm:$0x1] }
 0x2cd   : > { %5667 = vmatmul.mubr.bf16.gmra.mrb[24].mxu1 %v5051_v0  ;;  %v4030_v0 = vld [vmem:[#allocation2 + $0x40] sm:$0xf] }
 0x2ce   : > { %5675 = vmatpush3.bf16.msra.mxu1 %v5892_v31  ;;  %5686 = vmatprep.mubr.bf16.mxu1 %v5893_v32  ;;  %v5908_v31 = vld [vmem:[%s6975_s3 + $0x1f0] sm:$0xff]   ;;  %v4029_v32 = vld [vmem:[#allocation2 + $0x3c] sm:$0x1]  ;;  %v4122_v51 = vshll.u32 %v4030_v0, 16 }
 0x2cf   : > { %5676 = vmatprep.subr.bf16.mxu1 %v5894_v36  ;;  %v4114_v57 = vshll.u32 %v4029_v32, 16  ;;  %v5916_v32 = vld [vmem:[%s6975_s3 + $0x230] sm:$0xff]  }
 0x2d2   : > { %5677 = vmatpush3.bf16.msra.mxu1 %v5894_v36  ;;  %v4083_v36 = vor.u32 %v4082_v26, %v4079_v43  ;;  %v5912_v26 = vld [vmem:[%s6975_s3 + $0x210] sm:$0xff]  }
 0x2d3   : > { %5678 = vmatprep.subr.bf16.mxu1 %v5895_v39 }
 0x2d4   : > { %v4084_v35 = vrot.slane %v4083_v36, 4  ;;  %v5914_v36 = vld [vmem:[%s6975_s3 + $0x220] sm:$0xff]  }
 0x2d6   : > { %5679 = vmatpush3.bf16.msra.mxu1 %v5895_v39  ;;  %v4133_v39 = vshrl.u32 %v4032_v29, 16  ;;  %v4089_v45 = vsel %vm6083_vm5, %v4084_v35, %v4088_v33  ;;  %v5118_v35 = vrot.slane %v4320_v12, 9  ;;  %v4331_v33 = vld [vmem:[#allocation2 + $0x4c] sm:$0x1] }
 0x2d7   : > { %5680 = vmatprep.subr.bf16.mxu1 %v5896_v9 }
 0x2d8   : > { %v4135_v28 = vrot.slane %v4133_v39, 4  ;;  %v4322_v39 = vld [vmem:[#allocation2 + $0x28] sm:$0xe] }
 0x2da   : > { %5681 = vmatpush3.bf16.msra.mxu1 %v5896_v9  ;;  %v4136_v9 = vshll.u32 %v4032_v29, 16 }
 0x2db   : > { %5682 = vmatprep.subr.bf16.mxu1 %v5897_v41 }
 0x2dc   : > { %v4138_v19 = vrot.slane %v4136_v9, 5  ;;  %v4323_v9 = vld [vmem:[#allocation2 + $0x2c] sm:$0x1] }
 0x2de   : > { %5683 = vmatpush3.bf16.msra.mxu1 %v5897_v41  ;;  %v4111_v41 = vor.u32 %v4110_v24, %v4107_v21  ;;  %v4139_v23 = vor.u32 %v4138_v19, %v4135_v28  ;;  %v5116_v21 = vrot.slane %v4316_v3, 9  ;;  %v4358_v28 = vrot.slane %v4321_v48, 5 }
 0x2df   : > { %5684 = vmatprep.subr.bf16.mxu1 %v5898_v46 }
 0x2e0   : > { %v4112_v15 = vrot.slane %v4111_v41, 4  ;;  %v4140_v56 = vrot.slane %v4139_v23, 4  ;;  %v4327_v41 = vld [vmem:[#allocation2 + $0x3c] sm:$0x1]  ;;  %v4378_v23 = vrot.slane %v4331_v33, 5 }
 0x2e2   : > { %5685 = vmatpush3.bf16.msra.mxu1 %v5898_v46  ;;  %v4119_v46 = vshrl.u32 %v4030_v0, 16 }
 0x2e3   : > { %5694 = vmatprep.subr.bf16.mxu1 %v5900_v52 }
 0x2e4   : > { %v4121_v49 = vrot.slane %v4119_v46, 4  ;;  %v5119_v46 = vrot.slane %v4322_v39, 9 }
 0x2e5   : > { %5687 = vmatmul.mubr.bf16.vlgmr.msra.gmra.mrb[20].mxu1 %v5899_v61  ;;  %v4033_v61 = vld [vmem:[#allocation2 + $0x4c] sm:$0x1] }
 0x2e6   : > { %5690 = vmatprep.mubr.bf16.mxu1 %v5901_v20  ;;  %5695 = vmatpush3.bf16.msra.mxu1 %v5900_v52  ;;  %v4072_v52 = vshll.u32 %v4023_v53, 16  ;;  %v4124_v20 = vrot.slane %v4122_v51, 5  ;;  %v4142_v1 = vshll.u32 %v4033_v61, 16  ;;  %v4326_v53 = vld [vmem:[#allocation2 + $0x38] sm:$0xe]  ;;  %v4362_v51 = vrot.slane %v4323_v9, 5 }
 0x2e7   : > { %5696 = vmatprep.subr.bf16.mxu1 %v5902_v55 }
 0x2e8   : > { %v4074_v2 = vrot.slane %v4072_v52, 5  ;;  %v4125_v50 = vor.u32 %v4124_v20, %v4121_v49  ;;  %v4144_v14 = vrot.slane %v4142_v1, 5  ;;  %v4370_v52 = vrot.slane %v4327_v41, 5 }
 0x2e9   : > { %v4359_v49 = vsel %vm6706_vm15, %v5118_v35, %v4358_v28 }
 0x2ea   : > { %5697 = vmatpush3.bf16.msra.mxu1 %v5902_v55  ;;  %v4070_v55 = vrot.slane %v4069_v42, 4  ;;  %v4126_v43 = vrot.slane %v4125_v50, 4  ;;  %v4145_v4 = vsel %vm6083_vm5, %v4140_v56, %v4144_v14  ;;  %v5917_v42 = vld [vmem:[%s6975_s3 + $0x238] sm:$0xff]   ;;  %v5152_v50 = vld [vmem:[%s6976_s4] ss:$0 sm:$0xff] }
 0x2eb   : > { %5698 = vmatprep.subr.bf16.mxu1 %v5904_v22 }
 0x2ed   : > { %5691 = vmatmul.mubr.bf16.gmra.mrb[24].mxu1 %v5903_v59  ;;  %v4102_v59 = vrot.slane %v4100_v8, 5  ;;  %v4366_v8 = vrot.slane %v4325_v54, 5 }
 0x2ee   : > { %5699 = vmatpush3.bf16.msra.mxu1 %v5904_v22  ;;  %5710 = vmatprep.mubr.bf16.mxu1 %v5104_v30  ;;  %v4116_v22 = vrot.slane %v4114_v57, 5  ;;  %v4075_v30 = vsel %vm6083_vm5, %v4070_v55, %v4074_v2  ;;  %v5121_v57 = vrot.slane %v4326_v53, 9  ;;  %v4330_v55 = vld [vmem:[#allocation2 + $0x48] sm:$0xe] }
 0x2ef   : > { %5700 = vmatprep.subr.bf16.mxu1 %v5905_v34  ;;  %v5105_v38 = vcombine.low %v4075_v30, %v4089_v45  ;;  %v4103_v5 = vsel %vm6083_vm5, %v4098_v47, %v4102_v59  ;;  %v4328_v47 = vld [vmem:[#allocation2 + $0x40] sm:$0xe]  ;;  %v5123_v45 = vrot.slane %v4330_v55, 9 }
 0x2f0   : > { %v4117_v44 = vsel %vm6083_vm5, %v4112_v15, %v4116_v22  ;;  %v4363_v15 = vsel %vm6706_vm15, %v5119_v46, %v4362_v51  ;;  %v4371_v61 = vsel %vm6706_vm15, %v5121_v57, %v4370_v52  ;;  %v4329_v22 = vld [vmem:[#allocation2 + $0x44] sm:$0x1]  ;;  %v5122_v1 = vrot.slane %v4328_v47, 9 }
 0x2f1   : > { %v5106_v10 = vcombine.low %v4103_v5, %v4117_v44  ;;  %v5141_v20 = vcombine.low %v4359_v49, %v4363_v15  ;;  %v4374_v59 = vrot.slane %v4329_v22, 5  ;;  %v4379_v44 = vsel %vm6706_vm15, %v5123_v45, %v4378_v23 }
 0x2f2   : > { %5701 = vmatpush3.bf16.msra.mxu1 %v5905_v34  ;;  %v4031_v34 = vld [vmem:[#allocation2 + $0x44] sm:$0x1] }
 0x2f3   : > { %5702 = vmatprep.subr.bf16.mxu1 %v5906_v58  ;;  %v4128_v18 = vshll.u32 %v4031_v34, 16  ;;  %v4375_v34 = vsel %vm6706_vm15, %v5122_v1, %v4374_v59 }
 0x2f4   : > { %v5143_v30 = vcombine.low %v4375_v34, %v4379_v44 }
 0x2f5   : > { %v4130_v29 = vrot.slane %v4128_v18, 5 }
 0x2f6   : > { %5703 = vmatpush3.bf16.msra.mxu1 %v5906_v58  ;;  %v4319_v58 = vld [vmem:[#allocation2 + $0x1c] sm:$0x1] }
 0x2f7   : > { %5704 = vmatprep.subr.bf16.mxu1 %v5907_v13  ;;  %v4354_v63 = vrot.slane %v4319_v58, 5  ;;  %v4131_v27 = vsel %vm6083_vm5, %v4126_v43, %v4130_v29 }
 0x2f9   : > { %v4355_v25 = vsel %vm6706_vm15, %v5117_v16, %v4354_v63 }
 0x2fa   : > { %5705 = vmatpush3.bf16.msra.mxu1 %v5907_v13  ;;  %v4317_v13 = vld [vmem:[#allocation2 + $0x14] sm:$0x1] }
 0x2fb   : > { %5706 = vmatprep.subr.bf16.mxu1 %v5908_v31  ;;  %v4350_v24 = vrot.slane %v4317_v13, 5 }
 0x2fd   : > { %v4351_v40 = vsel %vm6706_vm15, %v5116_v21, %v4350_v24 }
 0x2fe   : > { %5707 = vmatpush3.bf16.msra.mxu1 %v5908_v31  ;;  %v5107_v31 = vcombine.low %v4131_v27, %v4145_v4  ;;  %v5140_v0 = vcombine.low %v4351_v40, %v4355_v25 }
 0x2ff   : > { %5708 = vmatprep.subr.bf16.mxu1 %v5909_v17 }
 0x302   : > { %5709 = vmatpush3.bf16.msra.mxu1 %v5909_v17  ;;  %v4324_v17 = vld [vmem:[#allocation2 + $0x30] sm:$0xe] }
 0x303   : > { %5718 = vmatprep.subr.bf16.mxu1 %v5910_v62  ;;  %v5120_v19 = vrot.slane %v4324_v17, 9 }
 0x305   : > { %5711 = vmatmul.mubr.bf16.vlgmr.msra.gmra.mrb[20].mxu1 %v5105_v38 }
 0x306   : > { %5714 = vmatprep.mubr.bf16.mxu1 %v5106_v10  ;;  %5719 = vmatpush3.bf16.msra.mxu1 %v5910_v62  ;;  %v4367_v62 = vsel %vm6706_vm15, %v5120_v19, %v4366_v8 }
 0x307   : > { %5720 = vmatprep.subr.bf16.mxu1 %v5911_v7  ;;  %v5142_v2 = vcombine.low %v4367_v62, %v4371_v61 }
 0x30a   : > { %5721 = vmatpush3.bf16.msra.mxu1 %v5911_v7 }
 0x30b   : > { %5722 = vmatprep.subr.bf16.mxu1 %v5912_v26 }
 0x30d   : > { %5715 = vmatmul.mubr.bf16.gmra.mrb[24].mxu1 %v5107_v31 }
 0x30e   : > { %5723 = vmatpush3.bf16.msra.mxu1 %v5912_v26  ;;  %5734 = vmatprep.mubr.bf16.mxu1 %v5140_v0 }
 0x30f   : > { %5724 = vmatprep.subr.bf16.mxu1 %v5913_v60 }
 0x312   : > { %5725 = vmatpush3.bf16.msra.mxu1 %v5913_v60 }
 0x313   : > { %5726 = vmatprep.subr.bf16.mxu1 %v5914_v36 }
 0x316   : > { %5727 = vmatpush3.bf16.msra.mxu1 %v5914_v36 }
 0x317   : > { %5728 = vmatprep.subr.bf16.mxu1 %v5915_v6 }
 0x31a   : > { %5729 = vmatpush3.bf16.msra.mxu1 %v5915_v6 }
 0x31b   : > { %5730 = vmatprep.subr.bf16.mxu1 %v5916_v32 }
 0x31e   : > { %5731 = vmatpush3.bf16.msra.mxu1 %v5916_v32 }
 0x31f   : > { %5732 = vmatprep.subr.bf16.mxu1 %v5917_v42 }
 0x322   : > { %5733 = vmatpush3.bf16.msra.mxu1 %v5917_v42 }
 0x325   : > { %5735 = vmatmul.mubr.bf16.vlgmr.msra.gmra.mrb[20].mxu1 %v5141_v20 }
 0x326   : > { %5738 = vmatprep.mubr.bf16.mxu1 %v5142_v2 }
 0x32d   : > { %5739 = vmatmul.mubr.bf16.gmra.mrb[24].mxu1 %v5143_v30 }
 0x3f8   : > { %v5736_v11 = vpop.f32.mrb[20].mxu1 }
 0x3f9   : > { %v4567_v58 = vadd.f32 %v5736_v11, %v5152_v50  ;;  %v4495_v38 = vpop.f32.mrb[21].mxu1 }
 0x3fa   : > { %v4565_v5 = vadd.f32 %v5152_v50, %v4495_v38  ;;  %v5737_v7 = vpop.f32.mrb[22].mxu1 }
 0x3fb   : > { %4575 = vst [vmem:[%s246_s27 + $0x10] sm:$0xff] %v4567_v58  ;;  %v4568_v3 = vadd.f32 %v5737_v7, %v5152_v50  ;;  %v4498_v37 = vpop.f32.mrb[23].mxu1 }
 0x3fc   : > { %4573 = vst [vmem:[%s246_s27] sm:$0xff] %v4565_v5  ;;  %v4566_v10 = vadd.f32 %v5152_v50, %v4498_v37 }
 0x3fd   : > { %4576 = vst [vmem:[%s246_s27 + $0x18] sm:$0xff] %v4568_v3 }
 0x3fe   : > { %4574 = vst [vmem:[%s246_s27 + $0x8] sm:$0xff] %v4566_v10 }
 0x400   : > { %v5740_v18 = vpop.f32.mrb[24].mxu1 }
 0x401   : > { %v4571_v56 = vadd.f32 %v5740_v18, %v5152_v50  ;;  %v4511_v14 = vpop.f32.mrb[25].mxu1 }
 0x402   : > { %v4569_v13 = vadd.f32 %v5152_v50, %v4511_v14  ;;  %v5741_v16 = vpop.f32.mrb[26].mxu1 }
 0x403   : > { %4579 = vst [vmem:[%s246_s27 + $0x30] sm:$0xff] %v4571_v56  ;;  %v4572_v63 = vadd.f32 %v5741_v16, %v5152_v50  ;;  %v4514_v43 = vpop.f32.mrb[27].mxu1 }
 0x404   : > { %4577 = vst [vmem:[%s246_s27 + $0x20] sm:$0xff] %v4569_v13  ;;  %v4570_v26 = vadd.f32 %v5152_v50, %v4514_v43 }
 0x405   : > { %4580 = vst [vmem:[%s246_s27 + $0x38] sm:$0xff] %v4572_v63 }
 0x406   : > { %4578 = vst [vmem:[%s246_s27 + $0x28] sm:$0xff] %v4570_v26 }
 0x407 PF: > { %s15_s20 = sadd.s32 1, %s5940_s20   ;;  %s6988_s18 = smov %s5936_s19 }
 0x408   : > { %p12_p5 = scmp.ge.s32.totalorder %s15_s20, 4   ;;  %s6989_s19 = smov %s6991_s21 }
 0x40a   :  { %14 = sbr.rel (!%p12_p5) target bundleno = 2 (0x2), region = 99 }

</bundles_post_ra>
